<compile_context>
chip_gen: v5e
topology: v5e:2x2
jax: 0.10.0
libtpu: 0.0.40
codegen_flags: <defaults>
</compile_context>

<pallas_src>
import functools

import jax
import jax.numpy as jnp
from jax.experimental import pallas as pl
from jax.experimental.pallas import tpu as pltpu


def _round_up(x, m):
    return (x + m - 1) // m * m


def _cnn_fused_kernel(x_ref, w_ref, b_ref, o_ref, *, L, Fp):
    """One batch block of Conv1d + bias + ReLU + full-length max-pool.

    x_ref: (Bt, C*M)    bf16  (lane-dense, flattened NCL tile)
    w_ref: (C*M, L*Fp)  bf16  block-Toeplitz conv weight (resident)
    b_ref: (1, Fp)      f32
    o_ref: (Bt, Fp)     f32
    """
    # Single deep MXU contraction: y[b, t*Fp + f] = conv[b, t, f].
    y = jnp.dot(x_ref[...], w_ref[...],
                preferred_element_type=jnp.float32)          # (Bt, L*Fp) f32

    # Max over the L conv positions as lane-aligned 128-wide slab maxima
    # (pure VPU, no sublane reduce, no relayout).
    pooled = y[:, 0:Fp]
    for t in range(1, L):
        pooled = jnp.maximum(pooled, y[:, t * Fp:(t + 1) * Fp])

    # Equals max_t(relu(conv + bias)): bias is position-independent, ReLU monotone.
    o_ref[...] = jnp.maximum(pooled + b_ref[...], 0.0)       # f32 epilogue (v5e-safe)


def _choose_block_b(B, desired, per_row_bytes, vmem_budget=12 << 20):
    """Pick the batch block: big (amortize ~0.35us/step), VMEM-capped, and with an
    even grid length when possible so both v7x TensorCores get work."""
    cap = min(desired, B, max(8, vmem_budget // max(1, per_row_bytes)))
    cap = max(1, cap)
    best_any = None
    for bb in range(cap, 0, -1):
        if B % bb or bb % 8:
            continue
        if (B // bb) % 2 == 0:            # even grid -> megacore-friendly on v7x
            return bb
        if best_any is None:
            best_any = bb
    if best_any is not None:
        return best_any
    # No multiple-of-8 divisor <= cap: a full-extent batch block is always legal.
    return B


def cnn_forward(x_ncl, weight_fck, bias_f, *, block_b=128):
    """Fused Conv1d -> ReLU -> MaxPool1d(M-K+1) -> squeeze.

    x_ncl:      (B, C, M) float32  (PyTorch Conv1d NCL layout)
    weight_fck: (F, C, K) float32  (PyTorch Conv1d weight layout)
    bias_f:     (F,)      float32
    Returns (B, F) float32, or (F,) if B == 1 (matching torch .squeeze()).
    """
    B, C, M = x_ncl.shape
    F, C_w, K = weight_fck.shape
    assert C_w == C, (C_w, C)
    L = M - K + 1
    assert L >= 1, f"maxLengthOfWords ({M}) must be >= kernel size ({K})"

    CM = C * M
    Fp = _round_up(F, 128)                     # lane-dense output columns

    # --- lane-dense bf16 input: (B, C, M) -> (B, C*M), cast once in the wrapper.
    x2d = x_ncl.astype(jnp.bfloat16).reshape(B, CM)

    # --- block-Toeplitz weight: W_big[c*M + m, t*Fp + f] = w[f, c, m - t]
    #     for 0 <= m - t < K, else 0.  Built once per call (~C*M x L*Fp bf16).
    w_ckf = jnp.transpose(weight_fck.astype(jnp.float32), (1, 2, 0))   # (C, K, F)
    w_ckf = jnp.pad(w_ckf, ((0, 0), (0, 0), (0, Fp - F)))              # (C, K, Fp)
    slabs = []
    for t in range(L):
        s = jnp.pad(w_ckf, ((0, 0), (t, M - K - t), (0, 0)))           # (C, M, Fp)
        slabs.append(s.reshape(CM, Fp))
    w_big = jnp.concatenate(slabs, axis=1).astype(jnp.bfloat16)        # (CM, L*Fp)

    b_col = jnp.pad(bias_f.astype(jnp.float32), (0, Fp - F)).reshape(1, Fp)

    # Per-batch-row VMEM footprint (x double-buffered + matmul result + output).
    per_row_bytes = CM * 2 * 2 + L * Fp * 4 + Fp * 4 * 2
    Bt = _choose_block_b(B, block_b, per_row_bytes)

    kernel = functools.partial(_cnn_fused_kernel, L=L, Fp=Fp)

    out = pl.pallas_call(
        kernel,
        out_shape=jax.ShapeDtypeStruct((B, Fp), jnp.float32),
        grid=(B // Bt,),
        in_specs=[
            pl.BlockSpec((Bt, CM), lambda i: (i, 0)),        # x batch tile (bf16)
            pl.BlockSpec((CM, L * Fp), lambda i: (0, 0)),    # Toeplitz weight (resident)
            pl.BlockSpec((1, Fp), lambda i: (0, 0)),         # bias (resident)
        ],
        out_specs=pl.BlockSpec((Bt, Fp), lambda i: (i, 0)),
        compiler_params=pltpu.CompilerParams(
            dimension_semantics=("parallel",),               # megacore on v7x
        ),
    )(x2d, w_big, b_col)

    out = out[:, :F]                     # drop lane padding
    if B == 1:                           # PyTorch .squeeze() drops a batch dim of 1
        out = out[0]
    return out


def cnn_reference(x_ncl, weight_fck, bias_f, operand_dtype=jnp.float32):
    """Pure-JAX reference mirroring the PyTorch module (f32 accumulation)."""
    B, C, M = x_ncl.shape
    F, _, K = weight_fck.shape
    L = M - K + 1
    windows = jnp.stack([x_ncl[:, :, t:t + K] for t in range(L)], axis=2)  # (B,C,L,K)
    conv = jnp.einsum("bclk,fck->blf",
                      windows.astype(operand_dtype),
                      weight_fck.astype(operand_dtype),
                      preferred_element_type=jnp.float32)
    conv = conv + bias_f[None, None, :]
    return jnp.max(jnp.maximum(conv, 0.0), axis=1)             # (B, F)


if __name__ == "__main__":
    # Shapes consistent with the module (embSizeChar=32, f=64, maxLen=16, k=5),
    # batched so the grid is length 2 (pipelined on v5e/v6e, both cores on v7x).
    B, C, M, F, K = 256, 32, 16, 64, 5

    key = jax.random.PRNGKey(0)
    kx, kw, kb = jax.random.split(key, 3)
    x = jax.random.normal(kx, (B, C, M), dtype=jnp.float32)          # PyTorch NCL
    weight = jax.random.normal(kw, (F, C, K), dtype=jnp.float32) * 0.1
    bias = jax.random.normal(kb, (F,), dtype=jnp.float32) * 0.1

    fwd = jax.jit(cnn_forward)
    out = jax.block_until_ready(fwd(x, weight, bias))
    assert out.shape == (B, F), out.shape

    # Strict check vs. a reference using the same bf16 MXU operands (f32 accum).
    ref_bf16 = cnn_reference(x, weight, bias, operand_dtype=jnp.bfloat16)
    err = float(jnp.abs(out - ref_bf16).max())
    assert jnp.allclose(out, ref_bf16, atol=5e-3, rtol=5e-3), err

    # Loose sanity check vs. the pure-f32 PyTorch-equivalent math.
    ref_f32 = cnn_reference(x, weight, bias, operand_dtype=jnp.float32)
    err32 = float(jnp.abs(out - ref_f32).max())
    assert jnp.allclose(out, ref_f32, atol=5e-2, rtol=5e-2), err32

    print("KERNEL_OK")
</pallas_src>

<mosaic_0001>
module attributes {stable_mosaic.version = 11 : i64} {
  func.func @_cnn_fused_kernel(%arg0: i32, %arg1: memref<128x512xbf16, #tpu.memory_space<vmem>>, %arg2: memref<512x1536xbf16, #tpu.memory_space<vmem>>, %arg3: memref<1x128xf32, #tpu.memory_space<vmem>>, %arg4: memref<128x128xf32, #tpu.memory_space<vmem>>) attributes {dimension_semantics = [#tpu.dimension_semantics<parallel>], iteration_bounds = array<i64: 2>, scalar_prefetch = 0 : i64, scratch_operands = 0 : i64, tpu.core_type = #tpu.core_type<tc>, window_params = [{transform_indices = @transform_0, window_bounds = array<i64: 128, 512>}, {pipeline_mode = #tpu.pipeline_mode<synchronous>, transform_indices = @transform_1, window_bounds = array<i64: 512, 1536>}, {pipeline_mode = #tpu.pipeline_mode<synchronous>, transform_indices = @transform_2, window_bounds = array<i64: 1, 128>}, {transform_indices = @transform_3, window_bounds = array<i64: 128, 128>}]} {
    %c0 = arith.constant 0 : index
    %c0_0 = arith.constant 0 : index
    %0 = vector.load %arg1[%c0, %c0_0] : memref<128x512xbf16, #tpu.memory_space<vmem>>, vector<128x512xbf16>
    %c0_1 = arith.constant 0 : index
    %c0_2 = arith.constant 0 : index
    %1 = vector.load %arg2[%c0_1, %c0_2] : memref<512x1536xbf16, #tpu.memory_space<vmem>>, vector<512x1536xbf16>
    %cst = arith.constant dense<0.000000e+00> : vector<128x1536xf32>
    %2 = tpu.matmul %0, %1, %cst {dimension_numbers = #tpu.dot_dimension_numbers<[1], [0], [0], [1], [0, 0, 1, 1], [], []>} : vector<128x512xbf16>, vector<512x1536xbf16>, vector<128x1536xf32> -> vector<128x1536xf32>
    %3 = vector.extract_strided_slice %2 {offsets = [0, 0], sizes = [128, 128], strides = [1, 1]} : vector<128x1536xf32> to vector<128x128xf32>
    %4 = vector.extract_strided_slice %2 {offsets = [0, 128], sizes = [128, 128], strides = [1, 1]} : vector<128x1536xf32> to vector<128x128xf32>
    %5 = arith.maximumf %3, %4 : vector<128x128xf32>
    %6 = vector.extract_strided_slice %2 {offsets = [0, 256], sizes = [128, 128], strides = [1, 1]} : vector<128x1536xf32> to vector<128x128xf32>
    %7 = arith.maximumf %5, %6 : vector<128x128xf32>
    %8 = vector.extract_strided_slice %2 {offsets = [0, 384], sizes = [128, 128], strides = [1, 1]} : vector<128x1536xf32> to vector<128x128xf32>
    %9 = arith.maximumf %7, %8 : vector<128x128xf32>
    %10 = vector.extract_strided_slice %2 {offsets = [0, 512], sizes = [128, 128], strides = [1, 1]} : vector<128x1536xf32> to vector<128x128xf32>
    %11 = arith.maximumf %9, %10 : vector<128x128xf32>
    %12 = vector.extract_strided_slice %2 {offsets = [0, 640], sizes = [128, 128], strides = [1, 1]} : vector<128x1536xf32> to vector<128x128xf32>
    %13 = arith.maximumf %11, %12 : vector<128x128xf32>
    %14 = vector.extract_strided_slice %2 {offsets = [0, 768], sizes = [128, 128], strides = [1, 1]} : vector<128x1536xf32> to vector<128x128xf32>
    %15 = arith.maximumf %13, %14 : vector<128x128xf32>
    %16 = vector.extract_strided_slice %2 {offsets = [0, 896], sizes = [128, 128], strides = [1, 1]} : vector<128x1536xf32> to vector<128x128xf32>
    %17 = arith.maximumf %15, %16 : vector<128x128xf32>
    %18 = vector.extract_strided_slice %2 {offsets = [0, 1024], sizes = [128, 128], strides = [1, 1]} : vector<128x1536xf32> to vector<128x128xf32>
    %19 = arith.maximumf %17, %18 : vector<128x128xf32>
    %20 = vector.extract_strided_slice %2 {offsets = [0, 1152], sizes = [128, 128], strides = [1, 1]} : vector<128x1536xf32> to vector<128x128xf32>
    %21 = arith.maximumf %19, %20 : vector<128x128xf32>
    %22 = vector.extract_strided_slice %2 {offsets = [0, 1280], sizes = [128, 128], strides = [1, 1]} : vector<128x1536xf32> to vector<128x128xf32>
    %23 = arith.maximumf %21, %22 : vector<128x128xf32>
    %24 = vector.extract_strided_slice %2 {offsets = [0, 1408], sizes = [128, 128], strides = [1, 1]} : vector<128x1536xf32> to vector<128x128xf32>
    %25 = arith.maximumf %23, %24 : vector<128x128xf32>
    %c0_3 = arith.constant 0 : index
    %c0_4 = arith.constant 0 : index
    %26 = vector.load %arg3[%c0_3, %c0_4] : memref<1x128xf32, #tpu.memory_space<vmem>>, vector<1x128xf32>
    %27 = vector.broadcast %26 : vector<1x128xf32> to vector<128x128xf32>
    %28 = arith.addf %25, %27 : vector<128x128xf32>
    %cst_5 = arith.constant 0.000000e+00 : f32
    %29 = vector.broadcast %cst_5 : f32 to vector<128x128xf32>
    %30 = arith.maximumf %28, %29 : vector<128x128xf32>
    %c0_6 = arith.constant 0 : index
    %c0_7 = arith.constant 0 : index
    %31 = vector.load %arg4[%c0_6, %c0_7] : memref<128x128xf32, #tpu.memory_space<vmem>>, vector<128x128xf32>
    tpu.vector_store %arg4[%c0_6, %c0_7], %30 {strides = array<i32>} : memref<128x128xf32, #tpu.memory_space<vmem>>, vector<128x128xf32>,
    return
  }
  func.func @transform_0(%arg0: i32) -> (i32, i32) {
    %c0_i32 = arith.constant 0 : i32
    %c0_i32_0 = arith.constant 0 : i32
    return %arg0, %c0_i32 : i32, i32
  }
  func.func @transform_1(%arg0: i32) -> (i32, i32) {
    %c0_i32 = arith.constant 0 : i32
    %c0_i32_0 = arith.constant 0 : i32
    %c0_i32_1 = arith.constant 0 : i32
    return %c0_i32, %c0_i32_0 : i32, i32
  }
  func.func @transform_2(%arg0: i32) -> (i32, i32) {
    %c0_i32 = arith.constant 0 : i32
    %c0_i32_0 = arith.constant 0 : i32
    %c0_i32_1 = arith.constant 0 : i32
    return %c0_i32, %c0_i32_0 : i32, i32
  }
  func.func @transform_3(%arg0: i32) -> (i32, i32) {
    %c0_i32 = arith.constant 0 : i32
    %c0_i32_0 = arith.constant 0 : i32
    return %arg0, %c0_i32 : i32, i32
  }
}

</mosaic_0001>

<bundles_post_ra>
// kernel: cnn_forward.1
= control target key start
LH: loop header
LB: loop body
LE: loop exit
PB: predicated region body
PF: predicated region fallthrough
CT: control target
= control target key end

     0   :  { %s7439_s12 = smov 0   ;;  %s11087_s0 = inlined_call_operand.vmem [shape: bf16[256,512], index: 0, kind: input, shape index: {}]   ;;  %s11088_s1 = inlined_call_operand.vmem [shape: bf16[512,1536], index: 1, kind: input, shape index: {}]   ;;  %s11089_s2 = inlined_call_operand.vmem [shape: f32[1,128], index: 2, kind: input, shape index: {}]   ;;  %s11090_s3 = inlined_call_operand.vmem [shape: f32[256,128], index: 3, kind: output, shape index: {}]  }
   0x1 LB: > { %s5309_s13 = sadd.s32 4294967295, %s7417_s12   ;;  %p5313_p0 = scmp.ge.s32.totalorder %s7417_s12, 1  ;;  %s7417_s12 = sphi %s7439_s12, %s13_s12  }
   0x2   : > { %p139_p1 = scmp.lt.s32.totalorder %s7417_s12, 3 }
   0x4   : > { %p140_p2 = pnand %p5313_p0, %p139_p1 }
   0x6   : > { %143 = sbr.rel (%p140_p2) target bundleno = 1718 (0x6b6), region = 32 }
   0xb   : > { %v5785_v0 = vld [vmem:[%s11088_s1 + $0x2a0] sm:$0xf]  ;;  %v7108_v1 = vld [vmem:[%s11088_s1 + $0x2cc] sm:$0xf0]  ;;  %s5314_s24 = sshll.u32 %s5309_s13, 4 }
   0xc   : > { %v6169_v2 = vld [vmem:[%s11088_s1 + $0x5a0] sm:$0xf]  ;;  %v5786_v3 = vor.u32 %v7108_v1, %v5785_v0  ;;  %v7204_v4 = vld [vmem:[%s11088_s1 + $0x5cc] sm:$0xf0]  ;;  %p165_p3 = scmp.lt.s32.totalorder %s5314_s24, 31 }
   0xd   : > { %v6553_v5 = vld [vmem:[%s11088_s1 + $0x8a0] sm:$0xf]  ;;  %v7300_v6 = vld [vmem:[%s11088_s1 + $0x8cc] sm:$0xf0]  ;;  %v6170_v7 = vor.u32 %v7204_v4, %v6169_v2 }
   0xe   : > { %v6554_v8 = vor.u32 %v7300_v6, %v6553_v5  ;;  %v6937_v9 = vld [vmem:[%s11088_s1 + $0xba0] sm:$0xf]  ;;  %v7396_v10 = vld [vmem:[%s11088_s1 + $0xbcc] sm:$0xf0]  ;;  %2673 = vmatpush.bf16.msra.mxu0 %v5786_v3  ;;  %s11363_s24 = smov (!%p165_p3, %s5314_s24), 31 }
   0xf   : > { %v5737_v11 = vld [vmem:[%s11088_s1 + $0x240] sm:$0xf]  ;;  %v6938_v12 = vor.u32 %v7396_v10, %v6937_v9  ;;  %v7096_v13 = vld [vmem:[%s11088_s1 + $0x26c] sm:$0xf0]  ;;  %2722 = vmatpush.bf16.msra.mxu1 %v6170_v7  ;;  %s6985_s19 = sshll.u32 %s11363_s24, 4  ;;  %s5318_s9 = sshll.u32 %s11363_s24, 3 }
  0x10   : > { %v6121_v14 = vld [vmem:[%s11088_s1 + $0x540] sm:$0xf]  ;;  %v7192_v15 = vld [vmem:[%s11088_s1 + $0x56c] sm:$0xf0]  ;;  %2771 = vmatpush.bf16.msra.mxu2 %v6554_v8  ;;  %v5738_v16 = vor.u32 %v7096_v13, %v5737_v11  ;;  %s7656_s27 = scalar_lea.vmem %s11087_s0, %s6985_s19  ;;  %s11036_s14 = scalar_lea.vmem %s11090_s3, %s5318_s9 }
  0x11   : > { %v6122_v17 = vor.u32 %v7192_v15, %v6121_v14  ;;  %v6505_v18 = vld [vmem:[%s11088_s1 + $0x840] sm:$0xf]  ;;  %v7288_v19 = vld [vmem:[%s11088_s1 + $0x86c] sm:$0xf0]  ;;  %2820 = vmatpush.bf16.msra.mxu3 %v6938_v12 }
  0x12   : > { %v6889_v20 = vld [vmem:[%s11088_s1 + $0xb40] sm:$0xf]  ;;  %v6506_v21 = vor.u32 %v7288_v19, %v6505_v18  ;;  %v7384_v22 = vld [vmem:[%s11088_s1 + $0xb6c] sm:$0xf0]  ;;  %2674 = vmatpush.bf16.msra.mxu0 %v5738_v16 }
  0x13   : > { %v5689_v23 = vld [vmem:[%s11088_s1 + $0x1e0] sm:$0xf]  ;;  %v7084_v24 = vld [vmem:[%s11088_s1 + $0x20c] sm:$0xf0]  ;;  %v6890_v25 = vor.u32 %v7384_v22, %v6889_v20  ;;  %2723 = vmatpush.bf16.msra.mxu1 %v6122_v17 }
  0x14   : > { %v6073_v26 = vld [vmem:[%s11088_s1 + $0x4e0] sm:$0xf]  ;;  %v7180_v27 = vld [vmem:[%s11088_s1 + $0x50c] sm:$0xf0]  ;;  %v5690_v29 = vor.u32 %v7084_v24, %v5689_v23  ;;  %2772 = vmatpush.bf16.msra.mxu2 %v6506_v21 }
  0x15   : > { %v6457_v28 = vld [vmem:[%s11088_s1 + $0x7e0] sm:$0xf]  ;;  %v7276_v30 = vld [vmem:[%s11088_s1 + $0x80c] sm:$0xf0]  ;;  %v6074_v33 = vor.u32 %v7180_v27, %v6073_v26  ;;  %2821 = vmatpush.bf16.msra.mxu3 %v6890_v25 }
  0x16   : > { %v6841_v31 = vld [vmem:[%s11088_s1 + $0xae0] sm:$0xf]  ;;  %v7372_v32 = vld [vmem:[%s11088_s1 + $0xb0c] sm:$0xf0]  ;;  %v6458_v34 = vor.u32 %v7276_v30, %v6457_v28  ;;  %2675 = vmatpush.bf16.msra.mxu0 %v5690_v29  ;;  %v7294_v28 = vld [vmem:[%s11088_s1 + $0x8a4] sm:$0xf] }
  0x17   : > { %v5641_v35 = vld [vmem:[%s11088_s1 + $0x180] sm:$0xf]  ;;  %v7072_v36 = vld [vmem:[%s11088_s1 + $0x1ac] sm:$0xf0]  ;;  %v6842_v38 = vor.u32 %v7372_v32, %v6841_v31  ;;  %2724 = vmatpush.bf16.msra.mxu1 %v6074_v33  ;;  %v6555_v29 = vld [vmem:[%s11088_s1 + $0x8d0] sm:$0xf0] }
  0x18   : > { %v6025_v37 = vld [vmem:[%s11088_s1 + $0x480] sm:$0xf]  ;;  %v7168_v39 = vld [vmem:[%s11088_s1 + $0x4ac] sm:$0xf0]  ;;  %v5642_v44 = vor.u32 %v7072_v36, %v5641_v35  ;;  %2773 = vmatpush.bf16.msra.mxu2 %v6458_v34  ;;  %v7390_v30 = vld [vmem:[%s11088_s1 + $0xba4] sm:$0xf] }
  0x19   : > { %v6409_v40 = vld [vmem:[%s11088_s1 + $0x780] sm:$0xf]  ;;  %v7264_v41 = vld [vmem:[%s11088_s1 + $0x7ac] sm:$0xf0]  ;;  %v6026_v45 = vor.u32 %v7168_v39, %v6025_v37  ;;  %2822 = vmatpush.bf16.msra.mxu3 %v6842_v38  ;;  %v6939_v32 = vld [vmem:[%s11088_s1 + $0xbd0] sm:$0xf0] }
  0x1a   : > { %v6793_v42 = vld [vmem:[%s11088_s1 + $0xa80] sm:$0xf]  ;;  %v7360_v43 = vld [vmem:[%s11088_s1 + $0xaac] sm:$0xf0]  ;;  %v6410_v46 = vor.u32 %v7264_v41, %v6409_v40  ;;  %2676 = vmatpush.bf16.msra.mxu0 %v5642_v44  ;;  %v7102_v33 = vld [vmem:[%s11088_s1 + $0x2a4] sm:$0xf] }
  0x1b   : > { %v5593_v47 = vld [vmem:[%s11088_s1 + $0x120] sm:$0xf]  ;;  %v7060_v48 = vld [vmem:[%s11088_s1 + $0x14c] sm:$0xf0]  ;;  %v6794_v50 = vor.u32 %v7360_v43, %v6793_v42  ;;  %2725 = vmatpush.bf16.msra.mxu1 %v6026_v45  ;;  %v5787_v34 = vld [vmem:[%s11088_s1 + $0x2d0] sm:$0xf0] }
  0x1c   : > { %v5977_v49 = vld [vmem:[%s11088_s1 + $0x420] sm:$0xf]  ;;  %v7156_v51 = vld [vmem:[%s11088_s1 + $0x44c] sm:$0xf0]  ;;  %v5594_v56 = vor.u32 %v7060_v48, %v5593_v47  ;;  %2774 = vmatpush.bf16.msra.mxu2 %v6410_v46  ;;  %v6986_v39 = vld [vmem:[%s7656_s27 + $0x4] sm:$0xf]  ;;  %v6558_v47 = vor.u32 %v7294_v28, %v6555_v29 }
  0x1d   : > { %v6361_v52 = vld [vmem:[%s11088_s1 + $0x720] sm:$0xf]  ;;  %v7252_v53 = vld [vmem:[%s11088_s1 + $0x74c] sm:$0xf0]  ;;  %v5978_v57 = vor.u32 %v7156_v51, %v5977_v49  ;;  %2823 = vmatpush.bf16.msra.mxu3 %v6794_v50  ;;  %v7198_v40 = vld [vmem:[%s11088_s1 + $0x5a4] sm:$0xf]  ;;  %v6942_v51 = vor.u32 %v7390_v30, %v6939_v32 }
  0x1e   : > { %v6745_v54 = vld [vmem:[%s11088_s1 + $0xa20] sm:$0xf]  ;;  %v7348_v55 = vld [vmem:[%s11088_s1 + $0xa4c] sm:$0xf0]  ;;  %v6362_v58 = vor.u32 %v7252_v53, %v6361_v52  ;;  %2677 = vmatpush.bf16.msra.mxu0 %v5594_v56  ;;  %v6171_v41 = vld [vmem:[%s11088_s1 + $0x5d0] sm:$0xf0] }
  0x1f   : > { %v5545_v59 = vld [vmem:[%s11088_s1 + $0xc0] sm:$0xf]  ;;  %v7048_v60 = vld [vmem:[%s11088_s1 + $0xec] sm:$0xf0]  ;;  %v6746_v62 = vor.u32 %v7348_v55, %v6745_v54  ;;  %2726 = vmatpush.bf16.msra.mxu1 %v5978_v57  ;;  %v7282_v42 = vld [vmem:[%s11088_s1 + $0x844] sm:$0xf] }
  0x20   : > { %v5929_v61 = vld [vmem:[%s11088_s1 + $0x3c0] sm:$0xf]  ;;  %v7144_v63 = vld [vmem:[%s11088_s1 + $0x3ec] sm:$0xf0]  ;;  %v5546_v4 = vor.u32 %v7048_v60, %v5545_v59  ;;  %2775 = vmatpush.bf16.msra.mxu2 %v6362_v58  ;;  %v5323_v44 = vld [vmem:[%s7656_s27 + $0x10] sm:$0xf0]  ;;  %v5790_v58 = vor.u32 %v7102_v33, %v5787_v34  ;;  %v6174_v59 = vor.u32 %v7198_v40, %v6171_v41 }
  0x21   : > { %v6313_v0 = vld [vmem:[%s11088_s1 + $0x6c0] sm:$0xf]  ;;  %v7240_v1 = vld [vmem:[%s11088_s1 + $0x6ec] sm:$0xf0]  ;;  %v5930_v7 = vor.u32 %v7144_v63, %v5929_v61  ;;  %2824 = vmatpush.bf16.msra.mxu3 %v6746_v62  ;;  %v5329_v45 = vld [vmem:[%s7656_s27 + $0x8] sm:$0xf]  ;;  %v7689_v53 = vor.u32 %v6986_v39, %v5323_v44 }
  0x22   : > { %v6697_v2 = vld [vmem:[%s11088_s1 + $0x9c0] sm:$0xf]  ;;  %v7336_v3 = vld [vmem:[%s11088_s1 + $0x9ec] sm:$0xf0]  ;;  %v6314_v8 = vor.u32 %v7240_v1, %v6313_v0  ;;  %2678 = vmatpush.bf16.msra.mxu0 %v5546_v4  ;;  %v6989_v46 = vld [vmem:[%s7656_s27 + $0x14] sm:$0xf0] }
  0x23   : > { %v5497_v5 = vld [vmem:[%s11088_s1 + $0x60] sm:$0xf]  ;;  %v7036_v6 = vld [vmem:[%s11088_s1 + $0x8c] sm:$0xf0]  ;;  %v6698_v12 = vor.u32 %v7336_v3, %v6697_v2  ;;  %2727 = vmatpush.bf16.msra.mxu1 %v5930_v7  ;;  %v6987_v49 = vld [vmem:[%s7656_s27 + $0xc] sm:$0xf]  ;;  %v7691_v54 = vor.u32 %v6989_v46, %v5329_v45 }
  0x24   : > { %v5881_v9 = vld [vmem:[%s11088_s1 + $0x360] sm:$0xf]  ;;  %v7132_v10 = vld [vmem:[%s11088_s1 + $0x38c] sm:$0xf0]  ;;  %v5498_v17 = vor.u32 %v7036_v6, %v5497_v5  ;;  %2776 = vmatpush.bf16.msra.mxu2 %v6314_v8  ;;  %v5331_v50 = vld [vmem:[%s7656_s27 + $0x18] sm:$0xf0] }
  0x25   : > { %v6265_v11 = vld [vmem:[%s11088_s1 + $0x660] sm:$0xf]  ;;  %v7228_v13 = vld [vmem:[%s11088_s1 + $0x68c] sm:$0xf0]  ;;  %v5882_v21 = vor.u32 %v7132_v10, %v5881_v9  ;;  %2825 = vmatpush.bf16.msra.mxu3 %v6698_v12  ;;  %v6507_v52 = vld [vmem:[%s11088_s1 + $0x870] sm:$0xf0]  ;;  %v7699_v57 = vor.u32 %v6987_v49, %v5331_v50 }
  0x26   : > { %v6649_v14 = vld [vmem:[%s11088_s1 + $0x960] sm:$0xf]  ;;  %v7324_v15 = vld [vmem:[%s11088_s1 + $0x98c] sm:$0xf0]  ;;  %v6266_v22 = vor.u32 %v7228_v13, %v6265_v11  ;;  %2679 = vmatpush.bf16.msra.mxu0 %v5498_v17  ;;  %11185 = vst [vmem:[#allocation2_spill] sm:$0xff] %v7689_v53  ;;  %v6510_v60 = vor.u32 %v7282_v42, %v6507_v52 }
  0x27   : > { %v5449_v16 = vld [vmem:[%s11088_s1] sm:$0xf]  ;;  %v7024_v18 = vld [vmem:[%s11088_s1 + $0x2c] sm:$0xf0]  ;;  %v6650_v25 = vor.u32 %v7324_v15, %v6649_v14  ;;  %2728 = vmatpush.bf16.msra.mxu1 %v5882_v21  ;;  %11186 = vst [vmem:[#allocation3_spill] sm:$0xff] %v7691_v54 }
  0x28   : > { %v5833_v19 = vld [vmem:[%s11088_s1 + $0x300] sm:$0xf]  ;;  %v7120_v20 = vld [vmem:[%s11088_s1 + $0x32c] sm:$0xf0]  ;;  %v5450_v31 = vor.u32 %v7024_v18, %v5449_v16  ;;  %2777 = vmatpush.bf16.msra.mxu2 %v6266_v22  ;;  %v7378_v55 = vld [vmem:[%s11088_s1 + $0xb44] sm:$0xf] }
  0x29   : > { %v6217_v23 = vld [vmem:[%s11088_s1 + $0x600] sm:$0xf]  ;;  %v7216_v24 = vld [vmem:[%s11088_s1 + $0x62c] sm:$0xf0]  ;;  %v5834_v35 = vor.u32 %v7120_v20, %v5833_v19  ;;  %2826 = vmatpush.bf16.msra.mxu3 %v6650_v25  ;;  %v6891_v56 = vld [vmem:[%s11088_s1 + $0xb70] sm:$0xf0] }
  0x2a   : > { %v6601_v26 = vld [vmem:[%s11088_s1 + $0x900] sm:$0xf]  ;;  %v7312_v27 = vld [vmem:[%s11088_s1 + $0x92c] sm:$0xf0]  ;;  %v6218_v36 = vor.u32 %v7216_v24, %v6217_v23  ;;  %2680 = vmatpush.bf16.msra.mxu0 %v5450_v31  ;;  %11187 = vst [vmem:[#allocation4_spill] sm:$0xff] %v7699_v57  ;;  %v6894_v63 = vor.u32 %v7378_v55, %v6891_v56 }
  0x2b   : > { %v5321_v37 = vld [vmem:[%s7656_s27] sm:$0xf]  ;;  %v6988_v38 = vld [vmem:[%s7656_s27 + $0xc] sm:$0xf0]  ;;  %v6602_v43 = vor.u32 %v7312_v27, %v6601_v26  ;;  %2729 = vmatpush.bf16.msra.mxu1 %v5834_v35  ;;  %v7090_v61 = vld [vmem:[%s11088_s1 + $0x244] sm:$0xf] }
  0x2c   : > { %v7682_v48 = vor.u32 %v6988_v38, %v5321_v37  ;;  %2778 = vmatpush.bf16.msra.mxu2 %v6218_v36  ;;  %v5739_v62 = vld [vmem:[%s11088_s1 + $0x270] sm:$0xf0]  ;;  %v7186_v0 = vld [vmem:[%s11088_s1 + $0x544] sm:$0xf]  ;;  %v5337_v16 = vld [vmem:[%s7656_s27 + $0x20] sm:$0xf] }
  0x2d   : > { %2827 = vmatpush.bf16.msra.mxu3 %v6602_v43  ;;  %v6123_v1 = vld [vmem:[%s11088_s1 + $0x570] sm:$0xf0]  ;;  %v5742_v2 = vor.u32 %v7090_v61, %v5739_v62  ;;  %v7270_v3 = vld [vmem:[%s11088_s1 + $0x7e4] sm:$0xf]  ;;  %v6992_v17 = vld [vmem:[%s7656_s27 + $0x2c] sm:$0xf0] }
  0x2e   : > { %2681 = vmatmul.bf16.vlgmr.msra.gmra.mxu0 %v7682_v48  ;;  %2730 = vmatmul.bf16.vlgmr.msra.gmra.mxu1 %v7689_v53  ;;  %v6459_v4 = vld [vmem:[%s11088_s1 + $0x810] sm:$0xf0]  ;;  %v7366_v5 = vld [vmem:[%s11088_s1 + $0xae4] sm:$0xf]  ;;  %v6126_v6 = vor.u32 %v7186_v0, %v6123_v1  ;;  %v5345_v20 = vld [vmem:[%s7656_s27 + $0x28] sm:$0xf]  ;;  %v7749_v24 = vor.u32 %v6992_v17, %v5337_v16 }
  0x2f   : > { %2779 = vmatmul.bf16.vlgmr.msra.gmra.mxu2 %v7691_v54  ;;  %2869 = vmatpush.bf16.msrb.mxu0 %v5790_v58  ;;  %v6462_v7 = vor.u32 %v7270_v3, %v6459_v4  ;;  %v6843_v8 = vld [vmem:[%s11088_s1 + $0xb10] sm:$0xf0]  ;;  %v7078_v9 = vld [vmem:[%s11088_s1 + $0x1e4] sm:$0xf]  ;;  %v6993_v21 = vld [vmem:[%s7656_s27 + $0x34] sm:$0xf0] }
  0x30   : > { %2967 = vmatpush.bf16.msrb.mxu2 %v6558_v47  ;;  %2828 = vmatmul.bf16.vlgmr.msra.gmra.mxu3 %v7699_v57  ;;  %v5691_v10 = vld [vmem:[%s11088_s1 + $0x210] sm:$0xf0]  ;;  %v6846_v11 = vor.u32 %v7366_v5, %v6843_v8  ;;  %v7174_v12 = vld [vmem:[%s11088_s1 + $0x4e4] sm:$0xf]  ;;  %v6991_v22 = vld [vmem:[%s7656_s27 + $0x2c] sm:$0xf]  ;;  %v7753_v26 = vor.u32 %v6993_v21, %v5345_v20 }
  0x31   : > { %3016 = vmatpush.bf16.msrb.mxu3 %v6942_v51  ;;  %2918 = vmatpush.bf16.msrb.mxu1 %v6174_v59  ;;  %v6075_v13 = vld [vmem:[%s11088_s1 + $0x510] sm:$0xf0]  ;;  %v5694_v14 = vor.u32 %v7078_v9, %v5691_v10  ;;  %v6990_v18 = vld [vmem:[%s7656_s27 + $0x24] sm:$0xf]  ;;  %v5347_v23 = vld [vmem:[%s7656_s27 + $0x38] sm:$0xf0] }
  0x32   : > { %v6078_v15 = vor.u32 %v7174_v12, %v6075_v13  ;;  %v5339_v19 = vld [vmem:[%s7656_s27 + $0x30] sm:$0xf0]  ;;  %v7755_v27 = vor.u32 %v6991_v22, %v5347_v23  ;;  %v7258_v28 = vld [vmem:[%s11088_s1 + $0x784] sm:$0xf]  ;;  %v5353_v40 = vld [vmem:[%s7656_s27 + $0x40] sm:$0xf] }
  0x33   : > { %2870 = vmatpush.bf16.msrb.mxu0 %v5742_v2  ;;  %v7751_v25 = vor.u32 %v6990_v18, %v5339_v19  ;;  %v6411_v29 = vld [vmem:[%s11088_s1 + $0x7b0] sm:$0xf0]  ;;  %v7354_v30 = vld [vmem:[%s11088_s1 + $0xa84] sm:$0xf]  ;;  %v6996_v41 = vld [vmem:[%s7656_s27 + $0x4c] sm:$0xf0] }
  0x34   : > { %2968 = vmatpush.bf16.msrb.mxu2 %v6510_v60  ;;  %11188 = vst [vmem:[#allocation5_spill] sm:$0xff] %v7755_v27  ;;  %v6414_v31 = vor.u32 %v7258_v28, %v6411_v29  ;;  %v6795_v32 = vld [vmem:[%s11088_s1 + $0xab0] sm:$0xf0]  ;;  %v7066_v33 = vld [vmem:[%s11088_s1 + $0x184] sm:$0xf]  ;;  %v7793_v49 = vor.u32 %v6996_v41, %v5353_v40 }
  0x35   : > { %3017 = vmatpush.bf16.msrb.mxu3 %v6894_v63  ;;  %2919 = vmatpush.bf16.msrb.mxu1 %v6126_v6  ;;  %v5643_v34 = vld [vmem:[%s11088_s1 + $0x1b0] sm:$0xf0]  ;;  %v6798_v35 = vor.u32 %v7354_v30, %v6795_v32  ;;  %v7162_v37 = vld [vmem:[%s11088_s1 + $0x484] sm:$0xf]  ;;  %v5361_v44 = vld [vmem:[%s7656_s27 + $0x48] sm:$0xf] }
  0x36   : > { %v5646_v36 = vor.u32 %v7066_v33, %v5643_v34  ;;  %v6027_v38 = vld [vmem:[%s11088_s1 + $0x4b0] sm:$0xf0]  ;;  %v6994_v42 = vld [vmem:[%s7656_s27 + $0x44] sm:$0xf]  ;;  %v6997_v45 = vld [vmem:[%s7656_s27 + $0x54] sm:$0xf0] }
  0x37   : > { %2871 = vmatpush.bf16.msrb.mxu0 %v5694_v14  ;;  %v6030_v39 = vor.u32 %v7162_v37, %v6027_v38  ;;  %v5355_v43 = vld [vmem:[%s7656_s27 + $0x50] sm:$0xf0]  ;;  %v6995_v46 = vld [vmem:[%s7656_s27 + $0x4c] sm:$0xf]  ;;  %v5363_v47 = vld [vmem:[%s7656_s27 + $0x58] sm:$0xf0]  ;;  %v7797_v51 = vor.u32 %v6997_v45, %v5361_v44 }
  0x38   : > { %2969 = vmatpush.bf16.msrb.mxu2 %v6462_v7  ;;  %v7795_v50 = vor.u32 %v6994_v42, %v5355_v43  ;;  %v7799_v52 = vor.u32 %v6995_v46, %v5363_v47  ;;  %v7246_v55 = vld [vmem:[%s11088_s1 + $0x724] sm:$0xf]  ;;  %v6363_v56 = vld [vmem:[%s11088_s1 + $0x750] sm:$0xf0]  ;;  %v5369_v4 = vld [vmem:[%s7656_s27 + $0x60] sm:$0xf] }
  0x39   : > { %3018 = vmatpush.bf16.msrb.mxu3 %v6846_v11  ;;  %2920 = vmatpush.bf16.msrb.mxu1 %v6078_v15  ;;  %11189 = vst [vmem:[#allocation6_spill] sm:$0xff] %v7797_v51  ;;  %v7342_v58 = vld [vmem:[%s11088_s1 + $0xa24] sm:$0xf]  ;;  %v6366_v59 = vor.u32 %v7246_v55, %v6363_v56  ;;  %v6747_v60 = vld [vmem:[%s11088_s1 + $0xa50] sm:$0xf0] }
  0x3a   : > { %11190 = vst [vmem:[#allocation7_spill] sm:$0xff] %v7799_v52  ;;  %v7054_v61 = vld [vmem:[%s11088_s1 + $0x124] sm:$0xf]  ;;  %v5595_v62 = vld [vmem:[%s11088_s1 + $0x150] sm:$0xf0]  ;;  %v6750_v63 = vor.u32 %v7342_v58, %v6747_v60 }
  0x3b   : > { %2872 = vmatpush.bf16.msrb.mxu0 %v5646_v36  ;;  %v5598_v0 = vor.u32 %v7054_v61, %v5595_v62  ;;  %v7150_v1 = vld [vmem:[%s11088_s1 + $0x424] sm:$0xf]  ;;  %v5979_v2 = vld [vmem:[%s11088_s1 + $0x450] sm:$0xf0]  ;;  %v7000_v5 = vld [vmem:[%s7656_s27 + $0x6c] sm:$0xf0] }
  0x3c   : > { %2970 = vmatpush.bf16.msrb.mxu2 %v6414_v31  ;;  %v5982_v3 = vor.u32 %v7150_v1, %v5979_v2  ;;  %v6998_v6 = vld [vmem:[%s7656_s27 + $0x64] sm:$0xf]  ;;  %v5371_v7 = vld [vmem:[%s7656_s27 + $0x70] sm:$0xf0]  ;;  %v5377_v8 = vld [vmem:[%s7656_s27 + $0x68] sm:$0xf]  ;;  %v7837_v12 = vor.u32 %v7000_v5, %v5369_v4 }
  0x3d   : > { %3019 = vmatpush.bf16.msrb.mxu3 %v6798_v35  ;;  %2921 = vmatpush.bf16.msrb.mxu1 %v6030_v39  ;;  %v7001_v9 = vld [vmem:[%s7656_s27 + $0x74] sm:$0xf0]  ;;  %v6999_v10 = vld [vmem:[%s7656_s27 + $0x6c] sm:$0xf]  ;;  %v5379_v11 = vld [vmem:[%s7656_s27 + $0x78] sm:$0xf0]  ;;  %v7839_v13 = vor.u32 %v6998_v6, %v5371_v7 }
  0x3e   : > { %2686 = vmatmul.bf16.gmra.mxu0 %v7749_v24  ;;  %2735 = vmatmul.bf16.gmra.mxu1 %v7751_v25  ;;  %v7841_v14 = vor.u32 %v7001_v9, %v5377_v8  ;;  %v7843_v15 = vor.u32 %v6999_v10, %v5379_v11  ;;  %v7234_v16 = vld [vmem:[%s11088_s1 + $0x6c4] sm:$0xf]  ;;  %v6315_v17 = vld [vmem:[%s11088_s1 + $0x6f0] sm:$0xf0]  ;;  %v5385_v32 = vld [vmem:[%s7656_s27 + $0x80] sm:$0xf] }
  0x3f   : > { %2784 = vmatmul.bf16.gmra.mxu2 %v7753_v26  ;;  %2873 = vmatpush.bf16.msrb.mxu0 %v5598_v0  ;;  %v7330_v18 = vld [vmem:[%s11088_s1 + $0x9c4] sm:$0xf]  ;;  %v6318_v19 = vor.u32 %v7234_v16, %v6315_v17  ;;  %v6699_v20 = vld [vmem:[%s11088_s1 + $0x9f0] sm:$0xf0]  ;;  %v7004_v33 = vld [vmem:[%s7656_s27 + $0x8c] sm:$0xf0] }
  0x40   : > { %2833 = vmatmul.bf16.gmra.mxu3 %v7755_v27  ;;  %2971 = vmatpush.bf16.msrb.mxu2 %v6366_v59  ;;  %11191 = vst [vmem:[#allocation8_spill] sm:$0xff] %v7841_v14  ;;  %v7042_v21 = vld [vmem:[%s11088_s1 + $0xc4] sm:$0xf]  ;;  %v5547_v22 = vld [vmem:[%s11088_s1 + $0xf0] sm:$0xf0]  ;;  %v6702_v23 = vor.u32 %v7330_v18, %v6699_v20  ;;  %v7881_v40 = vor.u32 %v7004_v33, %v5385_v32 }
  0x41   : > { %3020 = vmatpush.bf16.msrb.mxu3 %v6750_v63  ;;  %2922 = vmatpush.bf16.msrb.mxu1 %v5982_v3  ;;  %11192 = vst [vmem:[#allocation9_spill] sm:$0xff] %v7843_v15  ;;  %v5550_v28 = vor.u32 %v7042_v21, %v5547_v22  ;;  %v7138_v29 = vld [vmem:[%s11088_s1 + $0x3c4] sm:$0xf]  ;;  %v5931_v30 = vld [vmem:[%s11088_s1 + $0x3f0] sm:$0xf0] }
  0x42   : > { %v5934_v31 = vor.u32 %v7138_v29, %v5931_v30  ;;  %v7002_v34 = vld [vmem:[%s7656_s27 + $0x84] sm:$0xf]  ;;  %v5387_v35 = vld [vmem:[%s7656_s27 + $0x90] sm:$0xf0]  ;;  %v5393_v36 = vld [vmem:[%s7656_s27 + $0x88] sm:$0xf] }
  0x43   : > { %2874 = vmatpush.bf16.msrb.mxu0 %v5550_v28  ;;  %v7005_v37 = vld [vmem:[%s7656_s27 + $0x94] sm:$0xf0]  ;;  %v7003_v38 = vld [vmem:[%s7656_s27 + $0x8c] sm:$0xf]  ;;  %v5395_v39 = vld [vmem:[%s7656_s27 + $0x98] sm:$0xf0]  ;;  %v7883_v41 = vor.u32 %v7002_v34, %v5387_v35 }
  0x44   : > { %2972 = vmatpush.bf16.msrb.mxu2 %v6318_v19  ;;  %v7885_v42 = vor.u32 %v7005_v37, %v5393_v36  ;;  %v7887_v43 = vor.u32 %v7003_v38, %v5395_v39  ;;  %v7222_v44 = vld [vmem:[%s11088_s1 + $0x664] sm:$0xf]  ;;  %v6267_v45 = vld [vmem:[%s11088_s1 + $0x690] sm:$0xf0]  ;;  %v5401_v0 = vld [vmem:[%s7656_s27 + $0xa0] sm:$0xf] }
  0x45   : > { %3021 = vmatpush.bf16.msrb.mxu3 %v6702_v23  ;;  %2923 = vmatpush.bf16.msrb.mxu1 %v5934_v31  ;;  %v7318_v46 = vld [vmem:[%s11088_s1 + $0x964] sm:$0xf]  ;;  %v6270_v47 = vor.u32 %v7222_v44, %v6267_v45  ;;  %v6651_v55 = vld [vmem:[%s11088_s1 + $0x990] sm:$0xf0]  ;;  %v7008_v1 = vld [vmem:[%s7656_s27 + $0xac] sm:$0xf0] }
  0x46   : > { %11193 = vst [vmem:[#allocation10_spill] sm:$0xff] %v7885_v42  ;;  %v7030_v56 = vld [vmem:[%s11088_s1 + $0x64] sm:$0xf]  ;;  %v5499_v58 = vld [vmem:[%s11088_s1 + $0x90] sm:$0xf0]  ;;  %v6654_v59 = vor.u32 %v7318_v46, %v6651_v55  ;;  %v7925_v8 = vor.u32 %v7008_v1, %v5401_v0 }
  0x47   : > { %11194 = vst [vmem:[#allocation11_spill] sm:$0xff] %v7887_v43  ;;  %v5502_v60 = vor.u32 %v7030_v56, %v5499_v58  ;;  %v7126_v61 = vld [vmem:[%s11088_s1 + $0x364] sm:$0xf]  ;;  %v5883_v62 = vld [vmem:[%s11088_s1 + $0x390] sm:$0xf0] }
  0x48   : > { %2973 = vmatpush.bf16.msrb.mxu2 %v6270_v47  ;;  %v5886_v63 = vor.u32 %v7126_v61, %v5883_v62  ;;  %v7006_v2 = vld [vmem:[%s7656_s27 + $0xa4] sm:$0xf]  ;;  %v5403_v3 = vld [vmem:[%s7656_s27 + $0xb0] sm:$0xf0]  ;;  %v5409_v4 = vld [vmem:[%s7656_s27 + $0xa8] sm:$0xf] }
  0x49   : > { %3022 = vmatpush.bf16.msrb.mxu3 %v6654_v59  ;;  %2875 = vmatpush.bf16.msrb.mxu0 %v5502_v60  ;;  %v7009_v5 = vld [vmem:[%s7656_s27 + $0xb4] sm:$0xf0]  ;;  %v7007_v6 = vld [vmem:[%s7656_s27 + $0xac] sm:$0xf]  ;;  %v5411_v7 = vld [vmem:[%s7656_s27 + $0xb8] sm:$0xf0]  ;;  %v7927_v9 = vor.u32 %v7006_v2, %v5403_v3 }
  0x4a   : > { %2924 = vmatpush.bf16.msrb.mxu1 %v5886_v63  ;;  %v7929_v10 = vor.u32 %v7009_v5, %v5409_v4  ;;  %v7931_v11 = vor.u32 %v7007_v6, %v5411_v7  ;;  %v7210_v16 = vld [vmem:[%s11088_s1 + $0x604] sm:$0xf]  ;;  %v6219_v17 = vld [vmem:[%s11088_s1 + $0x630] sm:$0xf0]  ;;  %v5417_v32 = vld [vmem:[%s7656_s27 + $0xc0] sm:$0xf] }
  0x4b   : > { %v7306_v18 = vld [vmem:[%s11088_s1 + $0x904] sm:$0xf]  ;;  %v6222_v19 = vor.u32 %v7210_v16, %v6219_v17  ;;  %v6603_v20 = vld [vmem:[%s11088_s1 + $0x930] sm:$0xf0]  ;;  %v7012_v33 = vld [vmem:[%s7656_s27 + $0xcc] sm:$0xf0] }
  0x4c   : > { %11195 = vst [vmem:[#allocation12_spill] sm:$0xff] %v7929_v10  ;;  %v7018_v21 = vld [vmem:[%s11088_s1 + $0x4] sm:$0xf]  ;;  %v5451_v22 = vld [vmem:[%s11088_s1 + $0x30] sm:$0xf0]  ;;  %v6606_v23 = vor.u32 %v7306_v18, %v6603_v20  ;;  %v7969_v44 = vor.u32 %v7012_v33, %v5417_v32 }
  0x4d   : > { %11196 = vst [vmem:[#allocation13_spill] sm:$0xff] %v7931_v11  ;;  %v5454_v28 = vor.u32 %v7018_v21, %v5451_v22  ;;  %v7114_v29 = vld [vmem:[%s11088_s1 + $0x304] sm:$0xf]  ;;  %v5835_v30 = vld [vmem:[%s11088_s1 + $0x330] sm:$0xf0]  ;;  %2974 = vmatpush.bf16.msrb.mxu2 %v6222_v19 }
  0x4e   : > { %2691 = vmatmul.bf16.gmra.mxu0 %v7793_v49  ;;  %2740 = vmatmul.bf16.gmra.mxu1 %v7795_v50  ;;  %v5838_v31 = vor.u32 %v7114_v29, %v5835_v30  ;;  %v7010_v34 = vld [vmem:[%s7656_s27 + $0xc4] sm:$0xf]  ;;  %v5419_v35 = vld [vmem:[%s7656_s27 + $0xd0] sm:$0xf0]  ;;  %v5425_v36 = vld [vmem:[%s7656_s27 + $0xc8] sm:$0xf] }
  0x4f   : > { %2789 = vmatmul.bf16.gmra.mxu2 %v7797_v51  ;;  %3023 = vmatpush.bf16.msrb.mxu3 %v6606_v23  ;;  %v7013_v37 = vld [vmem:[%s7656_s27 + $0xd4] sm:$0xf0]  ;;  %v7011_v38 = vld [vmem:[%s7656_s27 + $0xcc] sm:$0xf]  ;;  %v5427_v39 = vld [vmem:[%s7656_s27 + $0xd8] sm:$0xf0]  ;;  %v7971_v45 = vor.u32 %v7010_v34, %v5419_v35 }
  0x50   : > { %2838 = vmatmul.bf16.gmra.mxu3 %v7799_v52  ;;  %2876 = vmatpush.bf16.msrb.mxu0 %v5454_v28  ;;  %v7973_v46 = vor.u32 %v7013_v37, %v5425_v36  ;;  %v7975_v47 = vor.u32 %v7011_v38, %v5427_v39  ;;  %v6561_v55 = vld [vmem:[%s11088_s1 + $0x8a8] sm:$0xf]  ;;  %v7301_v56 = vld [vmem:[%s11088_s1 + $0x8d4] sm:$0xf0]  ;;  %v5433_v3 = vld [vmem:[%s7656_s27 + $0xe0] sm:$0xf] }
  0x51   : > { %2925 = vmatpush.bf16.msrb.mxu1 %v5838_v31  ;;  %11197 = vst [vmem:[#allocation14_spill] sm:$0xff] %v7971_v45  ;;  %v6945_v58 = vld [vmem:[%s11088_s1 + $0xba8] sm:$0xf]  ;;  %v6562_v59 = vor.u32 %v7301_v56, %v6561_v55  ;;  %v7397_v60 = vld [vmem:[%s11088_s1 + $0xbd4] sm:$0xf0] }
  0x52   : > { %11198 = vst [vmem:[#allocation15_spill] sm:$0xff] %v7973_v46  ;;  %v6946_v61 = vor.u32 %v7397_v60, %v6945_v58  ;;  %v5793_v62 = vld [vmem:[%s11088_s1 + $0x2a8] sm:$0xf]  ;;  %v7109_v63 = vld [vmem:[%s11088_s1 + $0x2d4] sm:$0xf0] }
  0x53   : > { %11199 = vst [vmem:[#allocation16_spill] sm:$0xff] %v7975_v47  ;;  %3163 = vmatpush.bf16.msra.mxu2 %v6562_v59  ;;  %v6177_v0 = vld [vmem:[%s11088_s1 + $0x5a8] sm:$0xf]  ;;  %v5794_v1 = vor.u32 %v7109_v63, %v5793_v62  ;;  %v7205_v2 = vld [vmem:[%s11088_s1 + $0x5d4] sm:$0xf0] }
  0x54   : > { %3212 = vmatpush.bf16.msra.mxu3 %v6946_v61  ;;  %v7016_v4 = vld [vmem:[%s7656_s27 + $0xec] sm:$0xf0]  ;;  %v7014_v5 = vld [vmem:[%s7656_s27 + $0xe4] sm:$0xf]  ;;  %v6178_v6 = vor.u32 %v7205_v2, %v6177_v0  ;;  %v5435_v7 = vld [vmem:[%s7656_s27 + $0xf0] sm:$0xf0] }
  0x55   : > { %v5441_v16 = vld [vmem:[%s7656_s27 + $0xe8] sm:$0xf]  ;;  %v7017_v17 = vld [vmem:[%s7656_s27 + $0xf4] sm:$0xf0]  ;;  %3065 = vmatpush.bf16.msra.mxu0 %v5794_v1  ;;  %v7015_v18 = vld [vmem:[%s7656_s27 + $0xec] sm:$0xf]  ;;  %v8013_v20 = vor.u32 %v7016_v4, %v5433_v3  ;;  %v8015_v21 = vor.u32 %v7014_v5, %v5435_v7 }
  0x56   : > { %v5443_v19 = vld [vmem:[%s7656_s27 + $0xf8] sm:$0xf0]  ;;  %3114 = vmatpush.bf16.msra.mxu1 %v6178_v6  ;;  %v8017_v22 = vor.u32 %v7017_v17, %v5441_v16  ;;  %v6513_v28 = vld [vmem:[%s11088_s1 + $0x848] sm:$0xf]  ;;  %v7289_v29 = vld [vmem:[%s11088_s1 + $0x874] sm:$0xf0] }
  0x57   : > { %11200 = vst [vmem:[#allocation17_spill] sm:$0xff] %v8015_v21  ;;  %v8019_v23 = vor.u32 %v7015_v18, %v5443_v19  ;;  %v6897_v30 = vld [vmem:[%s11088_s1 + $0xb48] sm:$0xf]  ;;  %v6514_v31 = vor.u32 %v7289_v29, %v6513_v28  ;;  %v7385_v32 = vld [vmem:[%s11088_s1 + $0xb74] sm:$0xf0] }
  0x58   : > { %11201 = vst [vmem:[#allocation18_spill] sm:$0xff] %v8017_v22  ;;  %v6898_v33 = vor.u32 %v7385_v32, %v6897_v30  ;;  %v5745_v34 = vld [vmem:[%s11088_s1 + $0x248] sm:$0xf]  ;;  %v7097_v35 = vld [vmem:[%s11088_s1 + $0x274] sm:$0xf0] }
  0x59   : > { %11202 = vst [vmem:[#allocation19_spill] sm:$0xff] %v8019_v23  ;;  %3164 = vmatpush.bf16.msra.mxu2 %v6514_v31  ;;  %v6129_v36 = vld [vmem:[%s11088_s1 + $0x548] sm:$0xf]  ;;  %v5746_v37 = vor.u32 %v7097_v35, %v5745_v34  ;;  %v7193_v38 = vld [vmem:[%s11088_s1 + $0x574] sm:$0xf0] }
  0x5a   : > { %3213 = vmatpush.bf16.msra.mxu3 %v6898_v33  ;;  %v6130_v39 = vor.u32 %v7193_v38, %v6129_v36  ;;  %v6465_v59 = vld [vmem:[%s11088_s1 + $0x7e8] sm:$0xf]  ;;  %v7277_v60 = vld [vmem:[%s11088_s1 + $0x814] sm:$0xf0] }
  0x5b   : > { %3066 = vmatpush.bf16.msra.mxu0 %v5746_v37  ;;  %v6849_v61 = vld [vmem:[%s11088_s1 + $0xae8] sm:$0xf]  ;;  %v6466_v62 = vor.u32 %v7277_v60, %v6465_v59  ;;  %v7373_v63 = vld [vmem:[%s11088_s1 + $0xb14] sm:$0xf0] }
  0x5c   : > { %3115 = vmatpush.bf16.msra.mxu1 %v6130_v39  ;;  %v6850_v1 = vor.u32 %v7373_v63, %v6849_v61  ;;  %v5697_v16 = vld [vmem:[%s11088_s1 + $0x1e8] sm:$0xf]  ;;  %v7085_v17 = vld [vmem:[%s11088_s1 + $0x214] sm:$0xf0] }
  0x5d   : > { %3165 = vmatpush.bf16.msra.mxu2 %v6466_v62  ;;  %v6081_v18 = vld [vmem:[%s11088_s1 + $0x4e8] sm:$0xf]  ;;  %v5698_v19 = vor.u32 %v7085_v17, %v5697_v16  ;;  %v7181_v28 = vld [vmem:[%s11088_s1 + $0x514] sm:$0xf0] }
  0x5e   : > { %2696 = vmatmul.bf16.gmra.mxu0 %v7837_v12  ;;  %2745 = vmatmul.bf16.gmra.mxu1 %v7839_v13  ;;  %v6082_v29 = vor.u32 %v7181_v28, %v6081_v18  ;;  %v6417_v37 = vld [vmem:[%s11088_s1 + $0x788] sm:$0xf]  ;;  %v7265_v38 = vld [vmem:[%s11088_s1 + $0x7b4] sm:$0xf0] }
  0x5f   : > { %2794 = vmatmul.bf16.gmra.mxu2 %v7841_v14  ;;  %3214 = vmatpush.bf16.msra.mxu3 %v6850_v1  ;;  %v6801_v39 = vld [vmem:[%s11088_s1 + $0xa88] sm:$0xf] }
  0x60   : > { %2843 = vmatmul.bf16.gmra.mxu3 %v7843_v15  ;;  %3067 = vmatpush.bf16.msra.mxu0 %v5698_v19 }
  0x61   : > { %3116 = vmatpush.bf16.msra.mxu1 %v6082_v29 }
  0x6e   : > { %2701 = vmatmul.bf16.gmra.mxu0 %v7881_v40  ;;  %2750 = vmatmul.bf16.gmra.mxu1 %v7883_v41 }
  0x6f   : > { %2799 = vmatmul.bf16.gmra.mxu2 %v7885_v42 }
  0x70   : > { %2848 = vmatmul.bf16.gmra.mxu3 %v7887_v43 }
  0x7e   : > { %2706 = vmatmul.bf16.gmra.mxu0 %v7925_v8  ;;  %2755 = vmatmul.bf16.gmra.mxu1 %v7927_v9 }
  0x7f   : > { %2804 = vmatmul.bf16.gmra.mxu2 %v7929_v10 }
  0x80   : > { %2853 = vmatmul.bf16.gmra.mxu3 %v7931_v11 }
  0x8e   : > { %2711 = vmatmul.bf16.gmra.mxu0 %v7969_v44  ;;  %2760 = vmatmul.bf16.gmra.mxu1 %v7971_v45 }
  0x8f   : > { %2809 = vmatmul.bf16.gmra.mxu2 %v7973_v46 }
  0x90   : > { %2858 = vmatmul.bf16.gmra.mxu3 %v7975_v47 }
  0x9e   : > { %2716 = vmatmul.bf16.gmra.mxu0 %v8013_v20  ;;  %2765 = vmatmul.bf16.gmra.mxu1 %v8015_v21 }
  0x9f   : > { %2814 = vmatmul.bf16.gmra.mxu2 %v8017_v22 }
  0xa0   : > { %2863 = vmatmul.bf16.gmra.mxu3 %v8019_v23 }
  0xab   : > { %v2682_v55 = vpop.f32.mrf.mxu0  ;;  %v2731_v56 = vpop.f32.mrf.mxu1 }
  0xac   : > { %v2732_v58 = vadd.f32 %v2731_v56, %v2682_v55  ;;  %v6418_v55 = vor.u32 %v7265_v38, %v6417_v37  ;;  %v7361_v56 = vld [vmem:[%s11088_s1 + $0xab4] sm:$0xf0] }
  0xad   : > { %v6802_v59 = vor.u32 %v7361_v56, %v6801_v39  ;;  %v7349_v37 = vld [vmem:[%s11088_s1 + $0xa54] sm:$0xf0] }
  0xae   : > { %2877 = vmatmul.bf16.vlgmr.msrb.gmra.mxu0 %v7682_v48  ;;  %2926 = vmatmul.bf16.vlgmr.msrb.gmra.mxu1 %v7689_v53 }
  0xaf   : > { %2975 = vmatmul.bf16.vlgmr.msrb.gmra.mxu2 %v7691_v54  ;;  %3215 = vmatpush.bf16.msra.mxu3 %v6802_v59 }
  0xb0   : > { %3024 = vmatmul.bf16.vlgmr.msrb.gmra.mxu3 %v7699_v57  ;;  %3166 = vmatpush.bf16.msra.mxu2 %v6418_v55 }
  0xb2   : > { %v2780_v0 = vpop.f32.mrf.mxu2 }
  0xb3   : > { %v2781_v2 = vadd.f32 %v2780_v0, %v2732_v58  ;;  %v2829_v3 = vpop.f32.mrf.mxu3  ;;  %v2684_v4 = vpop.f32.mrf.mxu0 }
  0xb4   : > { %v2733_v5 = vpop.f32.mrf.mxu1 }
  0xb5   : > { %v8065_v6 = vadd.f32 %v2829_v3, %v2781_v2  ;;  %v2734_v7 = vadd.f32 %v2733_v5, %v2684_v4  ;;  %v5649_v2 = vld [vmem:[%s11088_s1 + $0x188] sm:$0xf]  ;;  %v7073_v3 = vld [vmem:[%s11088_s1 + $0x1b4] sm:$0xf0] }
  0xb6   : > { %v6033_v4 = vld [vmem:[%s11088_s1 + $0x488] sm:$0xf]  ;;  %v5650_v5 = vor.u32 %v7073_v3, %v5649_v2  ;;  %v7157_v3 = vld [vmem:[%s11088_s1 + $0x454] sm:$0xf0] }
  0xb8   : > { %3068 = vmatpush.bf16.msra.mxu0 %v5650_v5 }
  0xba   : > { %v2782_v30 = vpop.f32.mrf.mxu2 }
  0xbb   : > { %v2783_v31 = vadd.f32 %v2782_v30, %v2734_v7  ;;  %v2831_v32 = vpop.f32.mrf.mxu3  ;;  %v2687_v33 = vpop.f32.mrf.mxu0  ;;  %v7169_v7 = vld [vmem:[%s11088_s1 + $0x4b4] sm:$0xf0] }
  0xbc   : > { %v2736_v34 = vpop.f32.mrf.mxu1  ;;  %v6034_v16 = vor.u32 %v7169_v7, %v6033_v4 }
  0xbd   : > { %v8079_v35 = vadd.f32 %v2831_v32, %v2783_v31  ;;  %v2737_v36 = vadd.f32 %v2736_v34, %v2687_v33  ;;  %v6369_v32 = vld [vmem:[%s11088_s1 + $0x728] sm:$0xf]  ;;  %v7253_v33 = vld [vmem:[%s11088_s1 + $0x754] sm:$0xf0] }
  0xbe   : > { %2882 = vmatmul.bf16.gmra.mxu0 %v7749_v24  ;;  %2931 = vmatmul.bf16.gmra.mxu1 %v7751_v25  ;;  %v6753_v34 = vld [vmem:[%s11088_s1 + $0xa28] sm:$0xf] }
  0xbf   : > { %2980 = vmatmul.bf16.gmra.mxu2 %v7753_v26  ;;  %3117 = vmatpush.bf16.msra.mxu1 %v6034_v16  ;;  %v6754_v39 = vor.u32 %v7349_v37, %v6753_v34  ;;  %v7337_v34 = vld [vmem:[%s11088_s1 + $0x9f4] sm:$0xf0] }
  0xc0   : > { %3029 = vmatmul.bf16.gmra.mxu3 %v7755_v27 }
  0xc1   : > { %3216 = vmatpush.bf16.msra.mxu3 %v6754_v39 }
  0xc2   : > { %v2785_v58 = vpop.f32.mrf.mxu2 }
  0xc3   : > { %v2786_v60 = vadd.f32 %v2785_v58, %v2737_v36  ;;  %v2834_v61 = vpop.f32.mrf.mxu3  ;;  %v2689_v62 = vpop.f32.mrf.mxu0  ;;  %v6370_v36 = vor.u32 %v7253_v33, %v6369_v32  ;;  %v6705_v32 = vld [vmem:[%s11088_s1 + $0x9c8] sm:$0xf] }
  0xc4   : > { %v2738_v63 = vpop.f32.mrf.mxu1  ;;  %v6706_v37 = vor.u32 %v7337_v34, %v6705_v32  ;;  %v6657_v32 = vld [vmem:[%s11088_s1 + $0x968] sm:$0xf]  ;;  %v7325_v34 = vld [vmem:[%s11088_s1 + $0x994] sm:$0xf0] }
  0xc5   : > { %v8097_v0 = vadd.f32 %v2834_v61, %v2786_v60  ;;  %v2739_v1 = vadd.f32 %v2738_v63, %v2689_v62  ;;  %3167 = vmatpush.bf16.msra.mxu2 %v6370_v36  ;;  %v5601_v62 = vld [vmem:[%s11088_s1 + $0x128] sm:$0xf]  ;;  %v7061_v63 = vld [vmem:[%s11088_s1 + $0x154] sm:$0xf0] }
  0xc6   : > { %v5602_v2 = vor.u32 %v7061_v63, %v5601_v62  ;;  %3217 = vmatpush.bf16.msra.mxu3 %v6706_v37  ;;  %v7049_v62 = vld [vmem:[%s11088_s1 + $0xf4] sm:$0xf0]  ;;  %v5937_v63 = vld [vmem:[%s11088_s1 + $0x3c8] sm:$0xf]  ;;  %v6658_v37 = vor.u32 %v7325_v34, %v6657_v32 }
  0xc7   : > { %v6225_v32 = vld [vmem:[%s11088_s1 + $0x608] sm:$0xf] }
  0xc8   : > { %3069 = vmatpush.bf16.msra.mxu0 %v5602_v2  ;;  %v7145_v2 = vld [vmem:[%s11088_s1 + $0x3f4] sm:$0xf0]  ;;  %v6609_v34 = vld [vmem:[%s11088_s1 + $0x908] sm:$0xf] }
  0xca   : > { %v2787_v17 = vpop.f32.mrf.mxu2  ;;  %3218 = vmatpush.bf16.msra.mxu3 %v6658_v37  ;;  %v7313_v37 = vld [vmem:[%s11088_s1 + $0x934] sm:$0xf0] }
  0xcb   : > { %v2788_v18 = vadd.f32 %v2787_v17, %v2739_v1  ;;  %v2836_v19 = vpop.f32.mrf.mxu3  ;;  %v2692_v28 = vpop.f32.mrf.mxu0  ;;  %v5985_v1 = vld [vmem:[%s11088_s1 + $0x428] sm:$0xf] }
  0xcc   : > { %v2741_v29 = vpop.f32.mrf.mxu1  ;;  %v5986_v4 = vor.u32 %v7157_v3, %v5985_v1  ;;  %v5938_v3 = vor.u32 %v7145_v2, %v5937_v63  ;;  %v7037_v63 = vld [vmem:[%s11088_s1 + $0x94] sm:$0xf0] }
  0xcd   : > { %v8111_v30 = vadd.f32 %v2836_v19, %v2788_v18  ;;  %v2742_v31 = vadd.f32 %v2741_v29, %v2692_v28  ;;  %v6321_v29 = vld [vmem:[%s11088_s1 + $0x6c8] sm:$0xf] }
  0xce   : > { %2887 = vmatmul.bf16.gmra.mxu0 %v7793_v49  ;;  %2936 = vmatmul.bf16.gmra.mxu1 %v7795_v50 }
  0xcf   : > { %2985 = vmatmul.bf16.gmra.mxu2 %v7797_v51  ;;  %3118 = vmatpush.bf16.msra.mxu1 %v5986_v4 }
  0xd0   : > { %3034 = vmatmul.bf16.gmra.mxu3 %v7799_v52 }
  0xd2   : > { %v2790_v38 = vpop.f32.mrf.mxu2 }
  0xd3   : > { %v2791_v55 = vadd.f32 %v2790_v38, %v2742_v31  ;;  %v2839_v56 = vpop.f32.mrf.mxu3  ;;  %v2694_v58 = vpop.f32.mrf.mxu0  ;;  %v7241_v31 = vld [vmem:[%s11088_s1 + $0x6f4] sm:$0xf0]  ;;  %3119 = vmatpush.bf16.msra.mxu1 %v5938_v3 }
  0xd4   : > { %v2743_v59 = vpop.f32.mrf.mxu1  ;;  %v6322_v33 = vor.u32 %v7241_v31, %v6321_v29  ;;  %v6273_v29 = vld [vmem:[%s11088_s1 + $0x668] sm:$0xf]  ;;  %v7229_v31 = vld [vmem:[%s11088_s1 + $0x694] sm:$0xf0] }
  0xd5   : > { %v8129_v60 = vadd.f32 %v2839_v56, %v2791_v55  ;;  %v2744_v61 = vadd.f32 %v2743_v59, %v2694_v58  ;;  %v7133_v3 = vld [vmem:[%s11088_s1 + $0x394] sm:$0xf0] }
  0xd6   : > { %3168 = vmatpush.bf16.msra.mxu2 %v6322_v33  ;;  %v6274_v33 = vor.u32 %v7229_v31, %v6273_v29 }
  0xda   : > { %v2792_v5 = vpop.f32.mrf.mxu2  ;;  %3169 = vmatpush.bf16.msra.mxu2 %v6274_v33  ;;  %v7217_v33 = vld [vmem:[%s11088_s1 + $0x634] sm:$0xf0] }
  0xdb   : > { %v2793_v7 = vadd.f32 %v2792_v5, %v2744_v61  ;;  %v2841_v16 = vpop.f32.mrf.mxu3  ;;  %v2697_v17 = vpop.f32.mrf.mxu0  ;;  %v5553_v61 = vld [vmem:[%s11088_s1 + $0xc8] sm:$0xf] }
  0xdc   : > { %v2746_v18 = vpop.f32.mrf.mxu1  ;;  %v5554_v1 = vor.u32 %v7049_v62, %v5553_v61  ;;  %v5505_v62 = vld [vmem:[%s11088_s1 + $0x68] sm:$0xf] }
  0xdd   : > { %v8143_v19 = vadd.f32 %v2841_v16, %v2793_v7  ;;  %v2747_v28 = vadd.f32 %v2746_v18, %v2697_v17  ;;  %v5506_v2 = vor.u32 %v7037_v63, %v5505_v62 }
  0xde   : > { %2892 = vmatmul.bf16.gmra.mxu0 %v7837_v12  ;;  %2941 = vmatmul.bf16.gmra.mxu1 %v7839_v13 }
  0xdf   : > { %2990 = vmatmul.bf16.gmra.mxu2 %v7841_v14  ;;  %3070 = vmatpush.bf16.msra.mxu0 %v5554_v1  ;;  %v5889_v1 = vld [vmem:[%s11088_s1 + $0x368] sm:$0xf] }
  0xe0   : > { %3039 = vmatmul.bf16.gmra.mxu3 %v7843_v15 }
  0xe2   : > { %v2795_v36 = vpop.f32.mrf.mxu2 }
  0xe3   : > { %v2796_v38 = vadd.f32 %v2795_v36, %v2747_v28  ;;  %v2844_v39 = vpop.f32.mrf.mxu3  ;;  %v2699_v55 = vpop.f32.mrf.mxu0  ;;  %3071 = vmatpush.bf16.msra.mxu0 %v5506_v2  ;;  %v5457_v2 = vld [vmem:[%s11088_s1 + $0x8] sm:$0xf] }
  0xe4   : > { %v2748_v56 = vpop.f32.mrf.mxu1 }
  0xe5   : > { %v8161_v58 = vadd.f32 %v2844_v39, %v2796_v38  ;;  %v2749_v59 = vadd.f32 %v2748_v56, %v2699_v55 }
  0xea   : > { %v2797_v4 = vpop.f32.mrf.mxu2 }
  0xeb   : > { %v2798_v5 = vadd.f32 %v2797_v4, %v2749_v59  ;;  %v2846_v7 = vpop.f32.mrf.mxu3  ;;  %v2702_v16 = vpop.f32.mrf.mxu0  ;;  %v5890_v4 = vor.u32 %v7133_v3, %v5889_v1  ;;  %v7025_v3 = vld [vmem:[%s11088_s1 + $0x34] sm:$0xf0] }
  0xec   : > { %v2751_v17 = vpop.f32.mrf.mxu1 }
  0xed   : > { %v8175_v18 = vadd.f32 %v2846_v7, %v2798_v5  ;;  %v2752_v28 = vadd.f32 %v2751_v17, %v2702_v16  ;;  %3120 = vmatpush.bf16.msra.mxu1 %v5890_v4  ;;  %v5841_v4 = vld [vmem:[%s11088_s1 + $0x308] sm:$0xf] }
  0xee   : > { %2897 = vmatmul.bf16.gmra.mxu0 %v7881_v40  ;;  %2946 = vmatmul.bf16.gmra.mxu1 %v7883_v41 }
  0xef   : > { %2995 = vmatmul.bf16.gmra.mxu2 %v7885_v42 }
  0xf0   : > { %3044 = vmatmul.bf16.gmra.mxu3 %v7887_v43 }
  0xf2   : > { %v2800_v36 = vpop.f32.mrf.mxu2 }
  0xf3   : > { %v2801_v38 = vadd.f32 %v2800_v36, %v2752_v28  ;;  %v2849_v39 = vpop.f32.mrf.mxu3  ;;  %v2704_v55 = vpop.f32.mrf.mxu0  ;;  %v6226_v36 = vor.u32 %v7217_v33, %v6225_v32 }
  0xf4   : > { %v2753_v56 = vpop.f32.mrf.mxu1 }
  0xf5   : > { %v8193_v59 = vadd.f32 %v2849_v39, %v2801_v38  ;;  %v2754_v61 = vadd.f32 %v2753_v56, %v2704_v55  ;;  %v6610_v39 = vor.u32 %v7313_v37, %v6609_v34  ;;  %3170 = vmatpush.bf16.msra.mxu2 %v6226_v36  ;;  %v7295_v37 = vld [vmem:[%s11088_s1 + $0x8ac] sm:$0xf] }
  0xf7   : > { %3219 = vmatpush.bf16.msra.mxu3 %v6610_v39  ;;  %v7391_v39 = vld [vmem:[%s11088_s1 + $0xbac] sm:$0xf] }
  0xfa   : > { %v2802_v5 = vpop.f32.mrf.mxu2 }
  0xfb   : > { %v2803_v7 = vadd.f32 %v2802_v5, %v2754_v61  ;;  %v2851_v16 = vpop.f32.mrf.mxu3  ;;  %v2707_v17 = vpop.f32.mrf.mxu0  ;;  %v5458_v5 = vor.u32 %v7025_v3, %v5457_v2 }
  0xfc   : > { %v2756_v28 = vpop.f32.mrf.mxu1 }
  0xfd   : > { %v8207_v29 = vadd.f32 %v2851_v16, %v2803_v7  ;;  %v2757_v31 = vadd.f32 %v2756_v28, %v2707_v17  ;;  %v7121_v7 = vld [vmem:[%s11088_s1 + $0x334] sm:$0xf0]  ;;  %3072 = vmatpush.bf16.msra.mxu0 %v5458_v5 }
  0xfe   : > { %2902 = vmatmul.bf16.gmra.mxu0 %v7925_v8  ;;  %2951 = vmatmul.bf16.gmra.mxu1 %v7927_v9  ;;  %v5842_v16 = vor.u32 %v7121_v7, %v5841_v4 }
  0xff   : > { %3000 = vmatmul.bf16.gmra.mxu2 %v7929_v10 }
 0x100   : > { %3049 = vmatmul.bf16.gmra.mxu3 %v7931_v11  ;;  %3121 = vmatpush.bf16.msra.mxu1 %v5842_v16  ;;  %v7103_v16 = vld [vmem:[%s11088_s1 + $0x2ac] sm:$0xf] }
 0x102   : > { %v2805_v38 = vpop.f32.mrf.mxu2 }
 0x103   : > { %v2806_v55 = vadd.f32 %v2805_v38, %v2757_v31  ;;  %v2854_v56 = vpop.f32.mrf.mxu3  ;;  %v2709_v61 = vpop.f32.mrf.mxu0  ;;  %v6563_v38 = vld [vmem:[%s11088_s1 + $0x8d8] sm:$0xf0] }
 0x104   : > { %v2758_v62 = vpop.f32.mrf.mxu1 }
 0x105   : > { %v8225_v63 = vadd.f32 %v2854_v56, %v2806_v55  ;;  %v2759_v1 = vadd.f32 %v2758_v62, %v2709_v61  ;;  %v6566_v55 = vor.u32 %v7295_v37, %v6563_v38  ;;  %v6947_v56 = vld [vmem:[%s11088_s1 + $0xbd8] sm:$0xf0] }
 0x106   : > { %v6950_v62 = vor.u32 %v7391_v39, %v6947_v56 }
 0x107   : > { %3359 = vmatpush.bf16.msrb.mxu2 %v6566_v55 }
 0x108   : > { %3408 = vmatpush.bf16.msrb.mxu3 %v6950_v62  ;;  %v7283_v62 = vld [vmem:[%s11088_s1 + $0x84c] sm:$0xf] }
 0x10a   : > { %v2807_v17 = vpop.f32.mrf.mxu2 }
 0x10b   : > { %v2808_v28 = vadd.f32 %v2807_v17, %v2759_v1  ;;  %v2856_v31 = vpop.f32.mrf.mxu3  ;;  %v2712_v32 = vpop.f32.mrf.mxu0  ;;  %v5795_v17 = vld [vmem:[%s11088_s1 + $0x2d8] sm:$0xf0] }
 0x10c   : > { %v2761_v33 = vpop.f32.mrf.mxu1 }
 0x10d   : > { %v8239_v34 = vadd.f32 %v2856_v31, %v2808_v28  ;;  %v2762_v36 = vadd.f32 %v2761_v33, %v2712_v32  ;;  %v7199_v28 = vld [vmem:[%s11088_s1 + $0x5ac] sm:$0xf]  ;;  %v5798_v31 = vor.u32 %v7103_v16, %v5795_v17  ;;  %v6179_v32 = vld [vmem:[%s11088_s1 + $0x5d8] sm:$0xf0] }
 0x10e   : > { %2907 = vmatmul.bf16.gmra.mxu0 %v7969_v44  ;;  %2956 = vmatmul.bf16.gmra.mxu1 %v7971_v45  ;;  %v6182_v33 = vor.u32 %v7199_v28, %v6179_v32 }
 0x10f   : > { %3005 = vmatmul.bf16.gmra.mxu2 %v7973_v46  ;;  %3261 = vmatpush.bf16.msrb.mxu0 %v5798_v31 }
 0x110   : > { %3054 = vmatmul.bf16.gmra.mxu3 %v7975_v47  ;;  %3310 = vmatpush.bf16.msrb.mxu1 %v6182_v33 }
 0x112   : > { %v2810_v61 = vpop.f32.mrf.mxu2 }
 0x113   : > { %v2811_v1 = vadd.f32 %v2810_v61, %v2762_v36  ;;  %v2859_v2 = vpop.f32.mrf.mxu3  ;;  %v2714_v3 = vpop.f32.mrf.mxu0 }
 0x114   : > { %v2763_v4 = vpop.f32.mrf.mxu1 }
 0x115   : > { %v8257_v5 = vadd.f32 %v2859_v2, %v2811_v1  ;;  %v2764_v7 = vadd.f32 %v2763_v4, %v2714_v3  ;;  %v6515_v1 = vld [vmem:[%s11088_s1 + $0x878] sm:$0xf0]  ;;  %v7379_v2 = vld [vmem:[%s11088_s1 + $0xb4c] sm:$0xf] }
 0x116   : > { %v6518_v3 = vor.u32 %v7283_v62, %v6515_v1  ;;  %v6899_v4 = vld [vmem:[%s11088_s1 + $0xb78] sm:$0xf0] }
 0x117   : > { %v6902_v16 = vor.u32 %v7379_v2, %v6899_v4 }
 0x118   : > { %3360 = vmatpush.bf16.msrb.mxu2 %v6518_v3 }
 0x119   : > { %3409 = vmatpush.bf16.msrb.mxu3 %v6902_v16 }
 0x11a   : > { %v2812_v36 = vpop.f32.mrf.mxu2 }
 0x11b   : > { %v2813_v37 = vadd.f32 %v2812_v36, %v2764_v7  ;;  %v2861_v38 = vpop.f32.mrf.mxu3  ;;  %v2717_v39 = vpop.f32.mrf.mxu0 }
 0x11c   : > { %v2766_v55 = vpop.f32.mrf.mxu1 }
 0x11d   : > { %v8271_v56 = vadd.f32 %v2861_v38, %v2813_v37  ;;  %v2767_v61 = vadd.f32 %v2766_v55, %v2717_v39  ;;  %v7091_v37 = vld [vmem:[%s11088_s1 + $0x24c] sm:$0xf]  ;;  %v5747_v38 = vld [vmem:[%s11088_s1 + $0x278] sm:$0xf0] }
 0x11e   : > { %2912 = vmatmul.bf16.gmra.mxu0 %v8013_v20  ;;  %2961 = vmatmul.bf16.gmra.mxu1 %v8015_v21  ;;  %v7187_v39 = vld [vmem:[%s11088_s1 + $0x54c] sm:$0xf]  ;;  %v5750_v55 = vor.u32 %v7091_v37, %v5747_v38  ;;  %v6851_v37 = vld [vmem:[%s11088_s1 + $0xb18] sm:$0xf0] }
 0x11f   : > { %3010 = vmatmul.bf16.gmra.mxu2 %v8017_v22 }
 0x120   : > { %3059 = vmatmul.bf16.gmra.mxu3 %v8019_v23  ;;  %3262 = vmatpush.bf16.msrb.mxu0 %v5750_v55 }
 0x122   : > { %v2815_v7 = vpop.f32.mrf.mxu2 }
 0x123   : > { %v2816_v17 = vadd.f32 %v2815_v7, %v2767_v61  ;;  %v2864_v28 = vpop.f32.mrf.mxu3  ;;  %v2719_v31 = vpop.f32.mrf.mxu0  ;;  %v6131_v61 = vld [vmem:[%s11088_s1 + $0x578] sm:$0xf0] }
 0x124   : > { %v2768_v32 = vpop.f32.mrf.mxu1  ;;  %v6134_v62 = vor.u32 %v7187_v39, %v6131_v61 }
 0x125   : > { %v8289_v33 = vadd.f32 %v2864_v28, %v2816_v17  ;;  %v2769_v36 = vadd.f32 %v2768_v32, %v2719_v31  ;;  %v7271_v28 = vld [vmem:[%s11088_s1 + $0x7ec] sm:$0xf]  ;;  %v6467_v31 = vld [vmem:[%s11088_s1 + $0x818] sm:$0xf0] }
 0x126   : > { %3311 = vmatpush.bf16.msrb.mxu1 %v6134_v62  ;;  %v7367_v32 = vld [vmem:[%s11088_s1 + $0xaec] sm:$0xf] }
 0x127   : > { %v6854_v39 = vor.u32 %v7367_v32, %v6851_v37  ;;  %v6083_v32 = vld [vmem:[%s11088_s1 + $0x518] sm:$0xf0] }
 0x129   : > { %3410 = vmatpush.bf16.msrb.mxu3 %v6854_v39 }
 0x12a   : > { %v2817_v1 = vpop.f32.mrf.mxu2 }
 0x12b   : > { %v2818_v2 = vadd.f32 %v2817_v1, %v2769_v36  ;;  %v2866_v3 = vpop.f32.mrf.mxu3  ;;  %v2878_v4 = vpop.f32.mrf.mxu0  ;;  %v6470_v36 = vor.u32 %v7271_v28, %v6467_v31  ;;  %v5699_v28 = vld [vmem:[%s11088_s1 + $0x218] sm:$0xf0] }
 0x12c   : > { %v2927_v7 = vpop.f32.mrf.mxu1 }
 0x12d   : > { %v8303_v16 = vadd.f32 %v2866_v3, %v2818_v2  ;;  %v2928_v17 = vadd.f32 %v2927_v7, %v2878_v4  ;;  %3361 = vmatpush.bf16.msrb.mxu2 %v6470_v36  ;;  %v7079_v7 = vld [vmem:[%s11088_s1 + $0x1ec] sm:$0xf] }
 0x12e   : > { %3073 = vmatmul.bf16.vlgmr.msra.gmra.mxu0 %v7682_v48  ;;  %3122 = vmatmul.bf16.vlgmr.msra.gmra.mxu1 %v7689_v53  ;;  %v5702_v31 = vor.u32 %v7079_v7, %v5699_v28  ;;  %v6419_v28 = vld [vmem:[%s11088_s1 + $0x7b8] sm:$0xf0] }
 0x12f   : > { %3171 = vmatmul.bf16.vlgmr.msra.gmra.mxu2 %v7691_v54 }
 0x130   : > { %3220 = vmatmul.bf16.vlgmr.msra.gmra.mxu3 %v7699_v57  ;;  %3263 = vmatpush.bf16.msrb.mxu0 %v5702_v31 }
 0x132   : > { %v2976_v38 = vpop.f32.mrf.mxu2 }
 0x133   : > { %v2977_v55 = vadd.f32 %v2976_v38, %v2928_v17  ;;  %v3025_v61 = vpop.f32.mrf.mxu3  ;;  %v2880_v62 = vpop.f32.mrf.mxu0  ;;  %v7175_v17 = vld [vmem:[%s11088_s1 + $0x4ec] sm:$0xf] }
 0x134   : > { %v2929_v1 = vpop.f32.mrf.mxu1  ;;  %v6086_v36 = vor.u32 %v7175_v17, %v6083_v32  ;;  %v7355_v17 = vld [vmem:[%s11088_s1 + $0xa8c] sm:$0xf]  ;;  %v6803_v32 = vld [vmem:[%s11088_s1 + $0xab8] sm:$0xf0] }
 0x135   : > { %v8321_v2 = vadd.f32 %v3025_v61, %v2977_v55  ;;  %v2930_v3 = vadd.f32 %v2929_v1, %v2880_v62 }
 0x136   : > { %3312 = vmatpush.bf16.msrb.mxu1 %v6086_v36 }
 0x13a   : > { %v2978_v37 = vpop.f32.mrf.mxu2 }
 0x13b   : > { %v2979_v38 = vadd.f32 %v2978_v37, %v2930_v3  ;;  %v3027_v39 = vpop.f32.mrf.mxu3  ;;  %v2883_v55 = vpop.f32.mrf.mxu0  ;;  %v7259_v3 = vld [vmem:[%s11088_s1 + $0x78c] sm:$0xf]  ;;  %v6806_v37 = vor.u32 %v7355_v17, %v6803_v32 }
 0x13c   : > { %v2932_v61 = vpop.f32.mrf.mxu1  ;;  %v6422_v31 = vor.u32 %v7259_v3, %v6419_v28  ;;  %v7067_v3 = vld [vmem:[%s11088_s1 + $0x18c] sm:$0xf]  ;;  %v5651_v28 = vld [vmem:[%s11088_s1 + $0x1b8] sm:$0xf0] }
 0x13d   : > { %v8337_v62 = vadd.f32 %v3027_v39, %v2979_v38  ;;  %v2933_v1 = vadd.f32 %v2932_v61, %v2883_v55  ;;  %3411 = vmatpush.bf16.msrb.mxu3 %v6806_v37  ;;  %v5654_v17 = vor.u32 %v7067_v3, %v5651_v28  ;;  %v6371_v28 = vld [vmem:[%s11088_s1 + $0x758] sm:$0xf0] }
 0x13e   : > { %3078 = vmatmul.bf16.gmra.mxu0 %v7749_v24  ;;  %3127 = vmatmul.bf16.gmra.mxu1 %v7751_v25 }
 0x13f   : > { %3176 = vmatmul.bf16.gmra.mxu2 %v7753_v26  ;;  %3264 = vmatpush.bf16.msrb.mxu0 %v5654_v17 }
 0x140   : > { %3225 = vmatmul.bf16.gmra.mxu3 %v7755_v27  ;;  %3362 = vmatpush.bf16.msrb.mxu2 %v6422_v31  ;;  %v6035_v31 = vld [vmem:[%s11088_s1 + $0x4b8] sm:$0xf0] }
 0x142   : > { %v2981_v36 = vpop.f32.mrf.mxu2 }
 0x143   : > { %v2982_v38 = vadd.f32 %v2981_v36, %v2933_v1  ;;  %v3030_v39 = vpop.f32.mrf.mxu3  ;;  %v2885_v55 = vpop.f32.mrf.mxu0  ;;  %v7163_v1 = vld [vmem:[%s11088_s1 + $0x48c] sm:$0xf] }
 0x144   : > { %v2934_v61 = vpop.f32.mrf.mxu1  ;;  %v6038_v32 = vor.u32 %v7163_v1, %v6035_v31  ;;  %v7343_v1 = vld [vmem:[%s11088_s1 + $0xa2c] sm:$0xf]  ;;  %v6755_v31 = vld [vmem:[%s11088_s1 + $0xa58] sm:$0xf0] }
 0x145   : > { %v8357_v7 = vadd.f32 %v3030_v39, %v2982_v38  ;;  %v2935_v4 = vadd.f32 %v2934_v61, %v2885_v55 }
 0x146   : > { %3313 = vmatpush.bf16.msrb.mxu1 %v6038_v32 }
 0x14a   : > { %v2983_v36 = vpop.f32.mrf.mxu2 }
 0x14b   : > { %v2984_v37 = vadd.f32 %v2983_v36, %v2935_v4  ;;  %v3032_v38 = vpop.f32.mrf.mxu3  ;;  %v2888_v39 = vpop.f32.mrf.mxu0  ;;  %v7247_v4 = vld [vmem:[%s11088_s1 + $0x72c] sm:$0xf]  ;;  %v6758_v36 = vor.u32 %v7343_v1, %v6755_v31 }
 0x14c   : > { %v2937_v55 = vpop.f32.mrf.mxu1  ;;  %v6374_v17 = vor.u32 %v7247_v4, %v6371_v28  ;;  %v7055_v4 = vld [vmem:[%s11088_s1 + $0x12c] sm:$0xf]  ;;  %v5603_v28 = vld [vmem:[%s11088_s1 + $0x158] sm:$0xf0] }
 0x14d   : > { %v8373_v61 = vadd.f32 %v3032_v38, %v2984_v37  ;;  %v2938_v27 = vadd.f32 %v2937_v55, %v2888_v39  ;;  %3412 = vmatpush.bf16.msrb.mxu3 %v6758_v36  ;;  %v5606_v1 = vor.u32 %v7055_v4, %v5603_v28  ;;  %v6323_v28 = vld [vmem:[%s11088_s1 + $0x6f8] sm:$0xf0] }
 0x14e   : > { %3083 = vmatmul.bf16.gmra.mxu0 %v7793_v49  ;;  %3132 = vmatmul.bf16.gmra.mxu1 %v7795_v50 }
 0x14f   : > { %3181 = vmatmul.bf16.gmra.mxu2 %v7797_v51  ;;  %3265 = vmatpush.bf16.msrb.mxu0 %v5606_v1 }
 0x150   : > { %3230 = vmatmul.bf16.gmra.mxu3 %v7799_v52  ;;  %3363 = vmatpush.bf16.msrb.mxu2 %v6374_v17  ;;  %v5987_v17 = vld [vmem:[%s11088_s1 + $0x458] sm:$0xf0] }
 0x152   : > { %v2986_v32 = vpop.f32.mrf.mxu2 }
 0x153   : > { %v2987_v37 = vadd.f32 %v2986_v32, %v2938_v27  ;;  %v3035_v38 = vpop.f32.mrf.mxu3  ;;  %v2890_v39 = vpop.f32.mrf.mxu0  ;;  %v7151_v27 = vld [vmem:[%s11088_s1 + $0x42c] sm:$0xf] }
 0x154   : > { %v2939_v55 = vpop.f32.mrf.mxu1  ;;  %v5990_v31 = vor.u32 %v7151_v27, %v5987_v17  ;;  %v7331_v27 = vld [vmem:[%s11088_s1 + $0x9cc] sm:$0xf]  ;;  %v6707_v17 = vld [vmem:[%s11088_s1 + $0x9f8] sm:$0xf0] }
 0x155   : > { %v8393_v3 = vadd.f32 %v3035_v38, %v2987_v37  ;;  %v2940_v52 = vadd.f32 %v2939_v55, %v2890_v39 }
 0x156   : > { %3314 = vmatpush.bf16.msrb.mxu1 %v5990_v31 }
 0x15a   : > { %v2988_v32 = vpop.f32.mrf.mxu2 }
 0x15b   : > { %v2989_v36 = vadd.f32 %v2988_v32, %v2940_v52  ;;  %v3037_v37 = vpop.f32.mrf.mxu3  ;;  %v2893_v38 = vpop.f32.mrf.mxu0  ;;  %v7235_v52 = vld [vmem:[%s11088_s1 + $0x6cc] sm:$0xf]  ;;  %v6710_v32 = vor.u32 %v7331_v27, %v6707_v17 }
 0x15c   : > { %v2942_v39 = vpop.f32.mrf.mxu1  ;;  %v6326_v1 = vor.u32 %v7235_v52, %v6323_v28  ;;  %v7043_v52 = vld [vmem:[%s11088_s1 + $0xcc] sm:$0xf]  ;;  %v5555_v28 = vld [vmem:[%s11088_s1 + $0xf8] sm:$0xf0] }
 0x15d   : > { %v8409_v55 = vadd.f32 %v3037_v37, %v2989_v36  ;;  %v2943_v51 = vadd.f32 %v2942_v39, %v2893_v38  ;;  %3413 = vmatpush.bf16.msrb.mxu3 %v6710_v32  ;;  %v5558_v27 = vor.u32 %v7043_v52, %v5555_v28  ;;  %v6275_v28 = vld [vmem:[%s11088_s1 + $0x698] sm:$0xf0] }
 0x15e   : > { %3088 = vmatmul.bf16.gmra.mxu0 %v7837_v12  ;;  %3137 = vmatmul.bf16.gmra.mxu1 %v7839_v13 }
 0x15f   : > { %3186 = vmatmul.bf16.gmra.mxu2 %v7841_v14  ;;  %3266 = vmatpush.bf16.msrb.mxu0 %v5558_v27 }
 0x160   : > { %3235 = vmatmul.bf16.gmra.mxu3 %v7843_v15  ;;  %3364 = vmatpush.bf16.msrb.mxu2 %v6326_v1  ;;  %v5939_v1 = vld [vmem:[%s11088_s1 + $0x3f8] sm:$0xf0] }
 0x162   : > { %v2991_v31 = vpop.f32.mrf.mxu2 }
 0x163   : > { %v2992_v36 = vadd.f32 %v2991_v31, %v2943_v51  ;;  %v3040_v37 = vpop.f32.mrf.mxu3  ;;  %v2895_v38 = vpop.f32.mrf.mxu0  ;;  %v7139_v51 = vld [vmem:[%s11088_s1 + $0x3cc] sm:$0xf] }
 0x164   : > { %v2944_v39 = vpop.f32.mrf.mxu1  ;;  %v5942_v17 = vor.u32 %v7139_v51, %v5939_v1  ;;  %v7319_v51 = vld [vmem:[%s11088_s1 + $0x96c] sm:$0xf]  ;;  %v6659_v1 = vld [vmem:[%s11088_s1 + $0x998] sm:$0xf0] }
 0x165   : > { %v8429_v4 = vadd.f32 %v3040_v37, %v2992_v36  ;;  %v2945_v15 = vadd.f32 %v2944_v39, %v2895_v38 }
 0x166   : > { %3315 = vmatpush.bf16.msrb.mxu1 %v5942_v17 }
 0x16a   : > { %v2993_v31 = vpop.f32.mrf.mxu2 }
 0x16b   : > { %v2994_v32 = vadd.f32 %v2993_v31, %v2945_v15  ;;  %v3042_v36 = vpop.f32.mrf.mxu3  ;;  %v2898_v37 = vpop.f32.mrf.mxu0  ;;  %v7223_v15 = vld [vmem:[%s11088_s1 + $0x66c] sm:$0xf]  ;;  %v6662_v31 = vor.u32 %v7319_v51, %v6659_v1 }
 0x16c   : > { %v2947_v38 = vpop.f32.mrf.mxu1  ;;  %v6278_v27 = vor.u32 %v7223_v15, %v6275_v28  ;;  %v7031_v15 = vld [vmem:[%s11088_s1 + $0x6c] sm:$0xf]  ;;  %v5507_v28 = vld [vmem:[%s11088_s1 + $0x98] sm:$0xf0] }
 0x16d   : > { %v8445_v39 = vadd.f32 %v3042_v36, %v2994_v32  ;;  %v2948_v14 = vadd.f32 %v2947_v38, %v2898_v37  ;;  %3414 = vmatpush.bf16.msrb.mxu3 %v6662_v31  ;;  %v5510_v51 = vor.u32 %v7031_v15, %v5507_v28  ;;  %v6227_v28 = vld [vmem:[%s11088_s1 + $0x638] sm:$0xf0] }
 0x16e   : > { %3093 = vmatmul.bf16.gmra.mxu0 %v7881_v40  ;;  %3142 = vmatmul.bf16.gmra.mxu1 %v7883_v41 }
 0x16f   : > { %3191 = vmatmul.bf16.gmra.mxu2 %v7885_v42  ;;  %3267 = vmatpush.bf16.msrb.mxu0 %v5510_v51 }
 0x170   : > { %3240 = vmatmul.bf16.gmra.mxu3 %v7887_v43  ;;  %3365 = vmatpush.bf16.msrb.mxu2 %v6278_v27  ;;  %v5891_v27 = vld [vmem:[%s11088_s1 + $0x398] sm:$0xf0] }
 0x172   : > { %v2996_v17 = vpop.f32.mrf.mxu2 }
 0x173   : > { %v2997_v32 = vadd.f32 %v2996_v17, %v2948_v14  ;;  %v3045_v36 = vpop.f32.mrf.mxu3  ;;  %v2900_v37 = vpop.f32.mrf.mxu0  ;;  %v7127_v14 = vld [vmem:[%s11088_s1 + $0x36c] sm:$0xf] }
 0x174   : > { %v2949_v38 = vpop.f32.mrf.mxu1  ;;  %v5894_v1 = vor.u32 %v7127_v14, %v5891_v27  ;;  %v7307_v14 = vld [vmem:[%s11088_s1 + $0x90c] sm:$0xf]  ;;  %v6611_v27 = vld [vmem:[%s11088_s1 + $0x938] sm:$0xf0] }
 0x175   : > { %v8465_v52 = vadd.f32 %v3045_v36, %v2997_v32  ;;  %v2950_v43 = vadd.f32 %v2949_v38, %v2900_v37 }
 0x176   : > { %3316 = vmatpush.bf16.msrb.mxu1 %v5894_v1 }
 0x17a   : > { %v2998_v17 = vpop.f32.mrf.mxu2 }
 0x17b   : > { %v2999_v31 = vadd.f32 %v2998_v17, %v2950_v43  ;;  %v3047_v32 = vpop.f32.mrf.mxu3  ;;  %v2903_v36 = vpop.f32.mrf.mxu0  ;;  %v7211_v43 = vld [vmem:[%s11088_s1 + $0x60c] sm:$0xf]  ;;  %v6614_v17 = vor.u32 %v7307_v14, %v6611_v27 }
 0x17c   : > { %v2952_v37 = vpop.f32.mrf.mxu1  ;;  %v6230_v51 = vor.u32 %v7211_v43, %v6227_v28  ;;  %v7019_v43 = vld [vmem:[%s11088_s1 + $0xc] sm:$0xf]  ;;  %v5459_v28 = vld [vmem:[%s11088_s1 + $0x38] sm:$0xf0] }
 0x17d   : > { %v8481_v38 = vadd.f32 %v3047_v32, %v2999_v31  ;;  %v2953_v42 = vadd.f32 %v2952_v37, %v2903_v36  ;;  %3415 = vmatpush.bf16.msrb.mxu3 %v6614_v17  ;;  %v5462_v14 = vor.u32 %v7019_v43, %v5459_v28  ;;  %v7302_v28 = vld [vmem:[%s11088_s1 + $0x8dc] sm:$0xf0] }
 0x17e   : > { %3098 = vmatmul.bf16.gmra.mxu0 %v7925_v8  ;;  %3147 = vmatmul.bf16.gmra.mxu1 %v7927_v9 }
 0x17f   : > { %3196 = vmatmul.bf16.gmra.mxu2 %v7929_v10  ;;  %3268 = vmatpush.bf16.msrb.mxu0 %v5462_v14 }
 0x180   : > { %3245 = vmatmul.bf16.gmra.mxu3 %v7931_v11  ;;  %3366 = vmatpush.bf16.msrb.mxu2 %v6230_v51  ;;  %v5843_v51 = vld [vmem:[%s11088_s1 + $0x338] sm:$0xf0] }
 0x182   : > { %v3001_v1 = vpop.f32.mrf.mxu2 }
 0x183   : > { %v3002_v31 = vadd.f32 %v3001_v1, %v2953_v42  ;;  %v3050_v32 = vpop.f32.mrf.mxu3  ;;  %v2905_v36 = vpop.f32.mrf.mxu0  ;;  %v7115_v42 = vld [vmem:[%s11088_s1 + $0x30c] sm:$0xf] }
 0x184   : > { %v2954_v37 = vpop.f32.mrf.mxu1  ;;  %v5846_v27 = vor.u32 %v7115_v42, %v5843_v51  ;;  %v6953_v42 = vld [vmem:[%s11088_s1 + $0xbb0] sm:$0xf]  ;;  %v7398_v51 = vld [vmem:[%s11088_s1 + $0xbdc] sm:$0xf0] }
 0x185   : > { %v8501_v15 = vadd.f32 %v3050_v32, %v3002_v31  ;;  %v2955_v11 = vadd.f32 %v2954_v37, %v2905_v36 }
 0x186   : > { %3317 = vmatpush.bf16.msrb.mxu1 %v5846_v27 }
 0x18a   : > { %v3003_v1 = vpop.f32.mrf.mxu2 }
 0x18b   : > { %v3004_v17 = vadd.f32 %v3003_v1, %v2955_v11  ;;  %v3052_v31 = vpop.f32.mrf.mxu3  ;;  %v2908_v32 = vpop.f32.mrf.mxu0  ;;  %v6569_v11 = vld [vmem:[%s11088_s1 + $0x8b0] sm:$0xf]  ;;  %v6954_v1 = vor.u32 %v7398_v51, %v6953_v42 }
 0x18c   : > { %v2957_v36 = vpop.f32.mrf.mxu1  ;;  %v6570_v14 = vor.u32 %v7302_v28, %v6569_v11  ;;  %v5801_v11 = vld [vmem:[%s11088_s1 + $0x2b0] sm:$0xf]  ;;  %v7110_v28 = vld [vmem:[%s11088_s1 + $0x2dc] sm:$0xf0] }
 0x18d   : > { %v8517_v37 = vadd.f32 %v3052_v31, %v3004_v17  ;;  %v2958_v10 = vadd.f32 %v2957_v36, %v2908_v32  ;;  %3604 = vmatpush.bf16.msra.mxu3 %v6954_v1  ;;  %v5802_v42 = vor.u32 %v7110_v28, %v5801_v11  ;;  %v7290_v28 = vld [vmem:[%s11088_s1 + $0x87c] sm:$0xf0] }
 0x18e   : > { %3103 = vmatmul.bf16.gmra.mxu0 %v7969_v44  ;;  %3152 = vmatmul.bf16.gmra.mxu1 %v7971_v45 }
 0x18f   : > { %3201 = vmatmul.bf16.gmra.mxu2 %v7973_v46  ;;  %3457 = vmatpush.bf16.msra.mxu0 %v5802_v42 }
 0x190   : > { %3250 = vmatmul.bf16.gmra.mxu3 %v7975_v47  ;;  %3555 = vmatpush.bf16.msra.mxu2 %v6570_v14  ;;  %v7206_v14 = vld [vmem:[%s11088_s1 + $0x5dc] sm:$0xf0] }
 0x192   : > { %v3006_v27 = vpop.f32.mrf.mxu2 }
 0x193   : > { %v3007_v17 = vadd.f32 %v3006_v27, %v2958_v10  ;;  %v3055_v31 = vpop.f32.mrf.mxu3  ;;  %v2910_v32 = vpop.f32.mrf.mxu0  ;;  %v6185_v10 = vld [vmem:[%s11088_s1 + $0x5b0] sm:$0xf] }
 0x194   : > { %v2959_v36 = vpop.f32.mrf.mxu1  ;;  %v6186_v51 = vor.u32 %v7206_v14, %v6185_v10  ;;  %v6905_v10 = vld [vmem:[%s11088_s1 + $0xb50] sm:$0xf]  ;;  %v7386_v14 = vld [vmem:[%s11088_s1 + $0xb7c] sm:$0xf0] }
 0x195   : > { %v8537_v43 = vadd.f32 %v3055_v31, %v3007_v17  ;;  %v2960_v47 = vadd.f32 %v2959_v36, %v2910_v32 }
 0x196   : > { %3506 = vmatpush.bf16.msra.mxu1 %v6186_v51 }
 0x19a   : > { %v3008_v27 = vpop.f32.mrf.mxu2 }
 0x19b   : > { %v3009_v1 = vadd.f32 %v3008_v27, %v2960_v47  ;;  %v3057_v17 = vpop.f32.mrf.mxu3  ;;  %v2913_v31 = vpop.f32.mrf.mxu0  ;;  %v6521_v47 = vld [vmem:[%s11088_s1 + $0x850] sm:$0xf]  ;;  %v6906_v27 = vor.u32 %v7386_v14, %v6905_v10 }
 0x19c   : > { %v2962_v32 = vpop.f32.mrf.mxu1  ;;  %v6522_v42 = vor.u32 %v7290_v28, %v6521_v47  ;;  %v5753_v47 = vld [vmem:[%s11088_s1 + $0x250] sm:$0xf]  ;;  %v7098_v28 = vld [vmem:[%s11088_s1 + $0x27c] sm:$0xf0] }
 0x19d   : > { %v8553_v36 = vadd.f32 %v3057_v17, %v3009_v1  ;;  %v2963_v46 = vadd.f32 %v2962_v32, %v2913_v31  ;;  %3605 = vmatpush.bf16.msra.mxu3 %v6906_v27  ;;  %v5754_v10 = vor.u32 %v7098_v28, %v5753_v47  ;;  %v7278_v28 = vld [vmem:[%s11088_s1 + $0x81c] sm:$0xf0] }
 0x19e   : > { %3108 = vmatmul.bf16.gmra.mxu0 %v8013_v20  ;;  %3157 = vmatmul.bf16.gmra.mxu1 %v8015_v21 }
 0x19f   : > { %3206 = vmatmul.bf16.gmra.mxu2 %v8017_v22  ;;  %3458 = vmatpush.bf16.msra.mxu0 %v5754_v10 }
 0x1a0   : > { %3255 = vmatmul.bf16.gmra.mxu3 %v8019_v23  ;;  %3556 = vmatpush.bf16.msra.mxu2 %v6522_v42  ;;  %v7194_v42 = vld [vmem:[%s11088_s1 + $0x57c] sm:$0xf0] }
 0x1a2   : > { %v3011_v51 = vpop.f32.mrf.mxu2 }
 0x1a3   : > { %v3012_v1 = vadd.f32 %v3011_v51, %v2963_v46  ;;  %v3060_v17 = vpop.f32.mrf.mxu3  ;;  %v2915_v31 = vpop.f32.mrf.mxu0  ;;  %v6137_v46 = vld [vmem:[%s11088_s1 + $0x550] sm:$0xf] }
 0x1a4   : > { %v2964_v32 = vpop.f32.mrf.mxu1  ;;  %v6138_v14 = vor.u32 %v7194_v42, %v6137_v46  ;;  %v6857_v46 = vld [vmem:[%s11088_s1 + $0xaf0] sm:$0xf]  ;;  %v7374_v42 = vld [vmem:[%s11088_s1 + $0xb1c] sm:$0xf0] }
 0x1a5   : > { %v8573_v11 = vadd.f32 %v3060_v17, %v3012_v1  ;;  %v2965_v23 = vadd.f32 %v2964_v32, %v2915_v31 }
 0x1a6   : > { %3507 = vmatpush.bf16.msra.mxu1 %v6138_v14 }
 0x1aa   : > { %v3013_v51 = vpop.f32.mrf.mxu2 }
 0x1ab   : > { %v3014_v27 = vadd.f32 %v3013_v51, %v2965_v23  ;;  %v3062_v1 = vpop.f32.mrf.mxu3  ;;  %v3074_v17 = vpop.f32.mrf.mxu0  ;;  %v6473_v23 = vld [vmem:[%s11088_s1 + $0x7f0] sm:$0xf]  ;;  %v6858_v51 = vor.u32 %v7374_v42, %v6857_v46 }
 0x1ac   : > { %v3123_v31 = vpop.f32.mrf.mxu1  ;;  %v6474_v10 = vor.u32 %v7278_v28, %v6473_v23  ;;  %v5705_v23 = vld [vmem:[%s11088_s1 + $0x1f0] sm:$0xf] }
 0x1ad   : > { %v8589_v32 = vadd.f32 %v3062_v1, %v3014_v27  ;;  %v3124_v22 = vadd.f32 %v3123_v31, %v3074_v17  ;;  %3606 = vmatpush.bf16.msra.mxu3 %v6858_v51  ;;  %v6089_v28 = vld [vmem:[%s11088_s1 + $0x4f0] sm:$0xf] }
 0x1ae   : > { %3269 = vmatmul.bf16.vlgmr.msrb.gmra.mxu0 %v7682_v48  ;;  %3318 = vmatmul.bf16.vlgmr.msrb.gmra.mxu1 %v7689_v53 }
 0x1af   : > { %3367 = vmatmul.bf16.vlgmr.msrb.gmra.mxu2 %v7691_v54  ;;  %v11203_v54 = vmax.f32 %v8065_v6, %v8321_v2 }
 0x1b0   : > { %3416 = vmatmul.bf16.vlgmr.msrb.gmra.mxu3 %v7699_v57  ;;  %3557 = vmatpush.bf16.msra.mxu2 %v6474_v10  ;;  %v7182_v10 = vld [vmem:[%s11088_s1 + $0x51c] sm:$0xf0] }
 0x1b1   : > { %v6090_v6 = vor.u32 %v7182_v10, %v6089_v28 }
 0x1b2   : > { %v3172_v14 = vpop.f32.mrf.mxu2 }
 0x1b3   : > { %v3173_v27 = vadd.f32 %v3172_v14, %v3124_v22  ;;  %v3221_v1 = vpop.f32.mrf.mxu3  ;;  %v3076_v17 = vpop.f32.mrf.mxu0  ;;  %v7086_v22 = vld [vmem:[%s11088_s1 + $0x21c] sm:$0xf0]  ;;  %3508 = vmatpush.bf16.msra.mxu1 %v6090_v6 }
 0x1b4   : > { %v3125_v31 = vpop.f32.mrf.mxu1  ;;  %v5706_v46 = vor.u32 %v7086_v22, %v5705_v23  ;;  %v7266_v23 = vld [vmem:[%s11088_s1 + $0x7bc] sm:$0xf0] }
 0x1b5   : > { %v3222_v47 = vadd.f32 %v3221_v1, %v3173_v27  ;;  %v3126_v57 = vadd.f32 %v3125_v31, %v3076_v17  ;;  %v11204_v1 = vmax.f32 %v8079_v35, %v8337_v62  ;;  %v11205_v31 = vld [vmem:[#allocation5_spill] sm:$0xff]  ;;  %v6809_v35 = vld [vmem:[%s11088_s1 + $0xa90] sm:$0xf]  ;;  %v7362_v22 = vld [vmem:[%s11088_s1 + $0xabc] sm:$0xf0] }
 0x1b6   : > { %3459 = vmatpush.bf16.msra.mxu0 %v5706_v46  ;;  %v6810_v46 = vor.u32 %v7362_v22, %v6809_v35  ;;  %v7170_v35 = vld [vmem:[%s11088_s1 + $0x4bc] sm:$0xf0] }
 0x1b7   : > { %v8612_v53 = vmax.f32 %v11203_v54, %v3222_v47 }
 0x1b8   : > { %3607 = vmatpush.bf16.msra.mxu3 %v6810_v46 }
 0x1ba   : > { %v3174_v54 = vpop.f32.mrf.mxu2 }
 0x1bb   : > { %v3175_v2 = vadd.f32 %v3174_v54, %v3126_v57  ;;  %v3223_v47 = vpop.f32.mrf.mxu3  ;;  %v3079_v42 = vpop.f32.mrf.mxu0  ;;  %v6425_v57 = vld [vmem:[%s11088_s1 + $0x790] sm:$0xf] }
 0x1bc   : > { %v3128_v14 = vpop.f32.mrf.mxu1  ;;  %v6426_v62 = vor.u32 %v7266_v23, %v6425_v57  ;;  %v6041_v57 = vld [vmem:[%s11088_s1 + $0x490] sm:$0xf] }
 0x1bd   : > { %v3224_v51 = vadd.f32 %v3223_v47, %v3175_v2  ;;  %v3129_v27 = vadd.f32 %v3128_v14, %v3079_v42  ;;  %v11206_v14 = vmax.f32 %v8097_v0, %v8357_v7  ;;  %v6042_v0 = vor.u32 %v7170_v35, %v6041_v57 }
 0x1be   : > { %3274 = vmatmul.bf16.gmra.mxu0 %v7749_v24  ;;  %3323 = vmatmul.bf16.gmra.mxu1 %v7751_v25 }
 0x1bf   : > { %v8630_v17 = vmax.f32 %v11204_v1, %v3224_v51  ;;  %3372 = vmatmul.bf16.gmra.mxu2 %v7753_v26  ;;  %v5657_v1 = vld [vmem:[%s11088_s1 + $0x190] sm:$0xf]  ;;  %3509 = vmatpush.bf16.msra.mxu1 %v6042_v0 }
 0x1c0   : > { %3421 = vmatmul.bf16.gmra.mxu3 %v11205_v31  ;;  %3558 = vmatpush.bf16.msra.mxu2 %v6426_v62 }
 0x1c2   : > { %v3177_v28 = vpop.f32.mrf.mxu2 }
 0x1c3   : > { %v3178_v10 = vadd.f32 %v3177_v28, %v3129_v27  ;;  %v3226_v6 = vpop.f32.mrf.mxu3  ;;  %v3081_v54 = vpop.f32.mrf.mxu0  ;;  %v7074_v27 = vld [vmem:[%s11088_s1 + $0x1bc] sm:$0xf0] }
 0x1c4   : > { %v3130_v2 = vpop.f32.mrf.mxu1  ;;  %v5658_v23 = vor.u32 %v7074_v27, %v5657_v1  ;;  %v7254_v1 = vld [vmem:[%s11088_s1 + $0x75c] sm:$0xf0] }
 0x1c5   : > { %v3227_v47 = vadd.f32 %v3226_v6, %v3178_v10  ;;  %v3131_v42 = vadd.f32 %v3130_v2, %v3081_v54  ;;  %v11207_v54 = vmax.f32 %v8111_v30, %v8373_v61  ;;  %v6761_v30 = vld [vmem:[%s11088_s1 + $0xa30] sm:$0xf]  ;;  %v7350_v27 = vld [vmem:[%s11088_s1 + $0xa5c] sm:$0xf0] }
 0x1c6   : > { %3460 = vmatpush.bf16.msra.mxu0 %v5658_v23  ;;  %v6762_v23 = vor.u32 %v7350_v27, %v6761_v30  ;;  %v7158_v30 = vld [vmem:[%s11088_s1 + $0x45c] sm:$0xf0] }
 0x1c7   : > { %v8650_v51 = vmax.f32 %v11206_v14, %v3227_v47  ;;  %v11208_v47 = vld [vmem:[#allocation6_spill] sm:$0xff]  ;;  %v11209_v14 = vld [vmem:[#allocation7_spill] sm:$0xff] }
 0x1c8   : > { %3608 = vmatpush.bf16.msra.mxu3 %v6762_v23 }
 0x1ca   : > { %v3179_v7 = vpop.f32.mrf.mxu2 }
 0x1cb   : > { %v3180_v62 = vadd.f32 %v3179_v7, %v3131_v42  ;;  %v3228_v22 = vpop.f32.mrf.mxu3  ;;  %v3084_v28 = vpop.f32.mrf.mxu0  ;;  %v6377_v42 = vld [vmem:[%s11088_s1 + $0x730] sm:$0xf] }
 0x1cc   : > { %v3133_v46 = vpop.f32.mrf.mxu1  ;;  %v6378_v61 = vor.u32 %v7254_v1, %v6377_v42  ;;  %v5993_v42 = vld [vmem:[%s11088_s1 + $0x430] sm:$0xf] }
 0x1cd   : > { %v3229_v10 = vadd.f32 %v3228_v22, %v3180_v62  ;;  %v3134_v6 = vadd.f32 %v3133_v46, %v3084_v28  ;;  %v11210_v46 = vmax.f32 %v8129_v60, %v8393_v3  ;;  %v5994_v60 = vor.u32 %v7158_v30, %v5993_v42 }
 0x1ce   : > { %3279 = vmatmul.bf16.gmra.mxu0 %v7793_v49  ;;  %3328 = vmatmul.bf16.gmra.mxu1 %v7795_v50 }
 0x1cf   : > { %v8668_v2 = vmax.f32 %v11207_v54, %v3229_v10  ;;  %3377 = vmatmul.bf16.gmra.mxu2 %v11208_v47  ;;  %v5609_v54 = vld [vmem:[%s11088_s1 + $0x130] sm:$0xf]  ;;  %3510 = vmatpush.bf16.msra.mxu1 %v5994_v60 }
 0x1d0   : > { %3426 = vmatmul.bf16.gmra.mxu3 %v11209_v14  ;;  %3559 = vmatpush.bf16.msra.mxu2 %v6378_v61 }
 0x1d2   : > { %v3182_v57 = vpop.f32.mrf.mxu2 }
 0x1d3   : > { %v3183_v35 = vadd.f32 %v3182_v57, %v3134_v6  ;;  %v3231_v0 = vpop.f32.mrf.mxu3  ;;  %v3086_v7 = vpop.f32.mrf.mxu0  ;;  %v7062_v6 = vld [vmem:[%s11088_s1 + $0x15c] sm:$0xf0] }
 0x1d4   : > { %v3135_v62 = vpop.f32.mrf.mxu1  ;;  %v5610_v1 = vor.u32 %v7062_v6, %v5609_v54  ;;  %v7242_v54 = vld [vmem:[%s11088_s1 + $0x6fc] sm:$0xf0] }
 0x1d5   : > { %v3232_v22 = vadd.f32 %v3231_v0, %v3183_v35  ;;  %v3136_v28 = vadd.f32 %v3135_v62, %v3086_v7  ;;  %v11211_v7 = vmax.f32 %v8143_v19, %v8409_v55  ;;  %v6713_v19 = vld [vmem:[%s11088_s1 + $0x9d0] sm:$0xf]  ;;  %v7338_v6 = vld [vmem:[%s11088_s1 + $0x9fc] sm:$0xf0] }
 0x1d6   : > { %3461 = vmatpush.bf16.msra.mxu0 %v5610_v1  ;;  %v6714_v1 = vor.u32 %v7338_v6, %v6713_v19  ;;  %v7146_v19 = vld [vmem:[%s11088_s1 + $0x3fc] sm:$0xf0] }
 0x1d7   : > { %v8688_v10 = vmax.f32 %v11210_v46, %v3232_v22  ;;  %v11212_v22 = vld [vmem:[#allocation8_spill] sm:$0xff]  ;;  %v11213_v46 = vld [vmem:[#allocation9_spill] sm:$0xff] }
 0x1d8   : > { %3609 = vmatpush.bf16.msra.mxu3 %v6714_v1 }
 0x1da   : > { %v3184_v3 = vpop.f32.mrf.mxu2 }
 0x1db   : > { %v3185_v61 = vadd.f32 %v3184_v3, %v3136_v28  ;;  %v3233_v27 = vpop.f32.mrf.mxu3  ;;  %v3089_v57 = vpop.f32.mrf.mxu0  ;;  %v6329_v28 = vld [vmem:[%s11088_s1 + $0x6d0] sm:$0xf] }
 0x1dc   : > { %v3138_v23 = vpop.f32.mrf.mxu1  ;;  %v6330_v55 = vor.u32 %v7242_v54, %v6329_v28  ;;  %v5945_v28 = vld [vmem:[%s11088_s1 + $0x3d0] sm:$0xf] }
 0x1dd   : > { %v3234_v35 = vadd.f32 %v3233_v27, %v3185_v61  ;;  %v3139_v0 = vadd.f32 %v3138_v23, %v3089_v57  ;;  %v11214_v23 = vmax.f32 %v8161_v58, %v8429_v4  ;;  %v5946_v58 = vor.u32 %v7146_v19, %v5945_v28 }
 0x1de   : > { %3284 = vmatmul.bf16.gmra.mxu0 %v7837_v12  ;;  %3333 = vmatmul.bf16.gmra.mxu1 %v7839_v13 }
 0x1df   : > { %v8706_v62 = vmax.f32 %v11211_v7, %v3234_v35  ;;  %3382 = vmatmul.bf16.gmra.mxu2 %v11212_v22  ;;  %v5561_v7 = vld [vmem:[%s11088_s1 + $0xd0] sm:$0xf]  ;;  %3511 = vmatpush.bf16.msra.mxu1 %v5946_v58 }
 0x1e0   : > { %3431 = vmatmul.bf16.gmra.mxu3 %v11213_v46  ;;  %3560 = vmatpush.bf16.msra.mxu2 %v6330_v55 }
 0x1e2   : > { %v3187_v42 = vpop.f32.mrf.mxu2 }
 0x1e3   : > { %v3188_v30 = vadd.f32 %v3187_v42, %v3139_v0  ;;  %v3236_v60 = vpop.f32.mrf.mxu3  ;;  %v3091_v3 = vpop.f32.mrf.mxu0  ;;  %v7050_v0 = vld [vmem:[%s11088_s1 + $0xfc] sm:$0xf0] }
 0x1e4   : > { %v3140_v61 = vpop.f32.mrf.mxu1  ;;  %v5562_v54 = vor.u32 %v7050_v0, %v5561_v7  ;;  %v7230_v7 = vld [vmem:[%s11088_s1 + $0x69c] sm:$0xf0] }
 0x1e5   : > { %v3237_v27 = vadd.f32 %v3236_v60, %v3188_v30  ;;  %v3141_v57 = vadd.f32 %v3140_v61, %v3091_v3  ;;  %v11215_v3 = vmax.f32 %v8175_v18, %v8445_v39  ;;  %v6665_v18 = vld [vmem:[%s11088_s1 + $0x970] sm:$0xf]  ;;  %v7326_v0 = vld [vmem:[%s11088_s1 + $0x99c] sm:$0xf0] }
 0x1e6   : > { %3462 = vmatpush.bf16.msra.mxu0 %v5562_v54  ;;  %v6666_v54 = vor.u32 %v7326_v0, %v6665_v18  ;;  %v7134_v18 = vld [vmem:[%s11088_s1 + $0x39c] sm:$0xf0] }
 0x1e7   : > { %v8726_v35 = vmax.f32 %v11214_v23, %v3237_v27  ;;  %v11216_v27 = vld [vmem:[#allocation10_spill] sm:$0xff]  ;;  %v11217_v23 = vld [vmem:[#allocation11_spill] sm:$0xff] }
 0x1e8   : > { %3610 = vmatpush.bf16.msra.mxu3 %v6666_v54 }
 0x1ea   : > { %v3189_v4 = vpop.f32.mrf.mxu2 }
 0x1eb   : > { %v3190_v55 = vadd.f32 %v3189_v4, %v3141_v57  ;;  %v3238_v6 = vpop.f32.mrf.mxu3  ;;  %v3094_v42 = vpop.f32.mrf.mxu0  ;;  %v6281_v57 = vld [vmem:[%s11088_s1 + $0x670] sm:$0xf] }
 0x1ec   : > { %v3143_v1 = vpop.f32.mrf.mxu1  ;;  %v6282_v39 = vor.u32 %v7230_v7, %v6281_v57  ;;  %v5897_v57 = vld [vmem:[%s11088_s1 + $0x370] sm:$0xf] }
 0x1ed   : > { %v3239_v30 = vadd.f32 %v3238_v6, %v3190_v55  ;;  %v3144_v60 = vadd.f32 %v3143_v1, %v3094_v42  ;;  %v11218_v1 = vmax.f32 %v8193_v59, %v8465_v52  ;;  %v5898_v59 = vor.u32 %v7134_v18, %v5897_v57 }
 0x1ee   : > { %3289 = vmatmul.bf16.gmra.mxu0 %v7881_v40  ;;  %3338 = vmatmul.bf16.gmra.mxu1 %v7883_v41 }
 0x1ef   : > { %v8744_v61 = vmax.f32 %v11215_v3, %v3239_v30  ;;  %3387 = vmatmul.bf16.gmra.mxu2 %v11216_v27  ;;  %v5513_v3 = vld [vmem:[%s11088_s1 + $0x70] sm:$0xf]  ;;  %3512 = vmatpush.bf16.msra.mxu1 %v5898_v59 }
 0x1f0   : > { %3436 = vmatmul.bf16.gmra.mxu3 %v11217_v23  ;;  %3561 = vmatpush.bf16.msra.mxu2 %v6282_v39 }
 0x1f2   : > { %v3192_v28 = vpop.f32.mrf.mxu2 }
 0x1f3   : > { %v3193_v19 = vadd.f32 %v3192_v28, %v3144_v60  ;;  %v3241_v58 = vpop.f32.mrf.mxu3  ;;  %v3096_v4 = vpop.f32.mrf.mxu0  ;;  %v7038_v60 = vld [vmem:[%s11088_s1 + $0x9c] sm:$0xf0] }
 0x1f4   : > { %v3145_v55 = vpop.f32.mrf.mxu1  ;;  %v5514_v7 = vor.u32 %v7038_v60, %v5513_v3  ;;  %v7218_v3 = vld [vmem:[%s11088_s1 + $0x63c] sm:$0xf0] }
 0x1f5   : > { %v3242_v6 = vadd.f32 %v3241_v58, %v3193_v19  ;;  %v3146_v42 = vadd.f32 %v3145_v55, %v3096_v4  ;;  %v11219_v4 = vmax.f32 %v8207_v29, %v8481_v38  ;;  %v6617_v29 = vld [vmem:[%s11088_s1 + $0x910] sm:$0xf]  ;;  %v7314_v60 = vld [vmem:[%s11088_s1 + $0x93c] sm:$0xf0] }
 0x1f6   : > { %3463 = vmatpush.bf16.msra.mxu0 %v5514_v7  ;;  %v6618_v7 = vor.u32 %v7314_v60, %v6617_v29  ;;  %v7122_v29 = vld [vmem:[%s11088_s1 + $0x33c] sm:$0xf0] }
 0x1f7   : > { %v8764_v30 = vmax.f32 %v11218_v1, %v3242_v6  ;;  %v11220_v6 = vld [vmem:[#allocation12_spill] sm:$0xff]  ;;  %v11221_v1 = vld [vmem:[#allocation13_spill] sm:$0xff] }
 0x1f8   : > { %3611 = vmatpush.bf16.msra.mxu3 %v6618_v7 }
 0x1fa   : > { %v3194_v52 = vpop.f32.mrf.mxu2 }
 0x1fb   : > { %v3195_v39 = vadd.f32 %v3194_v52, %v3146_v42  ;;  %v3243_v0 = vpop.f32.mrf.mxu3  ;;  %v3099_v28 = vpop.f32.mrf.mxu0  ;;  %v6233_v42 = vld [vmem:[%s11088_s1 + $0x610] sm:$0xf] }
 0x1fc   : > { %v3148_v54 = vpop.f32.mrf.mxu1  ;;  %v6234_v38 = vor.u32 %v7218_v3, %v6233_v42  ;;  %v5849_v42 = vld [vmem:[%s11088_s1 + $0x310] sm:$0xf] }
 0x1fd   : > { %v3244_v19 = vadd.f32 %v3243_v0, %v3195_v39  ;;  %v3149_v58 = vadd.f32 %v3148_v54, %v3099_v28  ;;  %v11222_v54 = vmax.f32 %v8225_v63, %v8501_v15  ;;  %v5850_v63 = vor.u32 %v7122_v29, %v5849_v42 }
 0x1fe   : > { %3294 = vmatmul.bf16.gmra.mxu0 %v7925_v8  ;;  %3343 = vmatmul.bf16.gmra.mxu1 %v7927_v9 }
 0x1ff   : > { %v8782_v55 = vmax.f32 %v11219_v4, %v3244_v19  ;;  %3392 = vmatmul.bf16.gmra.mxu2 %v11220_v6  ;;  %v5465_v4 = vld [vmem:[%s11088_s1 + $0x10] sm:$0xf]  ;;  %3513 = vmatpush.bf16.msra.mxu1 %v5850_v63 }
 0x200   : > { %3441 = vmatmul.bf16.gmra.mxu3 %v11221_v1  ;;  %3562 = vmatpush.bf16.msra.mxu2 %v6234_v38 }
 0x202   : > { %v3197_v57 = vpop.f32.mrf.mxu2 }
 0x203   : > { %v3198_v18 = vadd.f32 %v3197_v57, %v3149_v58  ;;  %v3246_v59 = vpop.f32.mrf.mxu3  ;;  %v3101_v52 = vpop.f32.mrf.mxu0  ;;  %v7026_v58 = vld [vmem:[%s11088_s1 + $0x3c] sm:$0xf0] }
 0x204   : > { %v3150_v39 = vpop.f32.mrf.mxu1  ;;  %v5466_v3 = vor.u32 %v7026_v58, %v5465_v4  ;;  %v6571_v4 = vld [vmem:[%s11088_s1 + $0x8e0] sm:$0xf0] }
 0x205   : > { %v3247_v0 = vadd.f32 %v3246_v59, %v3198_v18  ;;  %v3151_v28 = vadd.f32 %v3150_v39, %v3101_v52  ;;  %v11223_v52 = vmax.f32 %v8239_v34, %v8517_v37  ;;  %v7392_v34 = vld [vmem:[%s11088_s1 + $0xbb4] sm:$0xf]  ;;  %v6955_v58 = vld [vmem:[%s11088_s1 + $0xbe0] sm:$0xf0] }
 0x206   : > { %3464 = vmatpush.bf16.msra.mxu0 %v5466_v3  ;;  %v6958_v3 = vor.u32 %v7392_v34, %v6955_v58  ;;  %v6187_v34 = vld [vmem:[%s11088_s1 + $0x5e0] sm:$0xf0] }
 0x207   : > { %v8802_v19 = vmax.f32 %v11222_v54, %v3247_v0  ;;  %v11224_v0 = vld [vmem:[#allocation15_spill] sm:$0xff]  ;;  %v11225_v54 = vld [vmem:[#allocation16_spill] sm:$0xff] }
 0x208   : > { %3800 = vmatpush.bf16.msrb.mxu3 %v6958_v3 }
 0x20a   : > { %v3199_v15 = vpop.f32.mrf.mxu2 }
 0x20b   : > { %v3200_v38 = vadd.f32 %v3199_v15, %v3151_v28  ;;  %v3248_v60 = vpop.f32.mrf.mxu3  ;;  %v3104_v57 = vpop.f32.mrf.mxu0  ;;  %v7296_v28 = vld [vmem:[%s11088_s1 + $0x8b4] sm:$0xf] }
 0x20c   : > { %v3153_v7 = vpop.f32.mrf.mxu1  ;;  %v6574_v37 = vor.u32 %v7296_v28, %v6571_v4  ;;  %v7200_v28 = vld [vmem:[%s11088_s1 + $0x5b4] sm:$0xf] }
 0x20d   : > { %v3249_v18 = vadd.f32 %v3248_v60, %v3200_v38  ;;  %v3154_v59 = vadd.f32 %v3153_v7, %v3104_v57  ;;  %v11226_v7 = vmax.f32 %v8257_v5, %v8537_v43  ;;  %v6190_v5 = vor.u32 %v7200_v28, %v6187_v34 }
 0x20e   : > { %3299 = vmatmul.bf16.gmra.mxu0 %v7969_v44  ;;  %3348 = vmatmul.bf16.gmra.mxu1 %v7971_v45 }
 0x20f   : > { %v8820_v39 = vmax.f32 %v11223_v52, %v3249_v18  ;;  %3397 = vmatmul.bf16.gmra.mxu2 %v11224_v0  ;;  %v7104_v52 = vld [vmem:[%s11088_s1 + $0x2b4] sm:$0xf]  ;;  %3702 = vmatpush.bf16.msrb.mxu1 %v6190_v5 }
 0x210   : > { %3446 = vmatmul.bf16.gmra.mxu3 %v11225_v54  ;;  %3751 = vmatpush.bf16.msrb.mxu2 %v6574_v37 }
 0x212   : > { %v3202_v42 = vpop.f32.mrf.mxu2 }
 0x213   : > { %v3203_v29 = vadd.f32 %v3202_v42, %v3154_v59  ;;  %v3251_v63 = vpop.f32.mrf.mxu3  ;;  %v3106_v15 = vpop.f32.mrf.mxu0  ;;  %v5803_v59 = vld [vmem:[%s11088_s1 + $0x2e0] sm:$0xf0] }
 0x214   : > { %v3155_v38 = vpop.f32.mrf.mxu1  ;;  %v5806_v4 = vor.u32 %v7104_v52, %v5803_v59  ;;  %v6523_v52 = vld [vmem:[%s11088_s1 + $0x880] sm:$0xf0] }
 0x215   : > { %v3252_v60 = vadd.f32 %v3251_v63, %v3203_v29  ;;  %v3156_v57 = vadd.f32 %v3155_v38, %v3106_v15  ;;  %v11227_v15 = vmax.f32 %v8271_v56, %v8553_v36  ;;  %v7380_v56 = vld [vmem:[%s11088_s1 + $0xb54] sm:$0xf]  ;;  %v6907_v59 = vld [vmem:[%s11088_s1 + $0xb80] sm:$0xf0] }
 0x216   : > { %3653 = vmatpush.bf16.msrb.mxu0 %v5806_v4  ;;  %v6910_v4 = vor.u32 %v7380_v56, %v6907_v59  ;;  %v6139_v56 = vld [vmem:[%s11088_s1 + $0x580] sm:$0xf0] }
 0x217   : > { %v8840_v18 = vmax.f32 %v11226_v7, %v3252_v60  ;;  %v11228_v60 = vld [vmem:[#allocation18_spill] sm:$0xff]  ;;  %v11229_v7 = vld [vmem:[#allocation19_spill] sm:$0xff] }
 0x218   : > { %3801 = vmatpush.bf16.msrb.mxu3 %v6910_v4 }
 0x21a   : > { %v3204_v43 = vpop.f32.mrf.mxu2 }
 0x21b   : > { %v3205_v37 = vadd.f32 %v3204_v43, %v3156_v57  ;;  %v3253_v58 = vpop.f32.mrf.mxu3  ;;  %v3109_v42 = vpop.f32.mrf.mxu0  ;;  %v7284_v57 = vld [vmem:[%s11088_s1 + $0x854] sm:$0xf] }
 0x21c   : > { %v3158_v3 = vpop.f32.mrf.mxu1  ;;  %v6526_v36 = vor.u32 %v7284_v57, %v6523_v52  ;;  %v7188_v57 = vld [vmem:[%s11088_s1 + $0x554] sm:$0xf] }
 0x21d   : > { %v3254_v29 = vadd.f32 %v3253_v58, %v3205_v37  ;;  %v3159_v63 = vadd.f32 %v3158_v3, %v3109_v42  ;;  %v11230_v3 = vmax.f32 %v8289_v33, %v8573_v11  ;;  %v6142_v33 = vor.u32 %v7188_v57, %v6139_v56  ;;  %v6859_v57 = vld [vmem:[%s11088_s1 + $0xb20] sm:$0xf0] }
 0x21e   : > { %3304 = vmatmul.bf16.gmra.mxu0 %v8013_v20  ;;  %3353 = vmatmul.bf16.gmra.mxu1 %v8015_v21 }
 0x21f   : > { %v8858_v38 = vmax.f32 %v11227_v15, %v3254_v29  ;;  %3402 = vmatmul.bf16.gmra.mxu2 %v11228_v60  ;;  %v7092_v15 = vld [vmem:[%s11088_s1 + $0x254] sm:$0xf]  ;;  %3703 = vmatpush.bf16.msrb.mxu1 %v6142_v33 }
 0x220   : > { %3451 = vmatmul.bf16.gmra.mxu3 %v11229_v7  ;;  %3752 = vmatpush.bf16.msrb.mxu2 %v6526_v36 }
 0x222   : > { %v3207_v28 = vpop.f32.mrf.mxu2 }
 0x223   : > { %v3208_v34 = vadd.f32 %v3207_v28, %v3159_v63  ;;  %v3256_v5 = vpop.f32.mrf.mxu3  ;;  %v3111_v43 = vpop.f32.mrf.mxu0  ;;  %v5755_v63 = vld [vmem:[%s11088_s1 + $0x280] sm:$0xf0] }
 0x224   : > { %v3160_v37 = vpop.f32.mrf.mxu1  ;;  %v5758_v52 = vor.u32 %v7092_v15, %v5755_v63  ;;  %v11234_v15 = vld [vmem:[#allocation4_spill] sm:$0xff]  ;;  %v6475_v63 = vld [vmem:[%s11088_s1 + $0x820] sm:$0xf0] }
 0x225   : > { %v3257_v58 = vadd.f32 %v3256_v5, %v3208_v34  ;;  %v3161_v42 = vadd.f32 %v3160_v37, %v3111_v43  ;;  %v11231_v43 = vmax.f32 %v8303_v16, %v8589_v32  ;;  %v7368_v16 = vld [vmem:[%s11088_s1 + $0xaf4] sm:$0xf] }
 0x226   : > { %3654 = vmatpush.bf16.msrb.mxu0 %v5758_v52  ;;  %v6862_v56 = vor.u32 %v7368_v16, %v6859_v57  ;;  %v6091_v16 = vld [vmem:[%s11088_s1 + $0x520] sm:$0xf0] }
 0x227   : > { %v8878_v29 = vmax.f32 %v11230_v3, %v3257_v58  ;;  %v11232_v58 = vld [vmem:[#allocation2_spill] sm:$0xff]  ;;  %v11233_v3 = vld [vmem:[#allocation3_spill] sm:$0xff] }
 0x228   : > { %3802 = vmatpush.bf16.msrb.mxu3 %v6862_v56 }
 0x22a   : > { %v3209_v11 = vpop.f32.mrf.mxu2 }
 0x22b   : > { %v3210_v36 = vadd.f32 %v3209_v11, %v3161_v42  ;;  %v3258_v59 = vpop.f32.mrf.mxu3  ;;  %v3270_v28 = vpop.f32.mrf.mxu0  ;;  %v7272_v42 = vld [vmem:[%s11088_s1 + $0x7f4] sm:$0xf] }
 0x22c   : > { %v3319_v4 = vpop.f32.mrf.mxu1  ;;  %v6478_v32 = vor.u32 %v7272_v42, %v6475_v63  ;;  %v5707_v42 = vld [vmem:[%s11088_s1 + $0x220] sm:$0xf0] }
 0x22d   : > { %v3259_v34 = vadd.f32 %v3258_v59, %v3210_v36  ;;  %v3320_v5 = vadd.f32 %v3319_v4, %v3270_v28 }
 0x22e   : > { %3465 = vmatmul.bf16.vlgmr.msra.gmra.mxu0 %v7682_v48  ;;  %3514 = vmatmul.bf16.vlgmr.msra.gmra.mxu1 %v11232_v58 }
 0x22f   : > { %v8896_v37 = vmax.f32 %v11231_v43, %v3259_v34  ;;  %3563 = vmatmul.bf16.vlgmr.msra.gmra.mxu2 %v11233_v3  ;;  %v7080_v43 = vld [vmem:[%s11088_s1 + $0x1f4] sm:$0xf] }
 0x230   : > { %3612 = vmatmul.bf16.vlgmr.msra.gmra.mxu3 %v11234_v15  ;;  %3753 = vmatpush.bf16.msrb.mxu2 %v6478_v32  ;;  %v5710_v63 = vor.u32 %v7080_v43, %v5707_v42  ;;  %v6427_v42 = vld [vmem:[%s11088_s1 + $0x7c0] sm:$0xf0] }
 0x232   : > { %v3368_v52 = vpop.f32.mrf.mxu2  ;;  %3655 = vmatpush.bf16.msrb.mxu0 %v5710_v63 }
 0x233   : > { %v3369_v33 = vadd.f32 %v3368_v52, %v3320_v5  ;;  %v3417_v11 = vpop.f32.mrf.mxu3  ;;  %v3272_v36 = vpop.f32.mrf.mxu0  ;;  %v7176_v5 = vld [vmem:[%s11088_s1 + $0x4f4] sm:$0xf] }
 0x234   : > { %v3321_v59 = vpop.f32.mrf.mxu1  ;;  %v6094_v32 = vor.u32 %v7176_v5, %v6091_v16  ;;  %v7356_v5 = vld [vmem:[%s11088_s1 + $0xa94] sm:$0xf]  ;;  %v6811_v16 = vld [vmem:[%s11088_s1 + $0xac0] sm:$0xf0] }
 0x235   : > { %v8913_v28 = vadd.f32 %v3417_v11, %v3369_v33  ;;  %v3322_v4 = vadd.f32 %v3321_v59, %v3272_v36 }
 0x236   : > { %3704 = vmatpush.bf16.msrb.mxu1 %v6094_v32 }
 0x23a   : > { %v3370_v57 = vpop.f32.mrf.mxu2 }
 0x23b   : > { %v3371_v52 = vadd.f32 %v3370_v57, %v3322_v4  ;;  %v3419_v56 = vpop.f32.mrf.mxu3  ;;  %v3275_v33 = vpop.f32.mrf.mxu0  ;;  %v7260_v4 = vld [vmem:[%s11088_s1 + $0x794] sm:$0xf]  ;;  %v6814_v57 = vor.u32 %v7356_v5, %v6811_v16 }
 0x23c   : > { %v3324_v11 = vpop.f32.mrf.mxu1  ;;  %v6430_v63 = vor.u32 %v7260_v4, %v6427_v42  ;;  %v7068_v4 = vld [vmem:[%s11088_s1 + $0x194] sm:$0xf]  ;;  %v5659_v42 = vld [vmem:[%s11088_s1 + $0x1c0] sm:$0xf0] }
 0x23d   : > { %v8929_v36 = vadd.f32 %v3419_v56, %v3371_v52  ;;  %v3325_v59 = vadd.f32 %v3324_v11, %v3275_v33  ;;  %3803 = vmatpush.bf16.msrb.mxu3 %v6814_v57  ;;  %v5662_v5 = vor.u32 %v7068_v4, %v5659_v42  ;;  %v6379_v42 = vld [vmem:[%s11088_s1 + $0x760] sm:$0xf0] }
 0x23e   : > { %3470 = vmatmul.bf16.gmra.mxu0 %v7749_v24  ;;  %3519 = vmatmul.bf16.gmra.mxu1 %v7751_v25 }
 0x23f   : > { %3568 = vmatmul.bf16.gmra.mxu2 %v7753_v26  ;;  %3656 = vmatpush.bf16.msrb.mxu0 %v5662_v5 }
 0x240   : > { %3617 = vmatmul.bf16.gmra.mxu3 %v11205_v31  ;;  %3754 = vmatpush.bf16.msrb.mxu2 %v6430_v63  ;;  %v6043_v63 = vld [vmem:[%s11088_s1 + $0x4c0] sm:$0xf0] }
 0x242   : > { %v3373_v32 = vpop.f32.mrf.mxu2 }
 0x243   : > { %v3374_v52 = vadd.f32 %v3373_v32, %v3325_v59  ;;  %v3422_v56 = vpop.f32.mrf.mxu3  ;;  %v3277_v33 = vpop.f32.mrf.mxu0  ;;  %v7164_v59 = vld [vmem:[%s11088_s1 + $0x494] sm:$0xf] }
 0x244   : > { %v3326_v11 = vpop.f32.mrf.mxu1  ;;  %v6046_v16 = vor.u32 %v7164_v59, %v6043_v63  ;;  %v7344_v59 = vld [vmem:[%s11088_s1 + $0xa34] sm:$0xf]  ;;  %v6763_v63 = vld [vmem:[%s11088_s1 + $0xa60] sm:$0xf0] }
 0x245   : > { %v8949_v43 = vadd.f32 %v3422_v56, %v3374_v52  ;;  %v3327_v34 = vadd.f32 %v3326_v11, %v3277_v33 }
 0x246   : > { %3705 = vmatpush.bf16.msrb.mxu1 %v6046_v16 }
 0x24a   : > { %v3375_v32 = vpop.f32.mrf.mxu2 }
 0x24b   : > { %v3376_v57 = vadd.f32 %v3375_v32, %v3327_v34  ;;  %v3424_v52 = vpop.f32.mrf.mxu3  ;;  %v3280_v56 = vpop.f32.mrf.mxu0  ;;  %v7248_v34 = vld [vmem:[%s11088_s1 + $0x734] sm:$0xf]  ;;  %v6766_v32 = vor.u32 %v7344_v59, %v6763_v63 }
 0x24c   : > { %v3329_v33 = vpop.f32.mrf.mxu1  ;;  %v6382_v5 = vor.u32 %v7248_v34, %v6379_v42  ;;  %v7056_v34 = vld [vmem:[%s11088_s1 + $0x134] sm:$0xf]  ;;  %v5611_v42 = vld [vmem:[%s11088_s1 + $0x160] sm:$0xf0] }
 0x24d   : > { %v8965_v11 = vadd.f32 %v3424_v52, %v3376_v57  ;;  %v3330_v31 = vadd.f32 %v3329_v33, %v3280_v56  ;;  %3804 = vmatpush.bf16.msrb.mxu3 %v6766_v32  ;;  %v5614_v59 = vor.u32 %v7056_v34, %v5611_v42  ;;  %v6331_v42 = vld [vmem:[%s11088_s1 + $0x700] sm:$0xf0] }
 0x24e   : > { %3475 = vmatmul.bf16.gmra.mxu0 %v7793_v49  ;;  %3524 = vmatmul.bf16.gmra.mxu1 %v7795_v50 }
 0x24f   : > { %3573 = vmatmul.bf16.gmra.mxu2 %v11208_v47  ;;  %3657 = vmatpush.bf16.msrb.mxu0 %v5614_v59 }
 0x250   : > { %3622 = vmatmul.bf16.gmra.mxu3 %v11209_v14  ;;  %3755 = vmatpush.bf16.msrb.mxu2 %v6382_v5  ;;  %v5995_v5 = vld [vmem:[%s11088_s1 + $0x460] sm:$0xf0] }
 0x252   : > { %v3378_v16 = vpop.f32.mrf.mxu2 }
 0x253   : > { %v3379_v57 = vadd.f32 %v3378_v16, %v3330_v31  ;;  %v3427_v52 = vpop.f32.mrf.mxu3  ;;  %v3282_v56 = vpop.f32.mrf.mxu0  ;;  %v7152_v31 = vld [vmem:[%s11088_s1 + $0x434] sm:$0xf] }
 0x254   : > { %v3331_v33 = vpop.f32.mrf.mxu1  ;;  %v5998_v63 = vor.u32 %v7152_v31, %v5995_v5  ;;  %v7332_v31 = vld [vmem:[%s11088_s1 + $0x9d4] sm:$0xf]  ;;  %v6715_v5 = vld [vmem:[%s11088_s1 + $0xa00] sm:$0xf0] }
 0x255   : > { %v8985_v4 = vadd.f32 %v3427_v52, %v3379_v57  ;;  %v3332_v14 = vadd.f32 %v3331_v33, %v3282_v56 }
 0x256   : > { %3706 = vmatpush.bf16.msrb.mxu1 %v5998_v63 }
 0x25a   : > { %v3380_v16 = vpop.f32.mrf.mxu2 }
 0x25b   : > { %v3381_v32 = vadd.f32 %v3380_v16, %v3332_v14  ;;  %v3429_v57 = vpop.f32.mrf.mxu3  ;;  %v3285_v52 = vpop.f32.mrf.mxu0  ;;  %v7236_v14 = vld [vmem:[%s11088_s1 + $0x6d4] sm:$0xf]  ;;  %v6718_v16 = vor.u32 %v7332_v31, %v6715_v5 }
 0x25c   : > { %v3334_v56 = vpop.f32.mrf.mxu1  ;;  %v6334_v59 = vor.u32 %v7236_v14, %v6331_v42  ;;  %v7044_v14 = vld [vmem:[%s11088_s1 + $0xd4] sm:$0xf]  ;;  %v5563_v42 = vld [vmem:[%s11088_s1 + $0x100] sm:$0xf0] }
 0x25d   : > { %v9001_v33 = vadd.f32 %v3429_v57, %v3381_v32  ;;  %v3335_v47 = vadd.f32 %v3334_v56, %v3285_v52  ;;  %3805 = vmatpush.bf16.msrb.mxu3 %v6718_v16  ;;  %v5566_v31 = vor.u32 %v7044_v14, %v5563_v42  ;;  %v6283_v42 = vld [vmem:[%s11088_s1 + $0x6a0] sm:$0xf0] }
 0x25e   : > { %3480 = vmatmul.bf16.gmra.mxu0 %v7837_v12  ;;  %3529 = vmatmul.bf16.gmra.mxu1 %v7839_v13 }
 0x25f   : > { %3578 = vmatmul.bf16.gmra.mxu2 %v11212_v22  ;;  %3658 = vmatpush.bf16.msrb.mxu0 %v5566_v31 }
 0x260   : > { %3627 = vmatmul.bf16.gmra.mxu3 %v11213_v46  ;;  %3756 = vmatpush.bf16.msrb.mxu2 %v6334_v59  ;;  %v5947_v59 = vld [vmem:[%s11088_s1 + $0x400] sm:$0xf0] }
 0x262   : > { %v3383_v63 = vpop.f32.mrf.mxu2 }
 0x263   : > { %v3384_v32 = vadd.f32 %v3383_v63, %v3335_v47  ;;  %v3432_v57 = vpop.f32.mrf.mxu3  ;;  %v3287_v52 = vpop.f32.mrf.mxu0  ;;  %v7140_v47 = vld [vmem:[%s11088_s1 + $0x3d4] sm:$0xf] }
 0x264   : > { %v3336_v56 = vpop.f32.mrf.mxu1  ;;  %v5950_v5 = vor.u32 %v7140_v47, %v5947_v59  ;;  %v7320_v47 = vld [vmem:[%s11088_s1 + $0x974] sm:$0xf]  ;;  %v6667_v59 = vld [vmem:[%s11088_s1 + $0x9a0] sm:$0xf0] }
 0x265   : > { %v9021_v34 = vadd.f32 %v3432_v57, %v3384_v32  ;;  %v3337_v46 = vadd.f32 %v3336_v56, %v3287_v52 }
 0x266   : > { %3707 = vmatpush.bf16.msrb.mxu1 %v5950_v5 }
 0x26a   : > { %v3385_v63 = vpop.f32.mrf.mxu2 }
 0x26b   : > { %v3386_v16 = vadd.f32 %v3385_v63, %v3337_v46  ;;  %v3434_v32 = vpop.f32.mrf.mxu3  ;;  %v3290_v57 = vpop.f32.mrf.mxu0  ;;  %v7224_v46 = vld [vmem:[%s11088_s1 + $0x674] sm:$0xf]  ;;  %v6670_v63 = vor.u32 %v7320_v47, %v6667_v59 }
 0x26c   : > { %v3339_v52 = vpop.f32.mrf.mxu1  ;;  %v6286_v31 = vor.u32 %v7224_v46, %v6283_v42  ;;  %v7032_v46 = vld [vmem:[%s11088_s1 + $0x74] sm:$0xf]  ;;  %v5515_v42 = vld [vmem:[%s11088_s1 + $0xa0] sm:$0xf0] }
 0x26d   : > { %v9037_v56 = vadd.f32 %v3434_v32, %v3386_v16  ;;  %v3340_v22 = vadd.f32 %v3339_v52, %v3290_v57  ;;  %3806 = vmatpush.bf16.msrb.mxu3 %v6670_v63  ;;  %v5518_v47 = vor.u32 %v7032_v46, %v5515_v42  ;;  %v6235_v42 = vld [vmem:[%s11088_s1 + $0x640] sm:$0xf0] }
 0x26e   : > { %3485 = vmatmul.bf16.gmra.mxu0 %v7881_v40  ;;  %3534 = vmatmul.bf16.gmra.mxu1 %v7883_v41 }
 0x26f   : > { %3583 = vmatmul.bf16.gmra.mxu2 %v11216_v27  ;;  %3659 = vmatpush.bf16.msrb.mxu0 %v5518_v47 }
 0x270   : > { %3632 = vmatmul.bf16.gmra.mxu3 %v11217_v23  ;;  %3757 = vmatpush.bf16.msrb.mxu2 %v6286_v31  ;;  %v5899_v31 = vld [vmem:[%s11088_s1 + $0x3a0] sm:$0xf0] }
 0x272   : > { %v3388_v5 = vpop.f32.mrf.mxu2 }
 0x273   : > { %v3389_v16 = vadd.f32 %v3388_v5, %v3340_v22  ;;  %v3437_v32 = vpop.f32.mrf.mxu3  ;;  %v3292_v57 = vpop.f32.mrf.mxu0  ;;  %v7128_v22 = vld [vmem:[%s11088_s1 + $0x374] sm:$0xf] }
 0x274   : > { %v3341_v52 = vpop.f32.mrf.mxu1  ;;  %v5902_v59 = vor.u32 %v7128_v22, %v5899_v31  ;;  %v7308_v22 = vld [vmem:[%s11088_s1 + $0x914] sm:$0xf]  ;;  %v6619_v31 = vld [vmem:[%s11088_s1 + $0x940] sm:$0xf0] }
 0x275   : > { %v9057_v14 = vadd.f32 %v3437_v32, %v3389_v16  ;;  %v3342_v23 = vadd.f32 %v3341_v52, %v3292_v57 }
 0x276   : > { %3708 = vmatpush.bf16.msrb.mxu1 %v5902_v59 }
 0x27a   : > { %v3390_v5 = vpop.f32.mrf.mxu2 }
 0x27b   : > { %v3391_v63 = vadd.f32 %v3390_v5, %v3342_v23  ;;  %v3439_v16 = vpop.f32.mrf.mxu3  ;;  %v3295_v32 = vpop.f32.mrf.mxu0  ;;  %v7212_v23 = vld [vmem:[%s11088_s1 + $0x614] sm:$0xf]  ;;  %v6622_v5 = vor.u32 %v7308_v22, %v6619_v31 }
 0x27c   : > { %v3344_v57 = vpop.f32.mrf.mxu1  ;;  %v6238_v47 = vor.u32 %v7212_v23, %v6235_v42  ;;  %v7020_v23 = vld [vmem:[%s11088_s1 + $0x14] sm:$0xf]  ;;  %v5467_v42 = vld [vmem:[%s11088_s1 + $0x40] sm:$0xf0] }
 0x27d   : > { %v9073_v52 = vadd.f32 %v3439_v16, %v3391_v63  ;;  %v3345_v27 = vadd.f32 %v3344_v57, %v3295_v32  ;;  %3807 = vmatpush.bf16.msrb.mxu3 %v6622_v5  ;;  %v5470_v22 = vor.u32 %v7020_v23, %v5467_v42  ;;  %v7303_v42 = vld [vmem:[%s11088_s1 + $0x8e4] sm:$0xf0] }
 0x27e   : > { %3490 = vmatmul.bf16.gmra.mxu0 %v7925_v8  ;;  %3539 = vmatmul.bf16.gmra.mxu1 %v7927_v9 }
 0x27f   : > { %3588 = vmatmul.bf16.gmra.mxu2 %v11220_v6  ;;  %3660 = vmatpush.bf16.msrb.mxu0 %v5470_v22 }
 0x280   : > { %3637 = vmatmul.bf16.gmra.mxu3 %v11221_v1  ;;  %3758 = vmatpush.bf16.msrb.mxu2 %v6238_v47  ;;  %v5851_v47 = vld [vmem:[%s11088_s1 + $0x340] sm:$0xf0] }
 0x282   : > { %v3393_v59 = vpop.f32.mrf.mxu2 }
 0x283   : > { %v3394_v63 = vadd.f32 %v3393_v59, %v3345_v27  ;;  %v3442_v16 = vpop.f32.mrf.mxu3  ;;  %v3297_v32 = vpop.f32.mrf.mxu0  ;;  %v7116_v27 = vld [vmem:[%s11088_s1 + $0x314] sm:$0xf] }
 0x284   : > { %v3346_v57 = vpop.f32.mrf.mxu1  ;;  %v5854_v31 = vor.u32 %v7116_v27, %v5851_v47  ;;  %v6961_v27 = vld [vmem:[%s11088_s1 + $0xbb8] sm:$0xf]  ;;  %v7399_v47 = vld [vmem:[%s11088_s1 + $0xbe4] sm:$0xf0] }
 0x285   : > { %v9093_v46 = vadd.f32 %v3442_v16, %v3394_v63  ;;  %v3347_v1 = vadd.f32 %v3346_v57, %v3297_v32 }
 0x286   : > { %3709 = vmatpush.bf16.msrb.mxu1 %v5854_v31 }
 0x28a   : > { %v3395_v59 = vpop.f32.mrf.mxu2 }
 0x28b   : > { %v3396_v5 = vadd.f32 %v3395_v59, %v3347_v1  ;;  %v3444_v63 = vpop.f32.mrf.mxu3  ;;  %v3300_v16 = vpop.f32.mrf.mxu0  ;;  %v6577_v1 = vld [vmem:[%s11088_s1 + $0x8b8] sm:$0xf]  ;;  %v6962_v59 = vor.u32 %v7399_v47, %v6961_v27 }
 0x28c   : > { %v3349_v32 = vpop.f32.mrf.mxu1  ;;  %v6578_v22 = vor.u32 %v7303_v42, %v6577_v1  ;;  %v5809_v1 = vld [vmem:[%s11088_s1 + $0x2b8] sm:$0xf]  ;;  %v7111_v42 = vld [vmem:[%s11088_s1 + $0x2e4] sm:$0xf0] }
 0x28d   : > { %v9109_v57 = vadd.f32 %v3444_v63, %v3396_v5  ;;  %v3350_v6 = vadd.f32 %v3349_v32, %v3300_v16  ;;  %3996 = vmatpush.bf16.msra.mxu3 %v6962_v59  ;;  %v5810_v27 = vor.u32 %v7111_v42, %v5809_v1  ;;  %v7291_v42 = vld [vmem:[%s11088_s1 + $0x884] sm:$0xf0] }
 0x28e   : > { %3495 = vmatmul.bf16.gmra.mxu0 %v7969_v44  ;;  %3544 = vmatmul.bf16.gmra.mxu1 %v7971_v45 }
 0x28f   : > { %3593 = vmatmul.bf16.gmra.mxu2 %v11224_v0  ;;  %3849 = vmatpush.bf16.msra.mxu0 %v5810_v27 }
 0x290   : > { %3642 = vmatmul.bf16.gmra.mxu3 %v11225_v54  ;;  %3947 = vmatpush.bf16.msra.mxu2 %v6578_v22  ;;  %v7207_v22 = vld [vmem:[%s11088_s1 + $0x5e4] sm:$0xf0] }
 0x292   : > { %v3398_v31 = vpop.f32.mrf.mxu2 }
 0x293   : > { %v3399_v5 = vadd.f32 %v3398_v31, %v3350_v6  ;;  %v3447_v63 = vpop.f32.mrf.mxu3  ;;  %v3302_v16 = vpop.f32.mrf.mxu0  ;;  %v6193_v6 = vld [vmem:[%s11088_s1 + $0x5b8] sm:$0xf] }
 0x294   : > { %v3351_v32 = vpop.f32.mrf.mxu1  ;;  %v6194_v47 = vor.u32 %v7207_v22, %v6193_v6  ;;  %v6913_v6 = vld [vmem:[%s11088_s1 + $0xb58] sm:$0xf]  ;;  %v7387_v22 = vld [vmem:[%s11088_s1 + $0xb84] sm:$0xf0] }
 0x295   : > { %v9129_v23 = vadd.f32 %v3447_v63, %v3399_v5  ;;  %v3352_v54 = vadd.f32 %v3351_v32, %v3302_v16 }
 0x296   : > { %3898 = vmatpush.bf16.msra.mxu1 %v6194_v47 }
 0x29a   : > { %v3400_v31 = vpop.f32.mrf.mxu2 }
 0x29b   : > { %v3401_v59 = vadd.f32 %v3400_v31, %v3352_v54  ;;  %v3449_v5 = vpop.f32.mrf.mxu3  ;;  %v3305_v63 = vpop.f32.mrf.mxu0  ;;  %v6529_v54 = vld [vmem:[%s11088_s1 + $0x858] sm:$0xf]  ;;  %v6914_v31 = vor.u32 %v7387_v22, %v6913_v6 }
 0x29c   : > { %v3354_v16 = vpop.f32.mrf.mxu1  ;;  %v6530_v27 = vor.u32 %v7291_v42, %v6529_v54  ;;  %v5761_v54 = vld [vmem:[%s11088_s1 + $0x258] sm:$0xf]  ;;  %v7099_v42 = vld [vmem:[%s11088_s1 + $0x284] sm:$0xf0] }
 0x29d   : > { %v9145_v32 = vadd.f32 %v3449_v5, %v3401_v59  ;;  %v3355_v0 = vadd.f32 %v3354_v16, %v3305_v63  ;;  %3997 = vmatpush.bf16.msra.mxu3 %v6914_v31  ;;  %v5762_v6 = vor.u32 %v7099_v42, %v5761_v54  ;;  %v7279_v42 = vld [vmem:[%s11088_s1 + $0x824] sm:$0xf0] }
 0x29e   : > { %3500 = vmatmul.bf16.gmra.mxu0 %v8013_v20  ;;  %3549 = vmatmul.bf16.gmra.mxu1 %v8015_v21 }
 0x29f   : > { %3598 = vmatmul.bf16.gmra.mxu2 %v11228_v60  ;;  %3850 = vmatpush.bf16.msra.mxu0 %v5762_v6 }
 0x2a0   : > { %3647 = vmatmul.bf16.gmra.mxu3 %v11229_v7  ;;  %3948 = vmatpush.bf16.msra.mxu2 %v6530_v27  ;;  %v7195_v27 = vld [vmem:[%s11088_s1 + $0x584] sm:$0xf0] }
 0x2a2   : > { %v3403_v47 = vpop.f32.mrf.mxu2 }
 0x2a3   : > { %v3404_v59 = vadd.f32 %v3403_v47, %v3355_v0  ;;  %v3452_v5 = vpop.f32.mrf.mxu3  ;;  %v3307_v63 = vpop.f32.mrf.mxu0  ;;  %v6145_v0 = vld [vmem:[%s11088_s1 + $0x558] sm:$0xf] }
 0x2a4   : > { %v3356_v16 = vpop.f32.mrf.mxu1  ;;  %v6146_v22 = vor.u32 %v7195_v27, %v6145_v0  ;;  %v6865_v0 = vld [vmem:[%s11088_s1 + $0xaf8] sm:$0xf]  ;;  %v7375_v27 = vld [vmem:[%s11088_s1 + $0xb24] sm:$0xf0] }
 0x2a5   : > { %v9165_v1 = vadd.f32 %v3452_v5, %v3404_v59  ;;  %v3357_v7 = vadd.f32 %v3356_v16, %v3307_v63 }
 0x2a6   : > { %3899 = vmatpush.bf16.msra.mxu1 %v6146_v22 }
 0x2aa   : > { %v3405_v47 = vpop.f32.mrf.mxu2 }
 0x2ab   : > { %v3406_v31 = vadd.f32 %v3405_v47, %v3357_v7  ;;  %v3454_v59 = vpop.f32.mrf.mxu3  ;;  %v3466_v5 = vpop.f32.mrf.mxu0  ;;  %v6481_v7 = vld [vmem:[%s11088_s1 + $0x7f8] sm:$0xf]  ;;  %v6866_v47 = vor.u32 %v7375_v27, %v6865_v0 }
 0x2ac   : > { %v3515_v63 = vpop.f32.mrf.mxu1  ;;  %v6482_v6 = vor.u32 %v7279_v42, %v6481_v7  ;;  %v5713_v7 = vld [vmem:[%s11088_s1 + $0x1f8] sm:$0xf] }
 0x2ad   : > { %v9181_v16 = vadd.f32 %v3454_v59, %v3406_v31  ;;  %v3516_v60 = vadd.f32 %v3515_v63, %v3466_v5  ;;  %3998 = vmatpush.bf16.msra.mxu3 %v6866_v47  ;;  %v6097_v42 = vld [vmem:[%s11088_s1 + $0x4f8] sm:$0xf] }
 0x2ae   : > { %3661 = vmatmul.bf16.vlgmr.msrb.gmra.mxu0 %v7682_v48  ;;  %3710 = vmatmul.bf16.vlgmr.msrb.gmra.mxu1 %v11232_v58 }
 0x2af   : > { %3759 = vmatmul.bf16.vlgmr.msrb.gmra.mxu2 %v11233_v3  ;;  %v11235_v3 = vmax.f32 %v8612_v53, %v8913_v28 }
 0x2b0   : > { %3808 = vmatmul.bf16.vlgmr.msrb.gmra.mxu3 %v11234_v15  ;;  %3949 = vmatpush.bf16.msra.mxu2 %v6482_v6  ;;  %v7183_v6 = vld [vmem:[%s11088_s1 + $0x524] sm:$0xf0] }
 0x2b1   : > { %v6098_v53 = vor.u32 %v7183_v6, %v6097_v42 }
 0x2b2   : > { %v3564_v22 = vpop.f32.mrf.mxu2 }
 0x2b3   : > { %v3565_v31 = vadd.f32 %v3564_v22, %v3516_v60  ;;  %v3613_v59 = vpop.f32.mrf.mxu3  ;;  %v3468_v5 = vpop.f32.mrf.mxu0  ;;  %v7087_v60 = vld [vmem:[%s11088_s1 + $0x224] sm:$0xf0]  ;;  %3900 = vmatpush.bf16.msra.mxu1 %v6098_v53 }
 0x2b4   : > { %v3517_v63 = vpop.f32.mrf.mxu1  ;;  %v5714_v0 = vor.u32 %v7087_v60, %v5713_v7  ;;  %v7267_v7 = vld [vmem:[%s11088_s1 + $0x7c4] sm:$0xf0] }
 0x2b5   : > { %v3614_v54 = vadd.f32 %v3613_v59, %v3565_v31  ;;  %v3518_v15 = vadd.f32 %v3517_v63, %v3468_v5  ;;  %v11236_v59 = vmax.f32 %v8630_v17, %v8929_v36  ;;  %v11237_v63 = vld [vmem:[#allocation5_spill] sm:$0xff]  ;;  %v7363_v60 = vld [vmem:[%s11088_s1 + $0xac4] sm:$0xf0] }
 0x2b6   : > { %3851 = vmatpush.bf16.msra.mxu0 %v5714_v0  ;;  %v6817_v17 = vld [vmem:[%s11088_s1 + $0xa98] sm:$0xf] }
 0x2b7   : > { %v9204_v58 = vmax.f32 %v11235_v3, %v3614_v54  ;;  %v6818_v0 = vor.u32 %v7363_v60, %v6817_v17  ;;  %v7171_v17 = vld [vmem:[%s11088_s1 + $0x4c4] sm:$0xf0] }
 0x2b9   : > { %3999 = vmatpush.bf16.msra.mxu3 %v6818_v0 }
 0x2ba   : > { %v3566_v3 = vpop.f32.mrf.mxu2 }
 0x2bb   : > { %v3567_v28 = vadd.f32 %v3566_v3, %v3518_v15  ;;  %v3615_v54 = vpop.f32.mrf.mxu3  ;;  %v3471_v27 = vpop.f32.mrf.mxu0  ;;  %v6433_v15 = vld [vmem:[%s11088_s1 + $0x798] sm:$0xf] }
 0x2bc   : > { %v3520_v22 = vpop.f32.mrf.mxu1  ;;  %v6434_v36 = vor.u32 %v7267_v7, %v6433_v15  ;;  %v6049_v15 = vld [vmem:[%s11088_s1 + $0x498] sm:$0xf] }
 0x2bd   : > { %v3616_v47 = vadd.f32 %v3615_v54, %v3567_v28  ;;  %v3521_v31 = vadd.f32 %v3520_v22, %v3471_v27  ;;  %v11238_v22 = vmax.f32 %v8650_v51, %v8949_v43  ;;  %v6050_v51 = vor.u32 %v7171_v17, %v6049_v15 }
 0x2be   : > { %3666 = vmatmul.bf16.gmra.mxu0 %v7749_v24  ;;  %3715 = vmatmul.bf16.gmra.mxu1 %v7751_v25 }
 0x2bf   : > { %v9222_v5 = vmax.f32 %v11236_v59, %v3616_v47  ;;  %3764 = vmatmul.bf16.gmra.mxu2 %v7753_v26  ;;  %v5665_v59 = vld [vmem:[%s11088_s1 + $0x198] sm:$0xf]  ;;  %3901 = vmatpush.bf16.msra.mxu1 %v6050_v51 }
 0x2c0   : > { %3813 = vmatmul.bf16.gmra.mxu3 %v11237_v63  ;;  %3950 = vmatpush.bf16.msra.mxu2 %v6434_v36 }
 0x2c2   : > { %v3569_v42 = vpop.f32.mrf.mxu2 }
 0x2c3   : > { %v3570_v6 = vadd.f32 %v3569_v42, %v3521_v31  ;;  %v3618_v53 = vpop.f32.mrf.mxu3  ;;  %v3473_v3 = vpop.f32.mrf.mxu0  ;;  %v7075_v31 = vld [vmem:[%s11088_s1 + $0x1c4] sm:$0xf0] }
 0x2c4   : > { %v3522_v28 = vpop.f32.mrf.mxu1  ;;  %v5666_v7 = vor.u32 %v7075_v31, %v5665_v59  ;;  %v7255_v59 = vld [vmem:[%s11088_s1 + $0x764] sm:$0xf0] }
 0x2c5   : > { %v3619_v54 = vadd.f32 %v3618_v53, %v3570_v6  ;;  %v3523_v27 = vadd.f32 %v3522_v28, %v3473_v3  ;;  %v11239_v3 = vmax.f32 %v8668_v2, %v8965_v11  ;;  %v6769_v2 = vld [vmem:[%s11088_s1 + $0xa38] sm:$0xf]  ;;  %v7351_v31 = vld [vmem:[%s11088_s1 + $0xa64] sm:$0xf0] }
 0x2c6   : > { %3852 = vmatpush.bf16.msra.mxu0 %v5666_v7  ;;  %v6770_v7 = vor.u32 %v7351_v31, %v6769_v2  ;;  %v7159_v2 = vld [vmem:[%s11088_s1 + $0x464] sm:$0xf0] }
 0x2c7   : > { %v9242_v47 = vmax.f32 %v11238_v22, %v3619_v54  ;;  %v11240_v54 = vld [vmem:[#allocation6_spill] sm:$0xff]  ;;  %v11241_v22 = vld [vmem:[#allocation7_spill] sm:$0xff] }
 0x2c8   : > { %4000 = vmatpush.bf16.msra.mxu3 %v6770_v7 }
 0x2ca   : > { %v3571_v43 = vpop.f32.mrf.mxu2 }
 0x2cb   : > { %v3572_v36 = vadd.f32 %v3571_v43, %v3523_v27  ;;  %v3620_v60 = vpop.f32.mrf.mxu3  ;;  %v3476_v42 = vpop.f32.mrf.mxu0  ;;  %v6385_v27 = vld [vmem:[%s11088_s1 + $0x738] sm:$0xf] }
 0x2cc   : > { %v3525_v0 = vpop.f32.mrf.mxu1  ;;  %v6386_v11 = vor.u32 %v7255_v59, %v6385_v27  ;;  %v6001_v27 = vld [vmem:[%s11088_s1 + $0x438] sm:$0xf] }
 0x2cd   : > { %v3621_v6 = vadd.f32 %v3620_v60, %v3572_v36  ;;  %v3526_v53 = vadd.f32 %v3525_v0, %v3476_v42  ;;  %v11242_v0 = vmax.f32 %v8688_v10, %v8985_v4  ;;  %v6002_v10 = vor.u32 %v7159_v2, %v6001_v27 }
 0x2ce   : > { %3671 = vmatmul.bf16.gmra.mxu0 %v7793_v49  ;;  %3720 = vmatmul.bf16.gmra.mxu1 %v7795_v50 }
 0x2cf   : > { %v9260_v28 = vmax.f32 %v11239_v3, %v3621_v6  ;;  %3769 = vmatmul.bf16.gmra.mxu2 %v11240_v54  ;;  %v5617_v3 = vld [vmem:[%s11088_s1 + $0x138] sm:$0xf]  ;;  %3902 = vmatpush.bf16.msra.mxu1 %v6002_v10 }
 0x2d0   : > { %3818 = vmatmul.bf16.gmra.mxu3 %v11241_v22  ;;  %3951 = vmatpush.bf16.msra.mxu2 %v6386_v11 }
 0x2d2   : > { %v3574_v15 = vpop.f32.mrf.mxu2 }
 0x2d3   : > { %v3575_v17 = vadd.f32 %v3574_v15, %v3526_v53  ;;  %v3623_v51 = vpop.f32.mrf.mxu3  ;;  %v3478_v43 = vpop.f32.mrf.mxu0  ;;  %v7063_v53 = vld [vmem:[%s11088_s1 + $0x164] sm:$0xf0] }
 0x2d4   : > { %v3527_v36 = vpop.f32.mrf.mxu1  ;;  %v5618_v59 = vor.u32 %v7063_v53, %v5617_v3  ;;  %v7243_v3 = vld [vmem:[%s11088_s1 + $0x704] sm:$0xf0] }
 0x2d5   : > { %v3624_v60 = vadd.f32 %v3623_v51, %v3575_v17  ;;  %v3528_v42 = vadd.f32 %v3527_v36, %v3478_v43  ;;  %v11243_v43 = vmax.f32 %v8706_v62, %v9001_v33  ;;  %v6721_v62 = vld [vmem:[%s11088_s1 + $0x9d8] sm:$0xf]  ;;  %v7339_v53 = vld [vmem:[%s11088_s1 + $0xa04] sm:$0xf0] }
 0x2d6   : > { %3853 = vmatpush.bf16.msra.mxu0 %v5618_v59  ;;  %v6722_v59 = vor.u32 %v7339_v53, %v6721_v62  ;;  %v7147_v62 = vld [vmem:[%s11088_s1 + $0x404] sm:$0xf0] }
 0x2d7   : > { %v9280_v6 = vmax.f32 %v11242_v0, %v3624_v60  ;;  %v11244_v60 = vld [vmem:[#allocation8_spill] sm:$0xff]  ;;  %v11245_v0 = vld [vmem:[#allocation9_spill] sm:$0xff] }
 0x2d8   : > { %4001 = vmatpush.bf16.msra.mxu3 %v6722_v59 }
 0x2da   : > { %v3576_v4 = vpop.f32.mrf.mxu2 }
 0x2db   : > { %v3577_v11 = vadd.f32 %v3576_v4, %v3528_v42  ;;  %v3625_v31 = vpop.f32.mrf.mxu3  ;;  %v3481_v15 = vpop.f32.mrf.mxu0  ;;  %v6337_v42 = vld [vmem:[%s11088_s1 + $0x6d8] sm:$0xf] }
 0x2dc   : > { %v3530_v7 = vpop.f32.mrf.mxu1  ;;  %v6338_v33 = vor.u32 %v7243_v3, %v6337_v42  ;;  %v5953_v42 = vld [vmem:[%s11088_s1 + $0x3d8] sm:$0xf] }
 0x2dd   : > { %v3626_v17 = vadd.f32 %v3625_v31, %v3577_v11  ;;  %v3531_v51 = vadd.f32 %v3530_v7, %v3481_v15  ;;  %v11246_v7 = vmax.f32 %v8726_v35, %v9021_v34  ;;  %v5954_v35 = vor.u32 %v7147_v62, %v5953_v42 }
 0x2de   : > { %3676 = vmatmul.bf16.gmra.mxu0 %v7837_v12  ;;  %3725 = vmatmul.bf16.gmra.mxu1 %v7839_v13 }
 0x2df   : > { %v9298_v36 = vmax.f32 %v11243_v43, %v3626_v17  ;;  %3774 = vmatmul.bf16.gmra.mxu2 %v11244_v60  ;;  %v5569_v43 = vld [vmem:[%s11088_s1 + $0xd8] sm:$0xf]  ;;  %3903 = vmatpush.bf16.msra.mxu1 %v5954_v35 }
 0x2e0   : > { %3823 = vmatmul.bf16.gmra.mxu3 %v11245_v0  ;;  %3952 = vmatpush.bf16.msra.mxu2 %v6338_v33 }
 0x2e2   : > { %v3579_v27 = vpop.f32.mrf.mxu2 }
 0x2e3   : > { %v3580_v2 = vadd.f32 %v3579_v27, %v3531_v51  ;;  %v3628_v10 = vpop.f32.mrf.mxu3  ;;  %v3483_v4 = vpop.f32.mrf.mxu0  ;;  %v7051_v51 = vld [vmem:[%s11088_s1 + $0x104] sm:$0xf0] }
 0x2e4   : > { %v3532_v11 = vpop.f32.mrf.mxu1  ;;  %v5570_v3 = vor.u32 %v7051_v51, %v5569_v43  ;;  %v7231_v43 = vld [vmem:[%s11088_s1 + $0x6a4] sm:$0xf0] }
 0x2e5   : > { %v3629_v31 = vadd.f32 %v3628_v10, %v3580_v2  ;;  %v3533_v15 = vadd.f32 %v3532_v11, %v3483_v4  ;;  %v11247_v4 = vmax.f32 %v8744_v61, %v9037_v56  ;;  %v6673_v61 = vld [vmem:[%s11088_s1 + $0x978] sm:$0xf]  ;;  %v7327_v51 = vld [vmem:[%s11088_s1 + $0x9a4] sm:$0xf0] }
 0x2e6   : > { %3854 = vmatpush.bf16.msra.mxu0 %v5570_v3  ;;  %v6674_v3 = vor.u32 %v7327_v51, %v6673_v61  ;;  %v7135_v61 = vld [vmem:[%s11088_s1 + $0x3a4] sm:$0xf0] }
 0x2e7   : > { %v9318_v17 = vmax.f32 %v11246_v7, %v3629_v31  ;;  %v11248_v31 = vld [vmem:[#allocation10_spill] sm:$0xff]  ;;  %v11249_v7 = vld [vmem:[#allocation11_spill] sm:$0xff] }
 0x2e8   : > { %4002 = vmatpush.bf16.msra.mxu3 %v6674_v3 }
 0x2ea   : > { %v3581_v34 = vpop.f32.mrf.mxu2 }
 0x2eb   : > { %v3582_v33 = vadd.f32 %v3581_v34, %v3533_v15  ;;  %v3630_v53 = vpop.f32.mrf.mxu3  ;;  %v3486_v27 = vpop.f32.mrf.mxu0  ;;  %v6289_v15 = vld [vmem:[%s11088_s1 + $0x678] sm:$0xf] }
 0x2ec   : > { %v3535_v59 = vpop.f32.mrf.mxu1  ;;  %v6290_v56 = vor.u32 %v7231_v43, %v6289_v15  ;;  %v5905_v15 = vld [vmem:[%s11088_s1 + $0x378] sm:$0xf] }
 0x2ed   : > { %v3631_v2 = vadd.f32 %v3630_v53, %v3582_v33  ;;  %v3536_v10 = vadd.f32 %v3535_v59, %v3486_v27  ;;  %v11250_v59 = vmax.f32 %v8764_v30, %v9057_v14  ;;  %v5906_v30 = vor.u32 %v7135_v61, %v5905_v15 }
 0x2ee   : > { %3681 = vmatmul.bf16.gmra.mxu0 %v7881_v40  ;;  %3730 = vmatmul.bf16.gmra.mxu1 %v7883_v41 }
 0x2ef   : > { %v9336_v11 = vmax.f32 %v11247_v4, %v3631_v2  ;;  %3779 = vmatmul.bf16.gmra.mxu2 %v11248_v31  ;;  %v5521_v4 = vld [vmem:[%s11088_s1 + $0x78] sm:$0xf]  ;;  %3904 = vmatpush.bf16.msra.mxu1 %v5906_v30 }
 0x2f0   : > { %3828 = vmatmul.bf16.gmra.mxu3 %v11249_v7  ;;  %3953 = vmatpush.bf16.msra.mxu2 %v6290_v56 }
 0x2f2   : > { %v3584_v42 = vpop.f32.mrf.mxu2 }
 0x2f3   : > { %v3585_v62 = vadd.f32 %v3584_v42, %v3536_v10  ;;  %v3633_v35 = vpop.f32.mrf.mxu3  ;;  %v3488_v34 = vpop.f32.mrf.mxu0  ;;  %v7039_v10 = vld [vmem:[%s11088_s1 + $0xa4] sm:$0xf0] }
 0x2f4   : > { %v3537_v33 = vpop.f32.mrf.mxu1  ;;  %v5522_v43 = vor.u32 %v7039_v10, %v5521_v4  ;;  %v7219_v4 = vld [vmem:[%s11088_s1 + $0x644] sm:$0xf0] }
 0x2f5   : > { %v3634_v53 = vadd.f32 %v3633_v35, %v3585_v62  ;;  %v3538_v27 = vadd.f32 %v3537_v33, %v3488_v34  ;;  %v11251_v34 = vmax.f32 %v8782_v55, %v9073_v52  ;;  %v6625_v55 = vld [vmem:[%s11088_s1 + $0x918] sm:$0xf]  ;;  %v7315_v10 = vld [vmem:[%s11088_s1 + $0x944] sm:$0xf0] }
 0x2f6   : > { %3855 = vmatpush.bf16.msra.mxu0 %v5522_v43  ;;  %v6626_v43 = vor.u32 %v7315_v10, %v6625_v55  ;;  %v7123_v55 = vld [vmem:[%s11088_s1 + $0x344] sm:$0xf0] }
 0x2f7   : > { %v9356_v2 = vmax.f32 %v11250_v59, %v3634_v53  ;;  %v11252_v53 = vld [vmem:[#allocation12_spill] sm:$0xff]  ;;  %v11253_v59 = vld [vmem:[#allocation13_spill] sm:$0xff] }
 0x2f8   : > { %4003 = vmatpush.bf16.msra.mxu3 %v6626_v43 }
 0x2fa   : > { %v3586_v14 = vpop.f32.mrf.mxu2 }
 0x2fb   : > { %v3587_v56 = vadd.f32 %v3586_v14, %v3538_v27  ;;  %v3635_v51 = vpop.f32.mrf.mxu3  ;;  %v3491_v42 = vpop.f32.mrf.mxu0  ;;  %v6241_v27 = vld [vmem:[%s11088_s1 + $0x618] sm:$0xf] }
 0x2fc   : > { %v3540_v3 = vpop.f32.mrf.mxu1  ;;  %v6242_v52 = vor.u32 %v7219_v4, %v6241_v27  ;;  %v5857_v27 = vld [vmem:[%s11088_s1 + $0x318] sm:$0xf] }
 0x2fd   : > { %v3636_v62 = vadd.f32 %v3635_v51, %v3587_v56  ;;  %v3541_v35 = vadd.f32 %v3540_v3, %v3491_v42  ;;  %v11254_v3 = vmax.f32 %v8802_v19, %v9093_v46  ;;  %v5858_v19 = vor.u32 %v7123_v55, %v5857_v27 }
 0x2fe   : > { %3686 = vmatmul.bf16.gmra.mxu0 %v7925_v8  ;;  %3735 = vmatmul.bf16.gmra.mxu1 %v7927_v9 }
 0x2ff   : > { %v9374_v33 = vmax.f32 %v11251_v34, %v3636_v62  ;;  %3784 = vmatmul.bf16.gmra.mxu2 %v11252_v53  ;;  %v5473_v34 = vld [vmem:[%s11088_s1 + $0x18] sm:$0xf]  ;;  %3905 = vmatpush.bf16.msra.mxu1 %v5858_v19 }
 0x300   : > { %3833 = vmatmul.bf16.gmra.mxu3 %v11253_v59  ;;  %3954 = vmatpush.bf16.msra.mxu2 %v6242_v52 }
 0x302   : > { %v3589_v15 = vpop.f32.mrf.mxu2 }
 0x303   : > { %v3590_v61 = vadd.f32 %v3589_v15, %v3541_v35  ;;  %v3638_v30 = vpop.f32.mrf.mxu3  ;;  %v3493_v14 = vpop.f32.mrf.mxu0  ;;  %v7027_v35 = vld [vmem:[%s11088_s1 + $0x44] sm:$0xf0] }
 0x304   : > { %v3542_v56 = vpop.f32.mrf.mxu1  ;;  %v5474_v4 = vor.u32 %v7027_v35, %v5473_v34  ;;  %v6579_v34 = vld [vmem:[%s11088_s1 + $0x8e8] sm:$0xf0] }
 0x305   : > { %v3639_v51 = vadd.f32 %v3638_v30, %v3590_v61  ;;  %v3543_v42 = vadd.f32 %v3542_v56, %v3493_v14  ;;  %v11255_v14 = vmax.f32 %v8820_v39, %v9109_v57  ;;  %v7393_v39 = vld [vmem:[%s11088_s1 + $0xbbc] sm:$0xf]  ;;  %v6963_v35 = vld [vmem:[%s11088_s1 + $0xbe8] sm:$0xf0] }
 0x306   : > { %3856 = vmatpush.bf16.msra.mxu0 %v5474_v4  ;;  %v6966_v4 = vor.u32 %v7393_v39, %v6963_v35  ;;  %v6195_v39 = vld [vmem:[%s11088_s1 + $0x5e8] sm:$0xf0] }
 0x307   : > { %v9394_v62 = vmax.f32 %v11254_v3, %v3639_v51  ;;  %v11256_v51 = vld [vmem:[#allocation15_spill] sm:$0xff]  ;;  %v11257_v3 = vld [vmem:[#allocation16_spill] sm:$0xff] }
 0x308   : > { %4192 = vmatpush.bf16.msrb.mxu3 %v6966_v4 }
 0x30a   : > { %v3591_v46 = vpop.f32.mrf.mxu2 }
 0x30b   : > { %v3592_v52 = vadd.f32 %v3591_v46, %v3543_v42  ;;  %v3640_v10 = vpop.f32.mrf.mxu3  ;;  %v3496_v15 = vpop.f32.mrf.mxu0  ;;  %v7297_v42 = vld [vmem:[%s11088_s1 + $0x8bc] sm:$0xf] }
 0x30c   : > { %v3545_v43 = vpop.f32.mrf.mxu1  ;;  %v6582_v57 = vor.u32 %v7297_v42, %v6579_v34  ;;  %v7201_v42 = vld [vmem:[%s11088_s1 + $0x5bc] sm:$0xf] }
 0x30d   : > { %v3641_v61 = vadd.f32 %v3640_v10, %v3592_v52  ;;  %v3546_v30 = vadd.f32 %v3545_v43, %v3496_v15  ;;  %v11258_v43 = vmax.f32 %v8840_v18, %v9129_v23  ;;  %v6198_v18 = vor.u32 %v7201_v42, %v6195_v39 }
 0x30e   : > { %3691 = vmatmul.bf16.gmra.mxu0 %v7969_v44  ;;  %3740 = vmatmul.bf16.gmra.mxu1 %v7971_v45 }
 0x30f   : > { %v9412_v56 = vmax.f32 %v11255_v14, %v3641_v61  ;;  %3789 = vmatmul.bf16.gmra.mxu2 %v11256_v51  ;;  %v7105_v14 = vld [vmem:[%s11088_s1 + $0x2bc] sm:$0xf]  ;;  %4094 = vmatpush.bf16.msrb.mxu1 %v6198_v18 }
 0x310   : > { %3838 = vmatmul.bf16.gmra.mxu3 %v11257_v3  ;;  %4143 = vmatpush.bf16.msrb.mxu2 %v6582_v57 }
 0x312   : > { %v3594_v27 = vpop.f32.mrf.mxu2 }
 0x313   : > { %v3595_v55 = vadd.f32 %v3594_v27, %v3546_v30  ;;  %v3643_v19 = vpop.f32.mrf.mxu3  ;;  %v3498_v46 = vpop.f32.mrf.mxu0  ;;  %v5811_v30 = vld [vmem:[%s11088_s1 + $0x2e8] sm:$0xf0] }
 0x314   : > { %v3547_v52 = vpop.f32.mrf.mxu1  ;;  %v5814_v34 = vor.u32 %v7105_v14, %v5811_v30  ;;  %v6531_v14 = vld [vmem:[%s11088_s1 + $0x888] sm:$0xf0] }
 0x315   : > { %v3644_v10 = vadd.f32 %v3643_v19, %v3595_v55  ;;  %v3548_v15 = vadd.f32 %v3547_v52, %v3498_v46  ;;  %v11259_v46 = vmax.f32 %v8858_v38, %v9145_v32  ;;  %v7381_v38 = vld [vmem:[%s11088_s1 + $0xb5c] sm:$0xf]  ;;  %v6915_v30 = vld [vmem:[%s11088_s1 + $0xb88] sm:$0xf0] }
 0x316   : > { %4045 = vmatpush.bf16.msrb.mxu0 %v5814_v34  ;;  %v6918_v34 = vor.u32 %v7381_v38, %v6915_v30  ;;  %v6147_v38 = vld [vmem:[%s11088_s1 + $0x588] sm:$0xf0] }
 0x317   : > { %v9432_v61 = vmax.f32 %v11258_v43, %v3644_v10  ;;  %v11260_v10 = vld [vmem:[#allocation18_spill] sm:$0xff]  ;;  %v11261_v43 = vld [vmem:[#allocation19_spill] sm:$0xff] }
 0x318   : > { %4193 = vmatpush.bf16.msrb.mxu3 %v6918_v34 }
 0x31a   : > { %v3596_v23 = vpop.f32.mrf.mxu2 }
 0x31b   : > { %v3597_v57 = vadd.f32 %v3596_v23, %v3548_v15  ;;  %v3645_v35 = vpop.f32.mrf.mxu3  ;;  %v3501_v27 = vpop.f32.mrf.mxu0  ;;  %v7285_v15 = vld [vmem:[%s11088_s1 + $0x85c] sm:$0xf] }
 0x31c   : > { %v3550_v4 = vpop.f32.mrf.mxu1  ;;  %v6534_v32 = vor.u32 %v7285_v15, %v6531_v14  ;;  %v7189_v15 = vld [vmem:[%s11088_s1 + $0x55c] sm:$0xf] }
 0x31d   : > { %v3646_v55 = vadd.f32 %v3645_v35, %v3597_v57  ;;  %v3551_v19 = vadd.f32 %v3550_v4, %v3501_v27  ;;  %v11262_v4 = vmax.f32 %v8878_v29, %v9165_v1  ;;  %v6150_v29 = vor.u32 %v7189_v15, %v6147_v38  ;;  %v6867_v15 = vld [vmem:[%s11088_s1 + $0xb28] sm:$0xf0] }
 0x31e   : > { %3696 = vmatmul.bf16.gmra.mxu0 %v8013_v20  ;;  %3745 = vmatmul.bf16.gmra.mxu1 %v8015_v21 }
 0x31f   : > { %v9450_v52 = vmax.f32 %v11259_v46, %v3646_v55  ;;  %3794 = vmatmul.bf16.gmra.mxu2 %v11260_v10  ;;  %v7093_v46 = vld [vmem:[%s11088_s1 + $0x25c] sm:$0xf]  ;;  %4095 = vmatpush.bf16.msrb.mxu1 %v6150_v29 }
 0x320   : > { %3843 = vmatmul.bf16.gmra.mxu3 %v11261_v43  ;;  %4144 = vmatpush.bf16.msrb.mxu2 %v6534_v32 }
 0x322   : > { %v3599_v42 = vpop.f32.mrf.mxu2 }
 0x323   : > { %v3600_v39 = vadd.f32 %v3599_v42, %v3551_v19  ;;  %v3648_v18 = vpop.f32.mrf.mxu3  ;;  %v3503_v23 = vpop.f32.mrf.mxu0  ;;  %v5763_v19 = vld [vmem:[%s11088_s1 + $0x288] sm:$0xf0] }
 0x324   : > { %v3552_v57 = vpop.f32.mrf.mxu1  ;;  %v5766_v14 = vor.u32 %v7093_v46, %v5763_v19  ;;  %v11266_v46 = vld [vmem:[#allocation4_spill] sm:$0xff]  ;;  %v6483_v19 = vld [vmem:[%s11088_s1 + $0x828] sm:$0xf0] }
 0x325   : > { %v3649_v35 = vadd.f32 %v3648_v18, %v3600_v39  ;;  %v3553_v27 = vadd.f32 %v3552_v57, %v3503_v23  ;;  %v11263_v23 = vmax.f32 %v8896_v37, %v9181_v16  ;;  %v7369_v37 = vld [vmem:[%s11088_s1 + $0xafc] sm:$0xf] }
 0x326   : > { %4046 = vmatpush.bf16.msrb.mxu0 %v5766_v14  ;;  %v6870_v38 = vor.u32 %v7369_v37, %v6867_v15  ;;  %v6099_v37 = vld [vmem:[%s11088_s1 + $0x528] sm:$0xf0] }
 0x327   : > { %v9470_v55 = vmax.f32 %v11262_v4, %v3649_v35  ;;  %v11264_v35 = vld [vmem:[#allocation2_spill] sm:$0xff]  ;;  %v11265_v4 = vld [vmem:[#allocation3_spill] sm:$0xff] }
 0x328   : > { %4194 = vmatpush.bf16.msrb.mxu3 %v6870_v38 }
 0x32a   : > { %v3601_v1 = vpop.f32.mrf.mxu2 }
 0x32b   : > { %v3602_v32 = vadd.f32 %v3601_v1, %v3553_v27  ;;  %v3650_v30 = vpop.f32.mrf.mxu3  ;;  %v3662_v42 = vpop.f32.mrf.mxu0  ;;  %v7273_v27 = vld [vmem:[%s11088_s1 + $0x7fc] sm:$0xf] }
 0x32c   : > { %v3711_v34 = vpop.f32.mrf.mxu1  ;;  %v6486_v16 = vor.u32 %v7273_v27, %v6483_v19  ;;  %v5715_v27 = vld [vmem:[%s11088_s1 + $0x228] sm:$0xf0] }
 0x32d   : > { %v3651_v39 = vadd.f32 %v3650_v30, %v3602_v32  ;;  %v3712_v18 = vadd.f32 %v3711_v34, %v3662_v42 }
 0x32e   : > { %3857 = vmatmul.bf16.vlgmr.msra.gmra.mxu0 %v7682_v48  ;;  %3906 = vmatmul.bf16.vlgmr.msra.gmra.mxu1 %v11264_v35 }
 0x32f   : > { %v9488_v57 = vmax.f32 %v11263_v23, %v3651_v39  ;;  %3955 = vmatmul.bf16.vlgmr.msra.gmra.mxu2 %v11265_v4  ;;  %v7081_v23 = vld [vmem:[%s11088_s1 + $0x1fc] sm:$0xf] }
 0x330   : > { %4004 = vmatmul.bf16.vlgmr.msra.gmra.mxu3 %v11266_v46  ;;  %4145 = vmatpush.bf16.msrb.mxu2 %v6486_v16  ;;  %v5718_v19 = vor.u32 %v7081_v23, %v5715_v27  ;;  %v6435_v27 = vld [vmem:[%s11088_s1 + $0x7c8] sm:$0xf0] }
 0x332   : > { %v3760_v14 = vpop.f32.mrf.mxu2  ;;  %4047 = vmatpush.bf16.msrb.mxu0 %v5718_v19 }
 0x333   : > { %v3761_v29 = vadd.f32 %v3760_v14, %v3712_v18  ;;  %v3809_v1 = vpop.f32.mrf.mxu3  ;;  %v3664_v32 = vpop.f32.mrf.mxu0  ;;  %v7177_v18 = vld [vmem:[%s11088_s1 + $0x4fc] sm:$0xf] }
 0x334   : > { %v3713_v30 = vpop.f32.mrf.mxu1  ;;  %v6102_v16 = vor.u32 %v7177_v18, %v6099_v37  ;;  %v7357_v18 = vld [vmem:[%s11088_s1 + $0xa9c] sm:$0xf]  ;;  %v6819_v37 = vld [vmem:[%s11088_s1 + $0xac8] sm:$0xf0] }
 0x335   : > { %v9505_v42 = vadd.f32 %v3809_v1, %v3761_v29  ;;  %v3714_v34 = vadd.f32 %v3713_v30, %v3664_v32 }
 0x336   : > { %4096 = vmatpush.bf16.msrb.mxu1 %v6102_v16 }
 0x33a   : > { %v3762_v15 = vpop.f32.mrf.mxu2 }
 0x33b   : > { %v3763_v14 = vadd.f32 %v3762_v15, %v3714_v34  ;;  %v3811_v38 = vpop.f32.mrf.mxu3  ;;  %v3667_v29 = vpop.f32.mrf.mxu0  ;;  %v7261_v34 = vld [vmem:[%s11088_s1 + $0x79c] sm:$0xf]  ;;  %v6822_v15 = vor.u32 %v7357_v18, %v6819_v37 }
 0x33c   : > { %v3716_v1 = vpop.f32.mrf.mxu1  ;;  %v6438_v19 = vor.u32 %v7261_v34, %v6435_v27  ;;  %v7069_v34 = vld [vmem:[%s11088_s1 + $0x19c] sm:$0xf]  ;;  %v5667_v27 = vld [vmem:[%s11088_s1 + $0x1c8] sm:$0xf0] }
 0x33d   : > { %v9521_v32 = vadd.f32 %v3811_v38, %v3763_v14  ;;  %v3717_v30 = vadd.f32 %v3716_v1, %v3667_v29  ;;  %4195 = vmatpush.bf16.msrb.mxu3 %v6822_v15  ;;  %v5670_v18 = vor.u32 %v7069_v34, %v5667_v27  ;;  %v6387_v27 = vld [vmem:[%s11088_s1 + $0x768] sm:$0xf0] }
 0x33e   : > { %3862 = vmatmul.bf16.gmra.mxu0 %v7749_v24  ;;  %3911 = vmatmul.bf16.gmra.mxu1 %v7751_v25 }
 0x33f   : > { %3960 = vmatmul.bf16.gmra.mxu2 %v7753_v26  ;;  %4048 = vmatpush.bf16.msrb.mxu0 %v5670_v18 }
 0x340   : > { %4009 = vmatmul.bf16.gmra.mxu3 %v11237_v63  ;;  %4146 = vmatpush.bf16.msrb.mxu2 %v6438_v19  ;;  %v6051_v19 = vld [vmem:[%s11088_s1 + $0x4c8] sm:$0xf0] }
 0x342   : > { %v3765_v16 = vpop.f32.mrf.mxu2 }
 0x343   : > { %v3766_v14 = vadd.f32 %v3765_v16, %v3717_v30  ;;  %v3814_v38 = vpop.f32.mrf.mxu3  ;;  %v3669_v29 = vpop.f32.mrf.mxu0  ;;  %v7165_v30 = vld [vmem:[%s11088_s1 + $0x49c] sm:$0xf] }
 0x344   : > { %v3718_v1 = vpop.f32.mrf.mxu1  ;;  %v6054_v37 = vor.u32 %v7165_v30, %v6051_v19  ;;  %v7345_v30 = vld [vmem:[%s11088_s1 + $0xa3c] sm:$0xf]  ;;  %v6771_v19 = vld [vmem:[%s11088_s1 + $0xa68] sm:$0xf0] }
 0x345   : > { %v9541_v23 = vadd.f32 %v3814_v38, %v3766_v14  ;;  %v3719_v39 = vadd.f32 %v3718_v1, %v3669_v29 }
 0x346   : > { %4097 = vmatpush.bf16.msrb.mxu1 %v6054_v37 }
 0x34a   : > { %v3767_v16 = vpop.f32.mrf.mxu2 }
 0x34b   : > { %v3768_v15 = vadd.f32 %v3767_v16, %v3719_v39  ;;  %v3816_v14 = vpop.f32.mrf.mxu3  ;;  %v3672_v38 = vpop.f32.mrf.mxu0  ;;  %v7249_v39 = vld [vmem:[%s11088_s1 + $0x73c] sm:$0xf]  ;;  %v6774_v16 = vor.u32 %v7345_v30, %v6771_v19 }
 0x34c   : > { %v3721_v29 = vpop.f32.mrf.mxu1  ;;  %v6390_v18 = vor.u32 %v7249_v39, %v6387_v27  ;;  %v7057_v39 = vld [vmem:[%s11088_s1 + $0x13c] sm:$0xf]  ;;  %v5619_v27 = vld [vmem:[%s11088_s1 + $0x168] sm:$0xf0] }
 0x34d   : > { %v9557_v1 = vadd.f32 %v3816_v14, %v3768_v15  ;;  %v3722_v63 = vadd.f32 %v3721_v29, %v3672_v38  ;;  %4196 = vmatpush.bf16.msrb.mxu3 %v6774_v16  ;;  %v5622_v30 = vor.u32 %v7057_v39, %v5619_v27  ;;  %v6339_v27 = vld [vmem:[%s11088_s1 + $0x708] sm:$0xf0] }
 0x34e   : > { %3867 = vmatmul.bf16.gmra.mxu0 %v7793_v49  ;;  %3916 = vmatmul.bf16.gmra.mxu1 %v7795_v50 }
 0x34f   : > { %3965 = vmatmul.bf16.gmra.mxu2 %v11240_v54  ;;  %4049 = vmatpush.bf16.msrb.mxu0 %v5622_v30 }
 0x350   : > { %4014 = vmatmul.bf16.gmra.mxu3 %v11241_v22  ;;  %4147 = vmatpush.bf16.msrb.mxu2 %v6390_v18  ;;  %v6003_v18 = vld [vmem:[%s11088_s1 + $0x468] sm:$0xf0] }
 0x352   : > { %v3770_v37 = vpop.f32.mrf.mxu2 }
 0x353   : > { %v3771_v15 = vadd.f32 %v3770_v37, %v3722_v63  ;;  %v3819_v14 = vpop.f32.mrf.mxu3  ;;  %v3674_v38 = vpop.f32.mrf.mxu0  ;;  %v7153_v63 = vld [vmem:[%s11088_s1 + $0x43c] sm:$0xf] }
 0x354   : > { %v3723_v29 = vpop.f32.mrf.mxu1  ;;  %v6006_v19 = vor.u32 %v7153_v63, %v6003_v18  ;;  %v7333_v63 = vld [vmem:[%s11088_s1 + $0x9dc] sm:$0xf]  ;;  %v6723_v18 = vld [vmem:[%s11088_s1 + $0xa08] sm:$0xf0] }
 0x355   : > { %v9577_v34 = vadd.f32 %v3819_v14, %v3771_v15  ;;  %v3724_v22 = vadd.f32 %v3723_v29, %v3674_v38 }
 0x356   : > { %4098 = vmatpush.bf16.msrb.mxu1 %v6006_v19 }
 0x35a   : > { %v3772_v37 = vpop.f32.mrf.mxu2 }
 0x35b   : > { %v3773_v16 = vadd.f32 %v3772_v37, %v3724_v22  ;;  %v3821_v15 = vpop.f32.mrf.mxu3  ;;  %v3677_v14 = vpop.f32.mrf.mxu0  ;;  %v7237_v22 = vld [vmem:[%s11088_s1 + $0x6dc] sm:$0xf]  ;;  %v6726_v37 = vor.u32 %v7333_v63, %v6723_v18 }
 0x35c   : > { %v3726_v38 = vpop.f32.mrf.mxu1  ;;  %v6342_v30 = vor.u32 %v7237_v22, %v6339_v27  ;;  %v7045_v22 = vld [vmem:[%s11088_s1 + $0xdc] sm:$0xf]  ;;  %v5571_v27 = vld [vmem:[%s11088_s1 + $0x108] sm:$0xf0] }
 0x35d   : > { %v9593_v29 = vadd.f32 %v3821_v15, %v3773_v16  ;;  %v3727_v54 = vadd.f32 %v3726_v38, %v3677_v14  ;;  %4197 = vmatpush.bf16.msrb.mxu3 %v6726_v37  ;;  %v5574_v63 = vor.u32 %v7045_v22, %v5571_v27  ;;  %v6291_v27 = vld [vmem:[%s11088_s1 + $0x6a8] sm:$0xf0] }
 0x35e   : > { %3872 = vmatmul.bf16.gmra.mxu0 %v7837_v12  ;;  %3921 = vmatmul.bf16.gmra.mxu1 %v7839_v13 }
 0x35f   : > { %3970 = vmatmul.bf16.gmra.mxu2 %v11244_v60  ;;  %4050 = vmatpush.bf16.msrb.mxu0 %v5574_v63 }
 0x360   : > { %4019 = vmatmul.bf16.gmra.mxu3 %v11245_v0  ;;  %4148 = vmatpush.bf16.msrb.mxu2 %v6342_v30  ;;  %v5955_v30 = vld [vmem:[%s11088_s1 + $0x408] sm:$0xf0] }
 0x362   : > { %v3775_v19 = vpop.f32.mrf.mxu2 }
 0x363   : > { %v3776_v16 = vadd.f32 %v3775_v19, %v3727_v54  ;;  %v3824_v15 = vpop.f32.mrf.mxu3  ;;  %v3679_v14 = vpop.f32.mrf.mxu0  ;;  %v7141_v54 = vld [vmem:[%s11088_s1 + $0x3dc] sm:$0xf] }
 0x364   : > { %v3728_v38 = vpop.f32.mrf.mxu1  ;;  %v5958_v18 = vor.u32 %v7141_v54, %v5955_v30  ;;  %v7321_v54 = vld [vmem:[%s11088_s1 + $0x97c] sm:$0xf]  ;;  %v6675_v30 = vld [vmem:[%s11088_s1 + $0x9a8] sm:$0xf0] }
 0x365   : > { %v9613_v39 = vadd.f32 %v3824_v15, %v3776_v16  ;;  %v3729_v0 = vadd.f32 %v3728_v38, %v3679_v14 }
 0x366   : > { %4099 = vmatpush.bf16.msrb.mxu1 %v5958_v18 }
 0x36a   : > { %v3777_v19 = vpop.f32.mrf.mxu2 }
 0x36b   : > { %v3778_v37 = vadd.f32 %v3777_v19, %v3729_v0  ;;  %v3826_v16 = vpop.f32.mrf.mxu3  ;;  %v3682_v15 = vpop.f32.mrf.mxu0  ;;  %v7225_v0 = vld [vmem:[%s11088_s1 + $0x67c] sm:$0xf]  ;;  %v6678_v19 = vor.u32 %v7321_v54, %v6675_v30 }
 0x36c   : > { %v3731_v14 = vpop.f32.mrf.mxu1  ;;  %v6294_v63 = vor.u32 %v7225_v0, %v6291_v27  ;;  %v7033_v0 = vld [vmem:[%s11088_s1 + $0x7c] sm:$0xf]  ;;  %v5523_v27 = vld [vmem:[%s11088_s1 + $0xa8] sm:$0xf0] }
 0x36d   : > { %v9629_v38 = vadd.f32 %v3826_v16, %v3778_v37  ;;  %v3732_v60 = vadd.f32 %v3731_v14, %v3682_v15  ;;  %4198 = vmatpush.bf16.msrb.mxu3 %v6678_v19  ;;  %v5526_v54 = vor.u32 %v7033_v0, %v5523_v27  ;;  %v6243_v27 = vld [vmem:[%s11088_s1 + $0x648] sm:$0xf0] }
 0x36e   : > { %3877 = vmatmul.bf16.gmra.mxu0 %v7881_v40  ;;  %3926 = vmatmul.bf16.gmra.mxu1 %v7883_v41 }
 0x36f   : > { %3975 = vmatmul.bf16.gmra.mxu2 %v11248_v31  ;;  %4051 = vmatpush.bf16.msrb.mxu0 %v5526_v54 }
 0x370   : > { %4024 = vmatmul.bf16.gmra.mxu3 %v11249_v7  ;;  %4149 = vmatpush.bf16.msrb.mxu2 %v6294_v63  ;;  %v5907_v63 = vld [vmem:[%s11088_s1 + $0x3a8] sm:$0xf0] }
 0x372   : > { %v3780_v18 = vpop.f32.mrf.mxu2 }
 0x373   : > { %v3781_v37 = vadd.f32 %v3780_v18, %v3732_v60  ;;  %v3829_v16 = vpop.f32.mrf.mxu3  ;;  %v3684_v15 = vpop.f32.mrf.mxu0  ;;  %v7129_v60 = vld [vmem:[%s11088_s1 + $0x37c] sm:$0xf] }
 0x374   : > { %v3733_v14 = vpop.f32.mrf.mxu1  ;;  %v5910_v30 = vor.u32 %v7129_v60, %v5907_v63  ;;  %v7309_v60 = vld [vmem:[%s11088_s1 + $0x91c] sm:$0xf]  ;;  %v6627_v63 = vld [vmem:[%s11088_s1 + $0x948] sm:$0xf0] }
 0x375   : > { %v9649_v22 = vadd.f32 %v3829_v16, %v3781_v37  ;;  %v3734_v7 = vadd.f32 %v3733_v14, %v3684_v15 }
 0x376   : > { %4100 = vmatpush.bf16.msrb.mxu1 %v5910_v30 }
 0x37a   : > { %v3782_v18 = vpop.f32.mrf.mxu2 }
 0x37b   : > { %v3783_v19 = vadd.f32 %v3782_v18, %v3734_v7  ;;  %v3831_v37 = vpop.f32.mrf.mxu3  ;;  %v3687_v16 = vpop.f32.mrf.mxu0  ;;  %v7213_v7 = vld [vmem:[%s11088_s1 + $0x61c] sm:$0xf]  ;;  %v6630_v18 = vor.u32 %v7309_v60, %v6627_v63 }
 0x37c   : > { %v3736_v15 = vpop.f32.mrf.mxu1  ;;  %v6246_v54 = vor.u32 %v7213_v7, %v6243_v27  ;;  %v7021_v7 = vld [vmem:[%s11088_s1 + $0x1c] sm:$0xf]  ;;  %v5475_v27 = vld [vmem:[%s11088_s1 + $0x48] sm:$0xf0] }
 0x37d   : > { %v9665_v14 = vadd.f32 %v3831_v37, %v3783_v19  ;;  %v3737_v31 = vadd.f32 %v3736_v15, %v3687_v16  ;;  %4199 = vmatpush.bf16.msrb.mxu3 %v6630_v18  ;;  %v5478_v60 = vor.u32 %v7021_v7, %v5475_v27  ;;  %v7304_v27 = vld [vmem:[%s11088_s1 + $0x8ec] sm:$0xf0] }
 0x37e   : > { %3882 = vmatmul.bf16.gmra.mxu0 %v7925_v8  ;;  %3931 = vmatmul.bf16.gmra.mxu1 %v7927_v9 }
 0x37f   : > { %3980 = vmatmul.bf16.gmra.mxu2 %v11252_v53  ;;  %4052 = vmatpush.bf16.msrb.mxu0 %v5478_v60 }
 0x380   : > { %4029 = vmatmul.bf16.gmra.mxu3 %v11253_v59  ;;  %4150 = vmatpush.bf16.msrb.mxu2 %v6246_v54  ;;  %v5859_v54 = vld [vmem:[%s11088_s1 + $0x348] sm:$0xf0] }
 0x382   : > { %v3785_v30 = vpop.f32.mrf.mxu2 }
 0x383   : > { %v3786_v19 = vadd.f32 %v3785_v30, %v3737_v31  ;;  %v3834_v37 = vpop.f32.mrf.mxu3  ;;  %v3689_v16 = vpop.f32.mrf.mxu0  ;;  %v7117_v31 = vld [vmem:[%s11088_s1 + $0x31c] sm:$0xf] }
 0x384   : > { %v3738_v15 = vpop.f32.mrf.mxu1  ;;  %v5862_v63 = vor.u32 %v7117_v31, %v5859_v54  ;;  %v6969_v31 = vld [vmem:[%s11088_s1 + $0xbc0] sm:$0xf]  ;;  %v7400_v54 = vld [vmem:[%s11088_s1 + $0xbec] sm:$0xf0] }
 0x385   : > { %v9685_v0 = vadd.f32 %v3834_v37, %v3786_v19  ;;  %v3739_v59 = vadd.f32 %v3738_v15, %v3689_v16 }
 0x386   : > { %4101 = vmatpush.bf16.msrb.mxu1 %v5862_v63 }
 0x38a   : > { %v3787_v30 = vpop.f32.mrf.mxu2 }
 0x38b   : > { %v3788_v18 = vadd.f32 %v3787_v30, %v3739_v59  ;;  %v3836_v19 = vpop.f32.mrf.mxu3  ;;  %v3692_v37 = vpop.f32.mrf.mxu0  ;;  %v6585_v59 = vld [vmem:[%s11088_s1 + $0x8c0] sm:$0xf]  ;;  %v6970_v30 = vor.u32 %v7400_v54, %v6969_v31 }
 0x38c   : > { %v3741_v16 = vpop.f32.mrf.mxu1  ;;  %v6586_v60 = vor.u32 %v7304_v27, %v6585_v59  ;;  %v5817_v59 = vld [vmem:[%s11088_s1 + $0x2c0] sm:$0xf]  ;;  %v7112_v27 = vld [vmem:[%s11088_s1 + $0x2ec] sm:$0xf0] }
 0x38d   : > { %v9701_v15 = vadd.f32 %v3836_v19, %v3788_v18  ;;  %v3742_v53 = vadd.f32 %v3741_v16, %v3692_v37  ;;  %4388 = vmatpush.bf16.msra.mxu3 %v6970_v30  ;;  %v5818_v31 = vor.u32 %v7112_v27, %v5817_v59  ;;  %v7292_v27 = vld [vmem:[%s11088_s1 + $0x88c] sm:$0xf0] }
 0x38e   : > { %3887 = vmatmul.bf16.gmra.mxu0 %v7969_v44  ;;  %3936 = vmatmul.bf16.gmra.mxu1 %v7971_v45 }
 0x38f   : > { %3985 = vmatmul.bf16.gmra.mxu2 %v11256_v51  ;;  %4241 = vmatpush.bf16.msra.mxu0 %v5818_v31 }
 0x390   : > { %4034 = vmatmul.bf16.gmra.mxu3 %v11257_v3  ;;  %4339 = vmatpush.bf16.msra.mxu2 %v6586_v60  ;;  %v7208_v60 = vld [vmem:[%s11088_s1 + $0x5ec] sm:$0xf0] }
 0x392   : > { %v3790_v63 = vpop.f32.mrf.mxu2 }
 0x393   : > { %v3791_v18 = vadd.f32 %v3790_v63, %v3742_v53  ;;  %v3839_v19 = vpop.f32.mrf.mxu3  ;;  %v3694_v37 = vpop.f32.mrf.mxu0  ;;  %v6201_v53 = vld [vmem:[%s11088_s1 + $0x5c0] sm:$0xf] }
 0x394   : > { %v3743_v16 = vpop.f32.mrf.mxu1  ;;  %v6202_v54 = vor.u32 %v7208_v60, %v6201_v53  ;;  %v6921_v53 = vld [vmem:[%s11088_s1 + $0xb60] sm:$0xf]  ;;  %v7388_v60 = vld [vmem:[%s11088_s1 + $0xb8c] sm:$0xf0] }
 0x395   : > { %v9721_v7 = vadd.f32 %v3839_v19, %v3791_v18  ;;  %v3744_v3 = vadd.f32 %v3743_v16, %v3694_v37 }
 0x396   : > { %4290 = vmatpush.bf16.msra.mxu1 %v6202_v54 }
 0x39a   : > { %v3792_v63 = vpop.f32.mrf.mxu2 }
 0x39b   : > { %v3793_v30 = vadd.f32 %v3792_v63, %v3744_v3  ;;  %v3841_v18 = vpop.f32.mrf.mxu3  ;;  %v3697_v19 = vpop.f32.mrf.mxu0  ;;  %v6537_v3 = vld [vmem:[%s11088_s1 + $0x860] sm:$0xf]  ;;  %v6922_v63 = vor.u32 %v7388_v60, %v6921_v53 }
 0x39c   : > { %v3746_v37 = vpop.f32.mrf.mxu1  ;;  %v6538_v31 = vor.u32 %v7292_v27, %v6537_v3  ;;  %v5769_v3 = vld [vmem:[%s11088_s1 + $0x260] sm:$0xf]  ;;  %v7100_v27 = vld [vmem:[%s11088_s1 + $0x28c] sm:$0xf0] }
 0x39d   : > { %v9737_v16 = vadd.f32 %v3841_v18, %v3793_v30  ;;  %v3747_v51 = vadd.f32 %v3746_v37, %v3697_v19  ;;  %4389 = vmatpush.bf16.msra.mxu3 %v6922_v63  ;;  %v5770_v53 = vor.u32 %v7100_v27, %v5769_v3  ;;  %v7280_v27 = vld [vmem:[%s11088_s1 + $0x82c] sm:$0xf0] }
 0x39e   : > { %3892 = vmatmul.bf16.gmra.mxu0 %v8013_v20  ;;  %3941 = vmatmul.bf16.gmra.mxu1 %v8015_v21 }
 0x39f   : > { %3990 = vmatmul.bf16.gmra.mxu2 %v11260_v10  ;;  %4242 = vmatpush.bf16.msra.mxu0 %v5770_v53 }
 0x3a0   : > { %4039 = vmatmul.bf16.gmra.mxu3 %v11261_v43  ;;  %4340 = vmatpush.bf16.msra.mxu2 %v6538_v31  ;;  %v7196_v31 = vld [vmem:[%s11088_s1 + $0x58c] sm:$0xf0] }
 0x3a2   : > { %v3795_v54 = vpop.f32.mrf.mxu2 }
 0x3a3   : > { %v3796_v30 = vadd.f32 %v3795_v54, %v3747_v51  ;;  %v3844_v18 = vpop.f32.mrf.mxu3  ;;  %v3699_v19 = vpop.f32.mrf.mxu0  ;;  %v6153_v51 = vld [vmem:[%s11088_s1 + $0x560] sm:$0xf] }
 0x3a4   : > { %v3748_v37 = vpop.f32.mrf.mxu1  ;;  %v6154_v60 = vor.u32 %v7196_v31, %v6153_v51  ;;  %v6873_v51 = vld [vmem:[%s11088_s1 + $0xb00] sm:$0xf]  ;;  %v7376_v31 = vld [vmem:[%s11088_s1 + $0xb2c] sm:$0xf0] }
 0x3a5   : > { %v9757_v59 = vadd.f32 %v3844_v18, %v3796_v30  ;;  %v3749_v43 = vadd.f32 %v3748_v37, %v3699_v19 }
 0x3a6   : > { %4291 = vmatpush.bf16.msra.mxu1 %v6154_v60 }
 0x3aa   : > { %v3797_v54 = vpop.f32.mrf.mxu2 }
 0x3ab   : > { %v3798_v63 = vadd.f32 %v3797_v54, %v3749_v43  ;;  %v3846_v30 = vpop.f32.mrf.mxu3  ;;  %v3858_v18 = vpop.f32.mrf.mxu0  ;;  %v6489_v43 = vld [vmem:[%s11088_s1 + $0x800] sm:$0xf]  ;;  %v6874_v54 = vor.u32 %v7376_v31, %v6873_v51 }
 0x3ac   : > { %v3907_v19 = vpop.f32.mrf.mxu1  ;;  %v6490_v53 = vor.u32 %v7280_v27, %v6489_v43  ;;  %v5721_v43 = vld [vmem:[%s11088_s1 + $0x200] sm:$0xf] }
 0x3ad   : > { %v9773_v37 = vadd.f32 %v3846_v30, %v3798_v63  ;;  %v3908_v10 = vadd.f32 %v3907_v19, %v3858_v18  ;;  %4390 = vmatpush.bf16.msra.mxu3 %v6874_v54  ;;  %v6105_v27 = vld [vmem:[%s11088_s1 + $0x500] sm:$0xf] }
 0x3ae   : > { %4053 = vmatmul.bf16.vlgmr.msrb.gmra.mxu0 %v7682_v48  ;;  %4102 = vmatmul.bf16.vlgmr.msrb.gmra.mxu1 %v11264_v35 }
 0x3af   : > { %4151 = vmatmul.bf16.vlgmr.msrb.gmra.mxu2 %v11265_v4  ;;  %v11267_v4 = vmax.f32 %v9204_v58, %v9505_v42 }
 0x3b0   : > { %4200 = vmatmul.bf16.vlgmr.msrb.gmra.mxu3 %v11266_v46  ;;  %4341 = vmatpush.bf16.msra.mxu2 %v6490_v53  ;;  %v7184_v53 = vld [vmem:[%s11088_s1 + $0x52c] sm:$0xf0] }
 0x3b1   : > { %v6106_v58 = vor.u32 %v7184_v53, %v6105_v27 }
 0x3b2   : > { %v3956_v60 = vpop.f32.mrf.mxu2 }
 0x3b3   : > { %v3957_v63 = vadd.f32 %v3956_v60, %v3908_v10  ;;  %v4005_v30 = vpop.f32.mrf.mxu3  ;;  %v3860_v18 = vpop.f32.mrf.mxu0  ;;  %v7088_v10 = vld [vmem:[%s11088_s1 + $0x22c] sm:$0xf0]  ;;  %4292 = vmatpush.bf16.msra.mxu1 %v6106_v58 }
 0x3b4   : > { %v3909_v19 = vpop.f32.mrf.mxu1  ;;  %v5722_v51 = vor.u32 %v7088_v10, %v5721_v43  ;;  %v7268_v43 = vld [vmem:[%s11088_s1 + $0x7cc] sm:$0xf0] }
 0x3b5   : > { %v4006_v3 = vadd.f32 %v4005_v30, %v3957_v63  ;;  %v3910_v46 = vadd.f32 %v3909_v19, %v3860_v18  ;;  %v11268_v30 = vmax.f32 %v9222_v5, %v9521_v32  ;;  %v11269_v19 = vld [vmem:[#allocation5_spill] sm:$0xff]  ;;  %v6825_v5 = vld [vmem:[%s11088_s1 + $0xaa0] sm:$0xf]  ;;  %v7364_v10 = vld [vmem:[%s11088_s1 + $0xacc] sm:$0xf0] }
 0x3b6   : > { %4243 = vmatpush.bf16.msra.mxu0 %v5722_v51  ;;  %v6826_v51 = vor.u32 %v7364_v10, %v6825_v5  ;;  %v7172_v5 = vld [vmem:[%s11088_s1 + $0x4cc] sm:$0xf0] }
 0x3b7   : > { %v9796_v35 = vmax.f32 %v11267_v4, %v4006_v3 }
 0x3b8   : > { %4391 = vmatpush.bf16.msra.mxu3 %v6826_v51 }
 0x3ba   : > { %v3958_v4 = vpop.f32.mrf.mxu2 }
 0x3bb   : > { %v3959_v42 = vadd.f32 %v3958_v4, %v3910_v46  ;;  %v4007_v3 = vpop.f32.mrf.mxu3  ;;  %v3863_v31 = vpop.f32.mrf.mxu0  ;;  %v6441_v46 = vld [vmem:[%s11088_s1 + $0x7a0] sm:$0xf] }
 0x3bc   : > { %v3912_v60 = vpop.f32.mrf.mxu1  ;;  %v6442_v32 = vor.u32 %v7268_v43, %v6441_v46  ;;  %v6057_v46 = vld [vmem:[%s11088_s1 + $0x4a0] sm:$0xf] }
 0x3bd   : > { %v4008_v54 = vadd.f32 %v4007_v3, %v3959_v42  ;;  %v3913_v63 = vadd.f32 %v3912_v60, %v3863_v31  ;;  %v11270_v60 = vmax.f32 %v9242_v47, %v9541_v23  ;;  %v6058_v47 = vor.u32 %v7172_v5, %v6057_v46 }
 0x3be   : > { %4058 = vmatmul.bf16.gmra.mxu0 %v7749_v24  ;;  %4107 = vmatmul.bf16.gmra.mxu1 %v7751_v25 }
 0x3bf   : > { %v9814_v18 = vmax.f32 %v11268_v30, %v4008_v54  ;;  %4156 = vmatmul.bf16.gmra.mxu2 %v7753_v26  ;;  %v5673_v30 = vld [vmem:[%s11088_s1 + $0x1a0] sm:$0xf]  ;;  %4293 = vmatpush.bf16.msra.mxu1 %v6058_v47 }
 0x3c0   : > { %4205 = vmatmul.bf16.gmra.mxu3 %v11269_v19  ;;  %4342 = vmatpush.bf16.msra.mxu2 %v6442_v32 }
 0x3c2   : > { %v3961_v27 = vpop.f32.mrf.mxu2 }
 0x3c3   : > { %v3962_v53 = vadd.f32 %v3961_v27, %v3913_v63  ;;  %v4010_v58 = vpop.f32.mrf.mxu3  ;;  %v3865_v4 = vpop.f32.mrf.mxu0  ;;  %v7076_v63 = vld [vmem:[%s11088_s1 + $0x1cc] sm:$0xf0] }
 0x3c4   : > { %v3914_v42 = vpop.f32.mrf.mxu1  ;;  %v5674_v43 = vor.u32 %v7076_v63, %v5673_v30  ;;  %v7256_v30 = vld [vmem:[%s11088_s1 + $0x76c] sm:$0xf0] }
 0x3c5   : > { %v4011_v3 = vadd.f32 %v4010_v58, %v3962_v53  ;;  %v3915_v31 = vadd.f32 %v3914_v42, %v3865_v4  ;;  %v11271_v4 = vmax.f32 %v9260_v28, %v9557_v1  ;;  %v6777_v28 = vld [vmem:[%s11088_s1 + $0xa40] sm:$0xf]  ;;  %v7352_v63 = vld [vmem:[%s11088_s1 + $0xa6c] sm:$0xf0] }
 0x3c6   : > { %4244 = vmatpush.bf16.msra.mxu0 %v5674_v43  ;;  %v6778_v43 = vor.u32 %v7352_v63, %v6777_v28  ;;  %v7160_v28 = vld [vmem:[%s11088_s1 + $0x46c] sm:$0xf0] }
 0x3c7   : > { %v9834_v54 = vmax.f32 %v11270_v60, %v4011_v3  ;;  %v11272_v3 = vld [vmem:[#allocation6_spill] sm:$0xff]  ;;  %v11273_v60 = vld [vmem:[#allocation7_spill] sm:$0xff] }
 0x3c8   : > { %4392 = vmatpush.bf16.msra.mxu3 %v6778_v43 }
 0x3ca   : > { %v3963_v23 = vpop.f32.mrf.mxu2 }
 0x3cb   : > { %v3964_v32 = vadd.f32 %v3963_v23, %v3915_v31  ;;  %v4012_v10 = vpop.f32.mrf.mxu3  ;;  %v3868_v27 = vpop.f32.mrf.mxu0  ;;  %v6393_v31 = vld [vmem:[%s11088_s1 + $0x740] sm:$0xf] }
 0x3cc   : > { %v3917_v51 = vpop.f32.mrf.mxu1  ;;  %v6394_v1 = vor.u32 %v7256_v30, %v6393_v31  ;;  %v6009_v31 = vld [vmem:[%s11088_s1 + $0x440] sm:$0xf] }
 0x3cd   : > { %v4013_v53 = vadd.f32 %v4012_v10, %v3964_v32  ;;  %v3918_v58 = vadd.f32 %v3917_v51, %v3868_v27  ;;  %v11274_v51 = vmax.f32 %v9280_v6, %v9577_v34  ;;  %v6010_v6 = vor.u32 %v7160_v28, %v6009_v31 }
 0x3ce   : > { %4063 = vmatmul.bf16.gmra.mxu0 %v7793_v49  ;;  %4112 = vmatmul.bf16.gmra.mxu1 %v7795_v50 }
 0x3cf   : > { %v9852_v42 = vmax.f32 %v11271_v4, %v4013_v53  ;;  %4161 = vmatmul.bf16.gmra.mxu2 %v11272_v3  ;;  %v5625_v4 = vld [vmem:[%s11088_s1 + $0x140] sm:$0xf]  ;;  %4294 = vmatpush.bf16.msra.mxu1 %v6010_v6 }
 0x3d0   : > { %4210 = vmatmul.bf16.gmra.mxu3 %v11273_v60  ;;  %4343 = vmatpush.bf16.msra.mxu2 %v6394_v1 }
 0x3d2   : > { %v3966_v46 = vpop.f32.mrf.mxu2 }
 0x3d3   : > { %v3967_v5 = vadd.f32 %v3966_v46, %v3918_v58  ;;  %v4015_v47 = vpop.f32.mrf.mxu3  ;;  %v3870_v23 = vpop.f32.mrf.mxu0  ;;  %v7064_v58 = vld [vmem:[%s11088_s1 + $0x16c] sm:$0xf0] }
 0x3d4   : > { %v3919_v32 = vpop.f32.mrf.mxu1  ;;  %v5626_v30 = vor.u32 %v7064_v58, %v5625_v4  ;;  %v7244_v4 = vld [vmem:[%s11088_s1 + $0x70c] sm:$0xf0] }
 0x3d5   : > { %v4016_v10 = vadd.f32 %v4015_v47, %v3967_v5  ;;  %v3920_v27 = vadd.f32 %v3919_v32, %v3870_v23  ;;  %v11275_v23 = vmax.f32 %v9298_v36, %v9593_v29  ;;  %v6729_v36 = vld [vmem:[%s11088_s1 + $0x9e0] sm:$0xf]  ;;  %v7340_v58 = vld [vmem:[%s11088_s1 + $0xa0c] sm:$0xf0] }
 0x3d6   : > { %4245 = vmatpush.bf16.msra.mxu0 %v5626_v30  ;;  %v6730_v30 = vor.u32 %v7340_v58, %v6729_v36  ;;  %v7148_v36 = vld [vmem:[%s11088_s1 + $0x40c] sm:$0xf0] }
 0x3d7   : > { %v9872_v53 = vmax.f32 %v11274_v51, %v4016_v10  ;;  %v11276_v10 = vld [vmem:[#allocation8_spill] sm:$0xff]  ;;  %v11277_v51 = vld [vmem:[#allocation9_spill] sm:$0xff] }
 0x3d8   : > { %4393 = vmatpush.bf16.msra.mxu3 %v6730_v30 }
 0x3da   : > { %v3968_v34 = vpop.f32.mrf.mxu2 }
 0x3db   : > { %v3969_v1 = vadd.f32 %v3968_v34, %v3920_v27  ;;  %v4017_v63 = vpop.f32.mrf.mxu3  ;;  %v3873_v46 = vpop.f32.mrf.mxu0  ;;  %v6345_v27 = vld [vmem:[%s11088_s1 + $0x6e0] sm:$0xf] }
 0x3dc   : > { %v3922_v43 = vpop.f32.mrf.mxu1  ;;  %v6346_v29 = vor.u32 %v7244_v4, %v6345_v27  ;;  %v5961_v27 = vld [vmem:[%s11088_s1 + $0x3e0] sm:$0xf] }
 0x3dd   : > { %v4018_v5 = vadd.f32 %v4017_v63, %v3969_v1  ;;  %v3923_v47 = vadd.f32 %v3922_v43, %v3873_v46  ;;  %v11278_v43 = vmax.f32 %v9318_v17, %v9613_v39  ;;  %v5962_v17 = vor.u32 %v7148_v36, %v5961_v27 }
 0x3de   : > { %4068 = vmatmul.bf16.gmra.mxu0 %v7837_v12  ;;  %4117 = vmatmul.bf16.gmra.mxu1 %v7839_v13 }
 0x3df   : > { %v9890_v32 = vmax.f32 %v11275_v23, %v4018_v5  ;;  %4166 = vmatmul.bf16.gmra.mxu2 %v11276_v10  ;;  %v5577_v23 = vld [vmem:[%s11088_s1 + $0xe0] sm:$0xf]  ;;  %4295 = vmatpush.bf16.msra.mxu1 %v5962_v17 }
 0x3e0   : > { %4215 = vmatmul.bf16.gmra.mxu3 %v11277_v51  ;;  %4344 = vmatpush.bf16.msra.mxu2 %v6346_v29 }
 0x3e2   : > { %v3971_v31 = vpop.f32.mrf.mxu2 }
 0x3e3   : > { %v3972_v28 = vadd.f32 %v3971_v31, %v3923_v47  ;;  %v4020_v6 = vpop.f32.mrf.mxu3  ;;  %v3875_v34 = vpop.f32.mrf.mxu0  ;;  %v7052_v47 = vld [vmem:[%s11088_s1 + $0x10c] sm:$0xf0] }
 0x3e4   : > { %v3924_v1 = vpop.f32.mrf.mxu1  ;;  %v5578_v4 = vor.u32 %v7052_v47, %v5577_v23  ;;  %v7232_v23 = vld [vmem:[%s11088_s1 + $0x6ac] sm:$0xf0] }
 0x3e5   : > { %v4021_v63 = vadd.f32 %v4020_v6, %v3972_v28  ;;  %v3925_v46 = vadd.f32 %v3924_v1, %v3875_v34  ;;  %v11279_v34 = vmax.f32 %v9336_v11, %v9629_v38  ;;  %v6681_v11 = vld [vmem:[%s11088_s1 + $0x980] sm:$0xf]  ;;  %v7328_v47 = vld [vmem:[%s11088_s1 + $0x9ac] sm:$0xf0] }
 0x3e6   : > { %4246 = vmatpush.bf16.msra.mxu0 %v5578_v4  ;;  %v6682_v4 = vor.u32 %v7328_v47, %v6681_v11  ;;  %v7136_v11 = vld [vmem:[%s11088_s1 + $0x3ac] sm:$0xf0] }
 0x3e7   : > { %v9910_v5 = vmax.f32 %v11278_v43, %v4021_v63  ;;  %v11280_v63 = vld [vmem:[#allocation10_spill] sm:$0xff]  ;;  %v11281_v43 = vld [vmem:[#allocation11_spill] sm:$0xff] }
 0x3e8   : > { %4394 = vmatpush.bf16.msra.mxu3 %v6682_v4 }
 0x3ea   : > { %v3973_v39 = vpop.f32.mrf.mxu2 }
 0x3eb   : > { %v3974_v29 = vadd.f32 %v3973_v39, %v3925_v46  ;;  %v4022_v58 = vpop.f32.mrf.mxu3  ;;  %v3878_v31 = vpop.f32.mrf.mxu0  ;;  %v6297_v46 = vld [vmem:[%s11088_s1 + $0x680] sm:$0xf] }
 0x3ec   : > { %v3927_v30 = vpop.f32.mrf.mxu1  ;;  %v6298_v38 = vor.u32 %v7232_v23, %v6297_v46  ;;  %v5913_v46 = vld [vmem:[%s11088_s1 + $0x380] sm:$0xf] }
 0x3ed   : > { %v4023_v28 = vadd.f32 %v4022_v58, %v3974_v29  ;;  %v3928_v6 = vadd.f32 %v3927_v30, %v3878_v31  ;;  %v11282_v30 = vmax.f32 %v9356_v2, %v9649_v22  ;;  %v5914_v2 = vor.u32 %v7136_v11, %v5913_v46 }
 0x3ee   : > { %4073 = vmatmul.bf16.gmra.mxu0 %v7881_v40  ;;  %4122 = vmatmul.bf16.gmra.mxu1 %v7883_v41 }
 0x3ef   : > { %v9928_v1 = vmax.f32 %v11279_v34, %v4023_v28  ;;  %4171 = vmatmul.bf16.gmra.mxu2 %v11280_v63  ;;  %v5529_v34 = vld [vmem:[%s11088_s1 + $0x80] sm:$0xf]  ;;  %4296 = vmatpush.bf16.msra.mxu1 %v5914_v2 }
 0x3f0   : > { %4220 = vmatmul.bf16.gmra.mxu3 %v11281_v43  ;;  %4345 = vmatpush.bf16.msra.mxu2 %v6298_v38 }
 0x3f2   : > { %v3976_v27 = vpop.f32.mrf.mxu2 }
 0x3f3   : > { %v3977_v36 = vadd.f32 %v3976_v27, %v3928_v6  ;;  %v4025_v17 = vpop.f32.mrf.mxu3  ;;  %v3880_v39 = vpop.f32.mrf.mxu0  ;;  %v7040_v6 = vld [vmem:[%s11088_s1 + $0xac] sm:$0xf0] }
 0x3f4   : > { %v3929_v29 = vpop.f32.mrf.mxu1  ;;  %v5530_v23 = vor.u32 %v7040_v6, %v5529_v34  ;;  %v7220_v34 = vld [vmem:[%s11088_s1 + $0x64c] sm:$0xf0] }
 0x3f5   : > { %v4026_v58 = vadd.f32 %v4025_v17, %v3977_v36  ;;  %v3930_v31 = vadd.f32 %v3929_v29, %v3880_v39  ;;  %v11283_v39 = vmax.f32 %v9374_v33, %v9665_v14  ;;  %v6633_v33 = vld [vmem:[%s11088_s1 + $0x920] sm:$0xf]  ;;  %v7316_v6 = vld [vmem:[%s11088_s1 + $0x94c] sm:$0xf0] }
 0x3f6   : > { %4247 = vmatpush.bf16.msra.mxu0 %v5530_v23  ;;  %v6634_v23 = vor.u32 %v7316_v6, %v6633_v33  ;;  %v7124_v33 = vld [vmem:[%s11088_s1 + $0x34c] sm:$0xf0] }
 0x3f7   : > { %v9948_v28 = vmax.f32 %v11282_v30, %v4026_v58  ;;  %v11284_v58 = vld [vmem:[#allocation12_spill] sm:$0xff]  ;;  %v11285_v30 = vld [vmem:[#allocation13_spill] sm:$0xff] }
 0x3f8   : > { %4395 = vmatpush.bf16.msra.mxu3 %v6634_v23 }
 0x3fa   : > { %v3978_v22 = vpop.f32.mrf.mxu2 }
 0x3fb   : > { %v3979_v38 = vadd.f32 %v3978_v22, %v3930_v31  ;;  %v4027_v47 = vpop.f32.mrf.mxu3  ;;  %v3883_v27 = vpop.f32.mrf.mxu0  ;;  %v6249_v31 = vld [vmem:[%s11088_s1 + $0x620] sm:$0xf] }
 0x3fc   : > { %v3932_v4 = vpop.f32.mrf.mxu1  ;;  %v6250_v14 = vor.u32 %v7220_v34, %v6249_v31  ;;  %v5865_v31 = vld [vmem:[%s11088_s1 + $0x320] sm:$0xf] }
 0x3fd   : > { %v4028_v36 = vadd.f32 %v4027_v47, %v3979_v38  ;;  %v3933_v17 = vadd.f32 %v3932_v4, %v3883_v27  ;;  %v11286_v4 = vmax.f32 %v9394_v62, %v9685_v0  ;;  %v5866_v62 = vor.u32 %v7124_v33, %v5865_v31 }
 0x3fe   : > { %4078 = vmatmul.bf16.gmra.mxu0 %v7925_v8  ;;  %4127 = vmatmul.bf16.gmra.mxu1 %v7927_v9 }
 0x3ff   : > { %v9966_v29 = vmax.f32 %v11283_v39, %v4028_v36  ;;  %4176 = vmatmul.bf16.gmra.mxu2 %v11284_v58  ;;  %v5481_v39 = vld [vmem:[%s11088_s1 + $0x20] sm:$0xf]  ;;  %4297 = vmatpush.bf16.msra.mxu1 %v5866_v62 }
 0x400   : > { %4225 = vmatmul.bf16.gmra.mxu3 %v11285_v30  ;;  %4346 = vmatpush.bf16.msra.mxu2 %v6250_v14 }
 0x402   : > { %v3981_v46 = vpop.f32.mrf.mxu2 }
 0x403   : > { %v3982_v11 = vadd.f32 %v3981_v46, %v3933_v17  ;;  %v4030_v2 = vpop.f32.mrf.mxu3  ;;  %v3885_v22 = vpop.f32.mrf.mxu0  ;;  %v7028_v17 = vld [vmem:[%s11088_s1 + $0x4c] sm:$0xf0] }
 0x404   : > { %v3934_v38 = vpop.f32.mrf.mxu1  ;;  %v5482_v34 = vor.u32 %v7028_v17, %v5481_v39  ;;  %v6587_v39 = vld [vmem:[%s11088_s1 + $0x8f0] sm:$0xf0] }
 0x405   : > { %v4031_v47 = vadd.f32 %v4030_v2, %v3982_v11  ;;  %v3935_v27 = vadd.f32 %v3934_v38, %v3885_v22  ;;  %v11287_v22 = vmax.f32 %v9412_v56, %v9701_v15  ;;  %v7394_v56 = vld [vmem:[%s11088_s1 + $0xbc4] sm:$0xf]  ;;  %v6971_v17 = vld [vmem:[%s11088_s1 + $0xbf0] sm:$0xf0] }
 0x406   : > { %4248 = vmatpush.bf16.msra.mxu0 %v5482_v34  ;;  %v6974_v34 = vor.u32 %v7394_v56, %v6971_v17  ;;  %v6203_v56 = vld [vmem:[%s11088_s1 + $0x5f0] sm:$0xf0] }
 0x407   : > { %v9986_v36 = vmax.f32 %v11286_v4, %v4031_v47  ;;  %v11288_v47 = vld [vmem:[#allocation15_spill] sm:$0xff]  ;;  %v11289_v4 = vld [vmem:[#allocation16_spill] sm:$0xff] }
 0x408   : > { %4584 = vmatpush.bf16.msrb.mxu3 %v6974_v34 }
 0x40a   : > { %v3983_v0 = vpop.f32.mrf.mxu2 }
 0x40b   : > { %v3984_v14 = vadd.f32 %v3983_v0, %v3935_v27  ;;  %v4032_v6 = vpop.f32.mrf.mxu3  ;;  %v3888_v46 = vpop.f32.mrf.mxu0  ;;  %v7298_v27 = vld [vmem:[%s11088_s1 + $0x8c4] sm:$0xf] }
 0x40c   : > { %v3937_v23 = vpop.f32.mrf.mxu1  ;;  %v6590_v15 = vor.u32 %v7298_v27, %v6587_v39  ;;  %v7202_v27 = vld [vmem:[%s11088_s1 + $0x5c4] sm:$0xf] }
 0x40d   : > { %v4033_v11 = vadd.f32 %v4032_v6, %v3984_v14  ;;  %v3938_v2 = vadd.f32 %v3937_v23, %v3888_v46  ;;  %v11290_v23 = vmax.f32 %v9432_v61, %v9721_v7  ;;  %v6206_v61 = vor.u32 %v7202_v27, %v6203_v56 }
 0x40e   : > { %4083 = vmatmul.bf16.gmra.mxu0 %v7969_v44  ;;  %4132 = vmatmul.bf16.gmra.mxu1 %v7971_v45 }
 0x40f   : > { %v10004_v38 = vmax.f32 %v11287_v22, %v4033_v11  ;;  %4181 = vmatmul.bf16.gmra.mxu2 %v11288_v47  ;;  %v7106_v22 = vld [vmem:[%s11088_s1 + $0x2c4] sm:$0xf]  ;;  %4486 = vmatpush.bf16.msrb.mxu1 %v6206_v61 }
 0x410   : > { %4230 = vmatmul.bf16.gmra.mxu3 %v11289_v4  ;;  %4535 = vmatpush.bf16.msrb.mxu2 %v6590_v15 }
 0x412   : > { %v3986_v31 = vpop.f32.mrf.mxu2 }
 0x413   : > { %v3987_v33 = vadd.f32 %v3986_v31, %v3938_v2  ;;  %v4035_v62 = vpop.f32.mrf.mxu3  ;;  %v3890_v0 = vpop.f32.mrf.mxu0  ;;  %v5819_v2 = vld [vmem:[%s11088_s1 + $0x2f0] sm:$0xf0] }
 0x414   : > { %v3939_v14 = vpop.f32.mrf.mxu1  ;;  %v5822_v39 = vor.u32 %v7106_v22, %v5819_v2  ;;  %v6539_v22 = vld [vmem:[%s11088_s1 + $0x890] sm:$0xf0] }
 0x415   : > { %v4036_v6 = vadd.f32 %v4035_v62, %v3987_v33  ;;  %v3940_v46 = vadd.f32 %v3939_v14, %v3890_v0  ;;  %v11291_v0 = vmax.f32 %v9450_v52, %v9737_v16  ;;  %v7382_v52 = vld [vmem:[%s11088_s1 + $0xb64] sm:$0xf]  ;;  %v6923_v2 = vld [vmem:[%s11088_s1 + $0xb90] sm:$0xf0] }
 0x416   : > { %4437 = vmatpush.bf16.msrb.mxu0 %v5822_v39  ;;  %v6926_v39 = vor.u32 %v7382_v52, %v6923_v2  ;;  %v6155_v52 = vld [vmem:[%s11088_s1 + $0x590] sm:$0xf0] }
 0x417   : > { %v10024_v11 = vmax.f32 %v11290_v23, %v4036_v6  ;;  %v11292_v6 = vld [vmem:[#allocation18_spill] sm:$0xff]  ;;  %v11293_v23 = vld [vmem:[#allocation19_spill] sm:$0xff] }
 0x418   : > { %4585 = vmatpush.bf16.msrb.mxu3 %v6926_v39 }
 0x41a   : > { %v3988_v7 = vpop.f32.mrf.mxu2 }
 0x41b   : > { %v3989_v15 = vadd.f32 %v3988_v7, %v3940_v46  ;;  %v4037_v17 = vpop.f32.mrf.mxu3  ;;  %v3893_v31 = vpop.f32.mrf.mxu0  ;;  %v7286_v46 = vld [vmem:[%s11088_s1 + $0x864] sm:$0xf] }
 0x41c   : > { %v3942_v34 = vpop.f32.mrf.mxu1  ;;  %v6542_v16 = vor.u32 %v7286_v46, %v6539_v22  ;;  %v7190_v46 = vld [vmem:[%s11088_s1 + $0x564] sm:$0xf] }
 0x41d   : > { %v4038_v33 = vadd.f32 %v4037_v17, %v3989_v15  ;;  %v3943_v62 = vadd.f32 %v3942_v34, %v3893_v31  ;;  %v11294_v34 = vmax.f32 %v9470_v55, %v9757_v59  ;;  %v6158_v55 = vor.u32 %v7190_v46, %v6155_v52  ;;  %v6875_v46 = vld [vmem:[%s11088_s1 + $0xb30] sm:$0xf0] }
 0x41e   : > { %4088 = vmatmul.bf16.gmra.mxu0 %v8013_v20  ;;  %4137 = vmatmul.bf16.gmra.mxu1 %v8015_v21 }
 0x41f   : > { %v10042_v14 = vmax.f32 %v11291_v0, %v4038_v33  ;;  %4186 = vmatmul.bf16.gmra.mxu2 %v11292_v6  ;;  %v7094_v0 = vld [vmem:[%s11088_s1 + $0x264] sm:$0xf]  ;;  %4487 = vmatpush.bf16.msrb.mxu1 %v6158_v55 }
 0x420   : > { %4235 = vmatmul.bf16.gmra.mxu3 %v11293_v23  ;;  %4536 = vmatpush.bf16.msrb.mxu2 %v6542_v16 }
 0x422   : > { %v3991_v27 = vpop.f32.mrf.mxu2 }
 0x423   : > { %v3992_v56 = vadd.f32 %v3991_v27, %v3943_v62  ;;  %v4040_v61 = vpop.f32.mrf.mxu3  ;;  %v3895_v7 = vpop.f32.mrf.mxu0  ;;  %v5771_v62 = vld [vmem:[%s11088_s1 + $0x290] sm:$0xf0] }
 0x424   : > { %v3944_v15 = vpop.f32.mrf.mxu1  ;;  %v5774_v22 = vor.u32 %v7094_v0, %v5771_v62  ;;  %v11298_v0 = vld [vmem:[#allocation4_spill] sm:$0xff] }
 0x425   : > { %v4041_v17 = vadd.f32 %v4040_v61, %v3992_v56  ;;  %v3945_v31 = vadd.f32 %v3944_v15, %v3895_v7  ;;  %v11295_v7 = vmax.f32 %v9488_v57, %v9773_v37  ;;  %v6491_v62 = vld [vmem:[%s11088_s1 + $0x830] sm:$0xf0]  ;;  %v7370_v57 = vld [vmem:[%s11088_s1 + $0xb04] sm:$0xf] }
 0x426   : > { %4438 = vmatpush.bf16.msrb.mxu0 %v5774_v22  ;;  %v6878_v52 = vor.u32 %v7370_v57, %v6875_v46  ;;  %v6107_v57 = vld [vmem:[%s11088_s1 + $0x530] sm:$0xf0] }
 0x427   : > { %v10062_v33 = vmax.f32 %v11294_v34, %v4041_v17  ;;  %v11296_v17 = vld [vmem:[#allocation2_spill] sm:$0xff]  ;;  %v11297_v34 = vld [vmem:[#allocation3_spill] sm:$0xff] }
 0x428   : > { %4586 = vmatpush.bf16.msrb.mxu3 %v6878_v52 }
 0x42a   : > { %v3993_v59 = vpop.f32.mrf.mxu2 }
 0x42b   : > { %v3994_v16 = vadd.f32 %v3993_v59, %v3945_v31  ;;  %v4042_v2 = vpop.f32.mrf.mxu3  ;;  %v4054_v27 = vpop.f32.mrf.mxu0  ;;  %v7274_v31 = vld [vmem:[%s11088_s1 + $0x804] sm:$0xf] }
 0x42c   : > { %v4103_v39 = vpop.f32.mrf.mxu1  ;;  %v6494_v37 = vor.u32 %v7274_v31, %v6491_v62  ;;  %v5723_v31 = vld [vmem:[%s11088_s1 + $0x230] sm:$0xf0] }
 0x42d   : > { %v4043_v56 = vadd.f32 %v4042_v2, %v3994_v16  ;;  %v4104_v61 = vadd.f32 %v4103_v39, %v4054_v27 }
 0x42e   : > { %4249 = vmatmul.bf16.vlgmr.msra.gmra.mxu0 %v7682_v48  ;;  %4298 = vmatmul.bf16.vlgmr.msra.gmra.mxu1 %v11296_v17 }
 0x42f   : > { %v10080_v15 = vmax.f32 %v11295_v7, %v4043_v56  ;;  %4347 = vmatmul.bf16.vlgmr.msra.gmra.mxu2 %v11297_v34  ;;  %v7082_v7 = vld [vmem:[%s11088_s1 + $0x204] sm:$0xf] }
 0x430   : > { %4396 = vmatmul.bf16.vlgmr.msra.gmra.mxu3 %v11298_v0  ;;  %4537 = vmatpush.bf16.msrb.mxu2 %v6494_v37  ;;  %v5726_v62 = vor.u32 %v7082_v7, %v5723_v31  ;;  %v6443_v31 = vld [vmem:[%s11088_s1 + $0x7d0] sm:$0xf0] }
 0x432   : > { %v4152_v22 = vpop.f32.mrf.mxu2  ;;  %4439 = vmatpush.bf16.msrb.mxu0 %v5726_v62 }
 0x433   : > { %v4153_v55 = vadd.f32 %v4152_v22, %v4104_v61  ;;  %v4201_v59 = vpop.f32.mrf.mxu3  ;;  %v4056_v16 = vpop.f32.mrf.mxu0  ;;  %v7178_v61 = vld [vmem:[%s11088_s1 + $0x504] sm:$0xf] }
 0x434   : > { %v4105_v2 = vpop.f32.mrf.mxu1  ;;  %v6110_v37 = vor.u32 %v7178_v61, %v6107_v57  ;;  %v7358_v61 = vld [vmem:[%s11088_s1 + $0xaa4] sm:$0xf]  ;;  %v6827_v57 = vld [vmem:[%s11088_s1 + $0xad0] sm:$0xf0] }
 0x435   : > { %v10097_v27 = vadd.f32 %v4201_v59, %v4153_v55  ;;  %v4106_v39 = vadd.f32 %v4105_v2, %v4056_v16 }
 0x436   : > { %4488 = vmatpush.bf16.msrb.mxu1 %v6110_v37 }
 0x43a   : > { %v4154_v46 = vpop.f32.mrf.mxu2 }
 0x43b   : > { %v4155_v22 = vadd.f32 %v4154_v46, %v4106_v39  ;;  %v4203_v52 = vpop.f32.mrf.mxu3  ;;  %v4059_v55 = vpop.f32.mrf.mxu0  ;;  %v7262_v39 = vld [vmem:[%s11088_s1 + $0x7a4] sm:$0xf]  ;;  %v6830_v46 = vor.u32 %v7358_v61, %v6827_v57 }
 0x43c   : > { %v4108_v59 = vpop.f32.mrf.mxu1  ;;  %v6446_v62 = vor.u32 %v7262_v39, %v6443_v31  ;;  %v7070_v39 = vld [vmem:[%s11088_s1 + $0x1a4] sm:$0xf]  ;;  %v5675_v31 = vld [vmem:[%s11088_s1 + $0x1d0] sm:$0xf0] }
 0x43d   : > { %v10113_v16 = vadd.f32 %v4203_v52, %v4155_v22  ;;  %v4109_v2 = vadd.f32 %v4108_v59, %v4059_v55  ;;  %4587 = vmatpush.bf16.msrb.mxu3 %v6830_v46  ;;  %v5678_v61 = vor.u32 %v7070_v39, %v5675_v31  ;;  %v6395_v31 = vld [vmem:[%s11088_s1 + $0x770] sm:$0xf0] }
 0x43e   : > { %4254 = vmatmul.bf16.gmra.mxu0 %v7749_v24  ;;  %4303 = vmatmul.bf16.gmra.mxu1 %v7751_v25 }
 0x43f   : > { %4352 = vmatmul.bf16.gmra.mxu2 %v7753_v26  ;;  %4440 = vmatpush.bf16.msrb.mxu0 %v5678_v61 }
 0x440   : > { %4401 = vmatmul.bf16.gmra.mxu3 %v11269_v19  ;;  %4538 = vmatpush.bf16.msrb.mxu2 %v6446_v62  ;;  %v6059_v62 = vld [vmem:[%s11088_s1 + $0x4d0] sm:$0xf0] }
 0x442   : > { %v4157_v37 = vpop.f32.mrf.mxu2 }
 0x443   : > { %v4158_v22 = vadd.f32 %v4157_v37, %v4109_v2  ;;  %v4206_v52 = vpop.f32.mrf.mxu3  ;;  %v4061_v55 = vpop.f32.mrf.mxu0  ;;  %v7166_v2 = vld [vmem:[%s11088_s1 + $0x4a4] sm:$0xf] }
 0x444   : > { %v4110_v59 = vpop.f32.mrf.mxu1  ;;  %v6062_v57 = vor.u32 %v7166_v2, %v6059_v62  ;;  %v7346_v2 = vld [vmem:[%s11088_s1 + $0xa44] sm:$0xf]  ;;  %v6779_v62 = vld [vmem:[%s11088_s1 + $0xa70] sm:$0xf0] }
 0x445   : > { %v10133_v7 = vadd.f32 %v4206_v52, %v4158_v22  ;;  %v4111_v56 = vadd.f32 %v4110_v59, %v4061_v55 }
 0x446   : > { %4489 = vmatpush.bf16.msrb.mxu1 %v6062_v57 }
 0x44a   : > { %v4159_v37 = vpop.f32.mrf.mxu2 }
 0x44b   : > { %v4160_v46 = vadd.f32 %v4159_v37, %v4111_v56  ;;  %v4208_v22 = vpop.f32.mrf.mxu3  ;;  %v4064_v52 = vpop.f32.mrf.mxu0  ;;  %v7250_v56 = vld [vmem:[%s11088_s1 + $0x744] sm:$0xf]  ;;  %v6782_v37 = vor.u32 %v7346_v2, %v6779_v62 }
 0x44c   : > { %v4113_v55 = vpop.f32.mrf.mxu1  ;;  %v6398_v61 = vor.u32 %v7250_v56, %v6395_v31  ;;  %v7058_v56 = vld [vmem:[%s11088_s1 + $0x144] sm:$0xf]  ;;  %v5627_v31 = vld [vmem:[%s11088_s1 + $0x170] sm:$0xf0] }
 0x44d   : > { %v10149_v59 = vadd.f32 %v4208_v22, %v4160_v46  ;;  %v4114_v19 = vadd.f32 %v4113_v55, %v4064_v52  ;;  %4588 = vmatpush.bf16.msrb.mxu3 %v6782_v37  ;;  %v5630_v2 = vor.u32 %v7058_v56, %v5627_v31  ;;  %v6347_v31 = vld [vmem:[%s11088_s1 + $0x710] sm:$0xf0] }
 0x44e   : > { %4259 = vmatmul.bf16.gmra.mxu0 %v7793_v49  ;;  %4308 = vmatmul.bf16.gmra.mxu1 %v7795_v50 }
 0x44f   : > { %4357 = vmatmul.bf16.gmra.mxu2 %v11272_v3  ;;  %4441 = vmatpush.bf16.msrb.mxu0 %v5630_v2 }
 0x450   : > { %4406 = vmatmul.bf16.gmra.mxu3 %v11273_v60  ;;  %4539 = vmatpush.bf16.msrb.mxu2 %v6398_v61  ;;  %v6011_v61 = vld [vmem:[%s11088_s1 + $0x470] sm:$0xf0] }
 0x452   : > { %v4162_v57 = vpop.f32.mrf.mxu2 }
 0x453   : > { %v4163_v46 = vadd.f32 %v4162_v57, %v4114_v19  ;;  %v4211_v22 = vpop.f32.mrf.mxu3  ;;  %v4066_v52 = vpop.f32.mrf.mxu0  ;;  %v7154_v19 = vld [vmem:[%s11088_s1 + $0x444] sm:$0xf] }
 0x454   : > { %v4115_v55 = vpop.f32.mrf.mxu1  ;;  %v6014_v62 = vor.u32 %v7154_v19, %v6011_v61  ;;  %v7334_v19 = vld [vmem:[%s11088_s1 + $0x9e4] sm:$0xf]  ;;  %v6731_v61 = vld [vmem:[%s11088_s1 + $0xa10] sm:$0xf0] }
 0x455   : > { %v10169_v39 = vadd.f32 %v4211_v22, %v4163_v46  ;;  %v4116_v60 = vadd.f32 %v4115_v55, %v4066_v52 }
 0x456   : > { %4490 = vmatpush.bf16.msrb.mxu1 %v6014_v62 }
 0x45a   : > { %v4164_v57 = vpop.f32.mrf.mxu2 }
 0x45b   : > { %v4165_v37 = vadd.f32 %v4164_v57, %v4116_v60  ;;  %v4213_v46 = vpop.f32.mrf.mxu3  ;;  %v4069_v22 = vpop.f32.mrf.mxu0  ;;  %v7238_v60 = vld [vmem:[%s11088_s1 + $0x6e4] sm:$0xf]  ;;  %v6734_v57 = vor.u32 %v7334_v19, %v6731_v61 }
 0x45c   : > { %v4118_v52 = vpop.f32.mrf.mxu1  ;;  %v6350_v2 = vor.u32 %v7238_v60, %v6347_v31  ;;  %v7046_v60 = vld [vmem:[%s11088_s1 + $0xe4] sm:$0xf]  ;;  %v5579_v31 = vld [vmem:[%s11088_s1 + $0x110] sm:$0xf0] }
 0x45d   : > { %v10185_v55 = vadd.f32 %v4213_v46, %v4165_v37  ;;  %v4119_v3 = vadd.f32 %v4118_v52, %v4069_v22  ;;  %4589 = vmatpush.bf16.msrb.mxu3 %v6734_v57  ;;  %v5582_v19 = vor.u32 %v7046_v60, %v5579_v31  ;;  %v6299_v31 = vld [vmem:[%s11088_s1 + $0x6b0] sm:$0xf0] }
 0x45e   : > { %4264 = vmatmul.bf16.gmra.mxu0 %v7837_v12  ;;  %4313 = vmatmul.bf16.gmra.mxu1 %v7839_v13 }
 0x45f   : > { %4362 = vmatmul.bf16.gmra.mxu2 %v11276_v10  ;;  %4442 = vmatpush.bf16.msrb.mxu0 %v5582_v19 }
 0x460   : > { %4411 = vmatmul.bf16.gmra.mxu3 %v11277_v51  ;;  %4540 = vmatpush.bf16.msrb.mxu2 %v6350_v2  ;;  %v5963_v2 = vld [vmem:[%s11088_s1 + $0x410] sm:$0xf0] }
 0x462   : > { %v4167_v62 = vpop.f32.mrf.mxu2 }
 0x463   : > { %v4168_v37 = vadd.f32 %v4167_v62, %v4119_v3  ;;  %v4216_v46 = vpop.f32.mrf.mxu3  ;;  %v4071_v22 = vpop.f32.mrf.mxu0  ;;  %v7142_v3 = vld [vmem:[%s11088_s1 + $0x3e4] sm:$0xf] }
 0x464   : > { %v4120_v52 = vpop.f32.mrf.mxu1  ;;  %v5966_v61 = vor.u32 %v7142_v3, %v5963_v2  ;;  %v7322_v3 = vld [vmem:[%s11088_s1 + $0x984] sm:$0xf]  ;;  %v6683_v2 = vld [vmem:[%s11088_s1 + $0x9b0] sm:$0xf0] }
 0x465   : > { %v10205_v56 = vadd.f32 %v4216_v46, %v4168_v37  ;;  %v4121_v51 = vadd.f32 %v4120_v52, %v4071_v22 }
 0x466   : > { %4491 = vmatpush.bf16.msrb.mxu1 %v5966_v61 }
 0x46a   : > { %v4169_v62 = vpop.f32.mrf.mxu2 }
 0x46b   : > { %v4170_v57 = vadd.f32 %v4169_v62, %v4121_v51  ;;  %v4218_v37 = vpop.f32.mrf.mxu3  ;;  %v4074_v46 = vpop.f32.mrf.mxu0  ;;  %v7226_v51 = vld [vmem:[%s11088_s1 + $0x684] sm:$0xf]  ;;  %v6686_v62 = vor.u32 %v7322_v3, %v6683_v2 }
 0x46c   : > { %v4123_v22 = vpop.f32.mrf.mxu1  ;;  %v6302_v19 = vor.u32 %v7226_v51, %v6299_v31  ;;  %v7034_v51 = vld [vmem:[%s11088_s1 + $0x84] sm:$0xf]  ;;  %v5531_v31 = vld [vmem:[%s11088_s1 + $0xb0] sm:$0xf0] }
 0x46d   : > { %v10221_v52 = vadd.f32 %v4218_v37, %v4170_v57  ;;  %v4124_v10 = vadd.f32 %v4123_v22, %v4074_v46  ;;  %4590 = vmatpush.bf16.msrb.mxu3 %v6686_v62  ;;  %v5534_v3 = vor.u32 %v7034_v51, %v5531_v31  ;;  %v6251_v31 = vld [vmem:[%s11088_s1 + $0x650] sm:$0xf0] }
 0x46e   : > { %4269 = vmatmul.bf16.gmra.mxu0 %v7881_v40  ;;  %4318 = vmatmul.bf16.gmra.mxu1 %v7883_v41 }
 0x46f   : > { %4367 = vmatmul.bf16.gmra.mxu2 %v11280_v63  ;;  %4443 = vmatpush.bf16.msrb.mxu0 %v5534_v3 }
 0x470   : > { %4416 = vmatmul.bf16.gmra.mxu3 %v11281_v43  ;;  %4541 = vmatpush.bf16.msrb.mxu2 %v6302_v19  ;;  %v5915_v19 = vld [vmem:[%s11088_s1 + $0x3b0] sm:$0xf0] }
 0x472   : > { %v4172_v61 = vpop.f32.mrf.mxu2 }
 0x473   : > { %v4173_v57 = vadd.f32 %v4172_v61, %v4124_v10  ;;  %v4221_v37 = vpop.f32.mrf.mxu3  ;;  %v4076_v46 = vpop.f32.mrf.mxu0  ;;  %v7130_v10 = vld [vmem:[%s11088_s1 + $0x384] sm:$0xf] }
 0x474   : > { %v4125_v22 = vpop.f32.mrf.mxu1  ;;  %v5918_v2 = vor.u32 %v7130_v10, %v5915_v19  ;;  %v7310_v10 = vld [vmem:[%s11088_s1 + $0x924] sm:$0xf]  ;;  %v6635_v19 = vld [vmem:[%s11088_s1 + $0x950] sm:$0xf0] }
 0x475   : > { %v10241_v60 = vadd.f32 %v4221_v37, %v4173_v57  ;;  %v4126_v43 = vadd.f32 %v4125_v22, %v4076_v46 }
 0x476   : > { %4492 = vmatpush.bf16.msrb.mxu1 %v5918_v2 }
 0x47a   : > { %v4174_v61 = vpop.f32.mrf.mxu2 }
 0x47b   : > { %v4175_v62 = vadd.f32 %v4174_v61, %v4126_v43  ;;  %v4223_v57 = vpop.f32.mrf.mxu3  ;;  %v4079_v37 = vpop.f32.mrf.mxu0  ;;  %v7214_v43 = vld [vmem:[%s11088_s1 + $0x624] sm:$0xf]  ;;  %v6638_v61 = vor.u32 %v7310_v10, %v6635_v19 }
 0x47c   : > { %v4128_v46 = vpop.f32.mrf.mxu1  ;;  %v6254_v3 = vor.u32 %v7214_v43, %v6251_v31  ;;  %v7022_v43 = vld [vmem:[%s11088_s1 + $0x24] sm:$0xf]  ;;  %v5483_v31 = vld [vmem:[%s11088_s1 + $0x50] sm:$0xf0] }
 0x47d   : > { %v10257_v22 = vadd.f32 %v4223_v57, %v4175_v62  ;;  %v4129_v63 = vadd.f32 %v4128_v46, %v4079_v37  ;;  %4591 = vmatpush.bf16.msrb.mxu3 %v6638_v61  ;;  %v5486_v10 = vor.u32 %v7022_v43, %v5483_v31  ;;  %v7305_v31 = vld [vmem:[%s11088_s1 + $0x8f4] sm:$0xf0] }
 0x47e   : > { %4274 = vmatmul.bf16.gmra.mxu0 %v7925_v8  ;;  %4323 = vmatmul.bf16.gmra.mxu1 %v7927_v9 }
 0x47f   : > { %4372 = vmatmul.bf16.gmra.mxu2 %v11284_v58  ;;  %4444 = vmatpush.bf16.msrb.mxu0 %v5486_v10 }
 0x480   : > { %4421 = vmatmul.bf16.gmra.mxu3 %v11285_v30  ;;  %4542 = vmatpush.bf16.msrb.mxu2 %v6254_v3  ;;  %v5867_v3 = vld [vmem:[%s11088_s1 + $0x350] sm:$0xf0] }
 0x482   : > { %v4177_v2 = vpop.f32.mrf.mxu2 }
 0x483   : > { %v4178_v62 = vadd.f32 %v4177_v2, %v4129_v63  ;;  %v4226_v57 = vpop.f32.mrf.mxu3  ;;  %v4081_v37 = vpop.f32.mrf.mxu0  ;;  %v7118_v63 = vld [vmem:[%s11088_s1 + $0x324] sm:$0xf] }
 0x484   : > { %v4130_v46 = vpop.f32.mrf.mxu1  ;;  %v5870_v19 = vor.u32 %v7118_v63, %v5867_v3  ;;  %v6977_v63 = vld [vmem:[%s11088_s1 + $0xbc8] sm:$0xf]  ;;  %v7401_v3 = vld [vmem:[%s11088_s1 + $0xbf4] sm:$0xf0] }
 0x485   : > { %v10277_v51 = vadd.f32 %v4226_v57, %v4178_v62  ;;  %v4131_v30 = vadd.f32 %v4130_v46, %v4081_v37 }
 0x486   : > { %4493 = vmatpush.bf16.msrb.mxu1 %v5870_v19 }
 0x48a   : > { %v4179_v2 = vpop.f32.mrf.mxu2 }
 0x48b   : > { %v4180_v61 = vadd.f32 %v4179_v2, %v4131_v30  ;;  %v4228_v62 = vpop.f32.mrf.mxu3  ;;  %v4084_v57 = vpop.f32.mrf.mxu0  ;;  %v6593_v30 = vld [vmem:[%s11088_s1 + $0x8c8] sm:$0xf]  ;;  %v6978_v2 = vor.u32 %v7401_v3, %v6977_v63 }
 0x48c   : > { %v4133_v37 = vpop.f32.mrf.mxu1  ;;  %v6594_v10 = vor.u32 %v7305_v31, %v6593_v30  ;;  %v5825_v30 = vld [vmem:[%s11088_s1 + $0x2c8] sm:$0xf]  ;;  %v7113_v31 = vld [vmem:[%s11088_s1 + $0x2f4] sm:$0xf0] }
 0x48d   : > { %v10293_v46 = vadd.f32 %v4228_v62, %v4180_v61  ;;  %v4134_v58 = vadd.f32 %v4133_v37, %v4084_v57  ;;  %4780 = vmatpush.bf16.msra.mxu3 %v6978_v2  ;;  %v5826_v63 = vor.u32 %v7113_v31, %v5825_v30  ;;  %v7293_v31 = vld [vmem:[%s11088_s1 + $0x894] sm:$0xf0] }
 0x48e   : > { %4279 = vmatmul.bf16.gmra.mxu0 %v7969_v44  ;;  %4328 = vmatmul.bf16.gmra.mxu1 %v7971_v45 }
 0x48f   : > { %4377 = vmatmul.bf16.gmra.mxu2 %v11288_v47  ;;  %4633 = vmatpush.bf16.msra.mxu0 %v5826_v63 }
 0x490   : > { %4426 = vmatmul.bf16.gmra.mxu3 %v11289_v4  ;;  %4731 = vmatpush.bf16.msra.mxu2 %v6594_v10  ;;  %v7209_v10 = vld [vmem:[%s11088_s1 + $0x5f4] sm:$0xf0] }
 0x492   : > { %v4182_v19 = vpop.f32.mrf.mxu2 }
 0x493   : > { %v4183_v61 = vadd.f32 %v4182_v19, %v4134_v58  ;;  %v4231_v62 = vpop.f32.mrf.mxu3  ;;  %v4086_v57 = vpop.f32.mrf.mxu0  ;;  %v6209_v58 = vld [vmem:[%s11088_s1 + $0x5c8] sm:$0xf] }
 0x494   : > { %v4135_v37 = vpop.f32.mrf.mxu1  ;;  %v6210_v3 = vor.u32 %v7209_v10, %v6209_v58  ;;  %v6929_v58 = vld [vmem:[%s11088_s1 + $0xb68] sm:$0xf]  ;;  %v7389_v10 = vld [vmem:[%s11088_s1 + $0xb94] sm:$0xf0] }
 0x495   : > { %v10313_v43 = vadd.f32 %v4231_v62, %v4183_v61  ;;  %v4136_v4 = vadd.f32 %v4135_v37, %v4086_v57 }
 0x496   : > { %4682 = vmatpush.bf16.msra.mxu1 %v6210_v3 }
 0x49a   : > { %v4184_v19 = vpop.f32.mrf.mxu2 }
 0x49b   : > { %v4185_v2 = vadd.f32 %v4184_v19, %v4136_v4  ;;  %v4233_v61 = vpop.f32.mrf.mxu3  ;;  %v4089_v62 = vpop.f32.mrf.mxu0  ;;  %v6545_v4 = vld [vmem:[%s11088_s1 + $0x868] sm:$0xf]  ;;  %v6930_v19 = vor.u32 %v7389_v10, %v6929_v58 }
 0x49c   : > { %v4138_v57 = vpop.f32.mrf.mxu1  ;;  %v6546_v63 = vor.u32 %v7293_v31, %v6545_v4  ;;  %v5777_v4 = vld [vmem:[%s11088_s1 + $0x268] sm:$0xf]  ;;  %v7101_v31 = vld [vmem:[%s11088_s1 + $0x294] sm:$0xf0] }
 0x49d   : > { %v10329_v37 = vadd.f32 %v4233_v61, %v4185_v2  ;;  %v4139_v47 = vadd.f32 %v4138_v57, %v4089_v62  ;;  %4781 = vmatpush.bf16.msra.mxu3 %v6930_v19  ;;  %v5778_v58 = vor.u32 %v7101_v31, %v5777_v4  ;;  %v7281_v31 = vld [vmem:[%s11088_s1 + $0x834] sm:$0xf0] }
 0x49e   : > { %4284 = vmatmul.bf16.gmra.mxu0 %v8013_v20  ;;  %4333 = vmatmul.bf16.gmra.mxu1 %v8015_v21 }
 0x49f   : > { %4382 = vmatmul.bf16.gmra.mxu2 %v11292_v6  ;;  %4634 = vmatpush.bf16.msra.mxu0 %v5778_v58 }
 0x4a0   : > { %4431 = vmatmul.bf16.gmra.mxu3 %v11293_v23  ;;  %4732 = vmatpush.bf16.msra.mxu2 %v6546_v63  ;;  %v7197_v63 = vld [vmem:[%s11088_s1 + $0x594] sm:$0xf0] }
 0x4a2   : > { %v4187_v3 = vpop.f32.mrf.mxu2 }
 0x4a3   : > { %v4188_v2 = vadd.f32 %v4187_v3, %v4139_v47  ;;  %v4236_v61 = vpop.f32.mrf.mxu3  ;;  %v4091_v62 = vpop.f32.mrf.mxu0  ;;  %v6161_v47 = vld [vmem:[%s11088_s1 + $0x568] sm:$0xf] }
 0x4a4   : > { %v4140_v57 = vpop.f32.mrf.mxu1  ;;  %v6162_v10 = vor.u32 %v7197_v63, %v6161_v47  ;;  %v6881_v47 = vld [vmem:[%s11088_s1 + $0xb08] sm:$0xf]  ;;  %v7377_v63 = vld [vmem:[%s11088_s1 + $0xb34] sm:$0xf0] }
 0x4a5   : > { %v10349_v30 = vadd.f32 %v4236_v61, %v4188_v2  ;;  %v4141_v23 = vadd.f32 %v4140_v57, %v4091_v62 }
 0x4a6   : > { %4683 = vmatpush.bf16.msra.mxu1 %v6162_v10 }
 0x4aa   : > { %v4189_v3 = vpop.f32.mrf.mxu2 }
 0x4ab   : > { %v4190_v19 = vadd.f32 %v4189_v3, %v4141_v23  ;;  %v4238_v2 = vpop.f32.mrf.mxu3  ;;  %v4250_v61 = vpop.f32.mrf.mxu0  ;;  %v6497_v23 = vld [vmem:[%s11088_s1 + $0x808] sm:$0xf]  ;;  %v6882_v3 = vor.u32 %v7377_v63, %v6881_v47 }
 0x4ac   : > { %v4299_v62 = vpop.f32.mrf.mxu1  ;;  %v6498_v58 = vor.u32 %v7281_v31, %v6497_v23  ;;  %v5729_v23 = vld [vmem:[%s11088_s1 + $0x208] sm:$0xf] }
 0x4ad   : > { %v10365_v57 = vadd.f32 %v4238_v2, %v4190_v19  ;;  %v4300_v6 = vadd.f32 %v4299_v62, %v4250_v61  ;;  %4782 = vmatpush.bf16.msra.mxu3 %v6882_v3  ;;  %v6113_v31 = vld [vmem:[%s11088_s1 + $0x508] sm:$0xf] }
 0x4ae   : > { %4445 = vmatmul.bf16.vlgmr.msrb.gmra.mxu0 %v7682_v48  ;;  %4494 = vmatmul.bf16.vlgmr.msrb.gmra.mxu1 %v11296_v17 }
 0x4af   : > { %4543 = vmatmul.bf16.vlgmr.msrb.gmra.mxu2 %v11297_v34  ;;  %v11299_v34 = vmax.f32 %v9796_v35, %v10097_v27 }
 0x4b0   : > { %4592 = vmatmul.bf16.vlgmr.msrb.gmra.mxu3 %v11298_v0  ;;  %4733 = vmatpush.bf16.msra.mxu2 %v6498_v58  ;;  %v7185_v58 = vld [vmem:[%s11088_s1 + $0x534] sm:$0xf0] }
 0x4b1   : > { %v6114_v35 = vor.u32 %v7185_v58, %v6113_v31 }
 0x4b2   : > { %v4348_v10 = vpop.f32.mrf.mxu2 }
 0x4b3   : > { %v4349_v19 = vadd.f32 %v4348_v10, %v4300_v6  ;;  %v4397_v2 = vpop.f32.mrf.mxu3  ;;  %v4252_v61 = vpop.f32.mrf.mxu0  ;;  %v7089_v6 = vld [vmem:[%s11088_s1 + $0x234] sm:$0xf0]  ;;  %4684 = vmatpush.bf16.msra.mxu1 %v6114_v35 }
 0x4b4   : > { %v4301_v62 = vpop.f32.mrf.mxu1  ;;  %v5730_v47 = vor.u32 %v7089_v6, %v5729_v23  ;;  %v7269_v23 = vld [vmem:[%s11088_s1 + $0x7d4] sm:$0xf0] }
 0x4b5   : > { %v4398_v4 = vadd.f32 %v4397_v2, %v4349_v19  ;;  %v4302_v0 = vadd.f32 %v4301_v62, %v4252_v61  ;;  %v11300_v2 = vmax.f32 %v9814_v18, %v10113_v16  ;;  %v11301_v62 = vld [vmem:[#allocation5_spill] sm:$0xff]  ;;  %v6833_v18 = vld [vmem:[%s11088_s1 + $0xaa8] sm:$0xf] }
 0x4b6   : > { %4635 = vmatpush.bf16.msra.mxu0 %v5730_v47  ;;  %v7365_v6 = vld [vmem:[%s11088_s1 + $0xad4] sm:$0xf0] }
 0x4b7   : > { %v10388_v17 = vmax.f32 %v11299_v34, %v4398_v4  ;;  %v6834_v47 = vor.u32 %v7365_v6, %v6833_v18  ;;  %v7173_v18 = vld [vmem:[%s11088_s1 + $0x4d4] sm:$0xf0] }
 0x4b9   : > { %4783 = vmatpush.bf16.msra.mxu3 %v6834_v47 }
 0x4ba   : > { %v4350_v34 = vpop.f32.mrf.mxu2 }
 0x4bb   : > { %v4351_v27 = vadd.f32 %v4350_v34, %v4302_v0  ;;  %v4399_v4 = vpop.f32.mrf.mxu3  ;;  %v4255_v63 = vpop.f32.mrf.mxu0  ;;  %v6449_v0 = vld [vmem:[%s11088_s1 + $0x7a8] sm:$0xf] }
 0x4bc   : > { %v4304_v10 = vpop.f32.mrf.mxu1  ;;  %v6450_v16 = vor.u32 %v7269_v23, %v6449_v0  ;;  %v6065_v0 = vld [vmem:[%s11088_s1 + $0x4a8] sm:$0xf] }
 0x4bd   : > { %v4400_v3 = vadd.f32 %v4399_v4, %v4351_v27  ;;  %v4305_v19 = vadd.f32 %v4304_v10, %v4255_v63  ;;  %v11302_v10 = vmax.f32 %v9834_v54, %v10133_v7  ;;  %v6066_v54 = vor.u32 %v7173_v18, %v6065_v0 }
 0x4be   : > { %4450 = vmatmul.bf16.gmra.mxu0 %v7749_v24  ;;  %4499 = vmatmul.bf16.gmra.mxu1 %v7751_v25 }
 0x4bf   : > { %v10406_v61 = vmax.f32 %v11300_v2, %v4400_v3  ;;  %4548 = vmatmul.bf16.gmra.mxu2 %v7753_v26  ;;  %v5681_v2 = vld [vmem:[%s11088_s1 + $0x1a8] sm:$0xf]  ;;  %4685 = vmatpush.bf16.msra.mxu1 %v6066_v54 }
 0x4c0   : > { %4597 = vmatmul.bf16.gmra.mxu3 %v11301_v62  ;;  %4734 = vmatpush.bf16.msra.mxu2 %v6450_v16 }
 0x4c2   : > { %v4353_v31 = vpop.f32.mrf.mxu2 }
 0x4c3   : > { %v4354_v58 = vadd.f32 %v4353_v31, %v4305_v19  ;;  %v4402_v35 = vpop.f32.mrf.mxu3  ;;  %v4257_v34 = vpop.f32.mrf.mxu0  ;;  %v7077_v19 = vld [vmem:[%s11088_s1 + $0x1d4] sm:$0xf0] }
 0x4c4   : > { %v4306_v27 = vpop.f32.mrf.mxu1  ;;  %v5682_v23 = vor.u32 %v7077_v19, %v5681_v2  ;;  %v7257_v2 = vld [vmem:[%s11088_s1 + $0x774] sm:$0xf0] }
 0x4c5   : > { %v4403_v4 = vadd.f32 %v4402_v35, %v4354_v58  ;;  %v4307_v63 = vadd.f32 %v4306_v27, %v4257_v34  ;;  %v11303_v34 = vmax.f32 %v9852_v42, %v10149_v59  ;;  %v6785_v42 = vld [vmem:[%s11088_s1 + $0xa48] sm:$0xf]  ;;  %v7353_v19 = vld [vmem:[%s11088_s1 + $0xa74] sm:$0xf0] }
 0x4c6   : > { %4636 = vmatpush.bf16.msra.mxu0 %v5682_v23  ;;  %v6786_v23 = vor.u32 %v7353_v19, %v6785_v42  ;;  %v7161_v42 = vld [vmem:[%s11088_s1 + $0x474] sm:$0xf0] }
 0x4c7   : > { %v10426_v3 = vmax.f32 %v11302_v10, %v4403_v4  ;;  %v11304_v4 = vld [vmem:[#allocation6_spill] sm:$0xff]  ;;  %v11305_v10 = vld [vmem:[#allocation7_spill] sm:$0xff] }
 0x4c8   : > { %4784 = vmatpush.bf16.msra.mxu3 %v6786_v23 }
 0x4ca   : > { %v4355_v7 = vpop.f32.mrf.mxu2 }
 0x4cb   : > { %v4356_v16 = vadd.f32 %v4355_v7, %v4307_v63  ;;  %v4404_v6 = vpop.f32.mrf.mxu3  ;;  %v4260_v31 = vpop.f32.mrf.mxu0  ;;  %v6401_v63 = vld [vmem:[%s11088_s1 + $0x748] sm:$0xf] }
 0x4cc   : > { %v4309_v47 = vpop.f32.mrf.mxu1  ;;  %v6402_v59 = vor.u32 %v7257_v2, %v6401_v63  ;;  %v6017_v63 = vld [vmem:[%s11088_s1 + $0x448] sm:$0xf] }
 0x4cd   : > { %v4405_v58 = vadd.f32 %v4404_v6, %v4356_v16  ;;  %v4310_v35 = vadd.f32 %v4309_v47, %v4260_v31  ;;  %v11306_v47 = vmax.f32 %v9872_v53, %v10169_v39  ;;  %v6018_v53 = vor.u32 %v7161_v42, %v6017_v63 }
 0x4ce   : > { %4455 = vmatmul.bf16.gmra.mxu0 %v7793_v49  ;;  %4504 = vmatmul.bf16.gmra.mxu1 %v7795_v50 }
 0x4cf   : > { %v10444_v27 = vmax.f32 %v11303_v34, %v4405_v58  ;;  %4553 = vmatmul.bf16.gmra.mxu2 %v11304_v4  ;;  %v5633_v34 = vld [vmem:[%s11088_s1 + $0x148] sm:$0xf]  ;;  %4686 = vmatpush.bf16.msra.mxu1 %v6018_v53 }
 0x4d0   : > { %4602 = vmatmul.bf16.gmra.mxu3 %v11305_v10  ;;  %4735 = vmatpush.bf16.msra.mxu2 %v6402_v59 }
 0x4d2   : > { %v4358_v0 = vpop.f32.mrf.mxu2 }
 0x4d3   : > { %v4359_v18 = vadd.f32 %v4358_v0, %v4310_v35  ;;  %v4407_v54 = vpop.f32.mrf.mxu3  ;;  %v4262_v7 = vpop.f32.mrf.mxu0  ;;  %v7065_v35 = vld [vmem:[%s11088_s1 + $0x174] sm:$0xf0] }
 0x4d4   : > { %v4311_v16 = vpop.f32.mrf.mxu1  ;;  %v5634_v2 = vor.u32 %v7065_v35, %v5633_v34  ;;  %v7245_v34 = vld [vmem:[%s11088_s1 + $0x714] sm:$0xf0] }
 0x4d5   : > { %v4408_v6 = vadd.f32 %v4407_v54, %v4359_v18  ;;  %v4312_v31 = vadd.f32 %v4311_v16, %v4262_v7  ;;  %v11307_v7 = vmax.f32 %v9890_v32, %v10185_v55  ;;  %v6737_v32 = vld [vmem:[%s11088_s1 + $0x9e8] sm:$0xf]  ;;  %v7341_v35 = vld [vmem:[%s11088_s1 + $0xa14] sm:$0xf0] }
 0x4d6   : > { %4637 = vmatpush.bf16.msra.mxu0 %v5634_v2  ;;  %v6738_v2 = vor.u32 %v7341_v35, %v6737_v32  ;;  %v7149_v32 = vld [vmem:[%s11088_s1 + $0x414] sm:$0xf0] }
 0x4d7   : > { %v10464_v58 = vmax.f32 %v11306_v47, %v4408_v6  ;;  %v11308_v6 = vld [vmem:[#allocation8_spill] sm:$0xff]  ;;  %v11309_v47 = vld [vmem:[#allocation9_spill] sm:$0xff] }
 0x4d8   : > { %4785 = vmatpush.bf16.msra.mxu3 %v6738_v2 }
 0x4da   : > { %v4360_v39 = vpop.f32.mrf.mxu2 }
 0x4db   : > { %v4361_v59 = vadd.f32 %v4360_v39, %v4312_v31  ;;  %v4409_v19 = vpop.f32.mrf.mxu3  ;;  %v4265_v0 = vpop.f32.mrf.mxu0  ;;  %v6353_v31 = vld [vmem:[%s11088_s1 + $0x6e8] sm:$0xf] }
 0x4dc   : > { %v4314_v23 = vpop.f32.mrf.mxu1  ;;  %v6354_v55 = vor.u32 %v7245_v34, %v6353_v31  ;;  %v5969_v31 = vld [vmem:[%s11088_s1 + $0x3e8] sm:$0xf] }
 0x4dd   : > { %v4410_v18 = vadd.f32 %v4409_v19, %v4361_v59  ;;  %v4315_v54 = vadd.f32 %v4314_v23, %v4265_v0  ;;  %v11310_v23 = vmax.f32 %v9910_v5, %v10205_v56  ;;  %v5970_v5 = vor.u32 %v7149_v32, %v5969_v31 }
 0x4de   : > { %4460 = vmatmul.bf16.gmra.mxu0 %v7837_v12  ;;  %4509 = vmatmul.bf16.gmra.mxu1 %v7839_v13 }
 0x4df   : > { %v10482_v16 = vmax.f32 %v11307_v7, %v4410_v18  ;;  %4558 = vmatmul.bf16.gmra.mxu2 %v11308_v6  ;;  %v5585_v7 = vld [vmem:[%s11088_s1 + $0xe8] sm:$0xf]  ;;  %4687 = vmatpush.bf16.msra.mxu1 %v5970_v5 }
 0x4e0   : > { %4607 = vmatmul.bf16.gmra.mxu3 %v11309_v47  ;;  %4736 = vmatpush.bf16.msra.mxu2 %v6354_v55 }
 0x4e2   : > { %v4363_v63 = vpop.f32.mrf.mxu2 }
 0x4e3   : > { %v4364_v42 = vadd.f32 %v4363_v63, %v4315_v54  ;;  %v4412_v53 = vpop.f32.mrf.mxu3  ;;  %v4267_v39 = vpop.f32.mrf.mxu0  ;;  %v7053_v54 = vld [vmem:[%s11088_s1 + $0x114] sm:$0xf0] }
 0x4e4   : > { %v4316_v59 = vpop.f32.mrf.mxu1  ;;  %v5586_v34 = vor.u32 %v7053_v54, %v5585_v7  ;;  %v7233_v7 = vld [vmem:[%s11088_s1 + $0x6b4] sm:$0xf0] }
 0x4e5   : > { %v4413_v19 = vadd.f32 %v4412_v53, %v4364_v42  ;;  %v4317_v0 = vadd.f32 %v4316_v59, %v4267_v39  ;;  %v11311_v39 = vmax.f32 %v9928_v1, %v10221_v52  ;;  %v6689_v1 = vld [vmem:[%s11088_s1 + $0x988] sm:$0xf]  ;;  %v7329_v54 = vld [vmem:[%s11088_s1 + $0x9b4] sm:$0xf0] }
 0x4e6   : > { %4638 = vmatpush.bf16.msra.mxu0 %v5586_v34  ;;  %v6690_v34 = vor.u32 %v7329_v54, %v6689_v1  ;;  %v7137_v1 = vld [vmem:[%s11088_s1 + $0x3b4] sm:$0xf0] }
 0x4e7   : > { %v10502_v18 = vmax.f32 %v11310_v23, %v4413_v19  ;;  %v11312_v19 = vld [vmem:[#allocation10_spill] sm:$0xff]  ;;  %v11313_v23 = vld [vmem:[#allocation11_spill] sm:$0xff] }
 0x4e8   : > { %4786 = vmatpush.bf16.msra.mxu3 %v6690_v34 }
 0x4ea   : > { %v4365_v56 = vpop.f32.mrf.mxu2 }
 0x4eb   : > { %v4366_v55 = vadd.f32 %v4365_v56, %v4317_v0  ;;  %v4414_v35 = vpop.f32.mrf.mxu3  ;;  %v4270_v63 = vpop.f32.mrf.mxu0  ;;  %v6305_v0 = vld [vmem:[%s11088_s1 + $0x688] sm:$0xf] }
 0x4ec   : > { %v4319_v2 = vpop.f32.mrf.mxu1  ;;  %v6306_v52 = vor.u32 %v7233_v7, %v6305_v0  ;;  %v5921_v0 = vld [vmem:[%s11088_s1 + $0x388] sm:$0xf] }
 0x4ed   : > { %v4415_v42 = vadd.f32 %v4414_v35, %v4366_v55  ;;  %v4320_v53 = vadd.f32 %v4319_v2, %v4270_v63  ;;  %v11314_v2 = vmax.f32 %v9948_v28, %v10241_v60  ;;  %v5922_v28 = vor.u32 %v7137_v1, %v5921_v0 }
 0x4ee   : > { %4465 = vmatmul.bf16.gmra.mxu0 %v7881_v40  ;;  %4514 = vmatmul.bf16.gmra.mxu1 %v7883_v41 }
 0x4ef   : > { %v10520_v59 = vmax.f32 %v11311_v39, %v4415_v42  ;;  %4563 = vmatmul.bf16.gmra.mxu2 %v11312_v19  ;;  %v5537_v39 = vld [vmem:[%s11088_s1 + $0x88] sm:$0xf]  ;;  %4688 = vmatpush.bf16.msra.mxu1 %v5922_v28 }
 0x4f0   : > { %4612 = vmatmul.bf16.gmra.mxu3 %v11313_v23  ;;  %4737 = vmatpush.bf16.msra.mxu2 %v6306_v52 }
 0x4f2   : > { %v4368_v31 = vpop.f32.mrf.mxu2 }
 0x4f3   : > { %v4369_v32 = vadd.f32 %v4368_v31, %v4320_v53  ;;  %v4417_v5 = vpop.f32.mrf.mxu3  ;;  %v4272_v56 = vpop.f32.mrf.mxu0  ;;  %v7041_v53 = vld [vmem:[%s11088_s1 + $0xb4] sm:$0xf0] }
 0x4f4   : > { %v4321_v55 = vpop.f32.mrf.mxu1  ;;  %v5538_v7 = vor.u32 %v7041_v53, %v5537_v39  ;;  %v7221_v39 = vld [vmem:[%s11088_s1 + $0x654] sm:$0xf0] }
 0x4f5   : > { %v4418_v35 = vadd.f32 %v4417_v5, %v4369_v32  ;;  %v4322_v63 = vadd.f32 %v4321_v55, %v4272_v56  ;;  %v11315_v56 = vmax.f32 %v9966_v29, %v10257_v22  ;;  %v6641_v29 = vld [vmem:[%s11088_s1 + $0x928] sm:$0xf]  ;;  %v7317_v53 = vld [vmem:[%s11088_s1 + $0x954] sm:$0xf0] }
 0x4f6   : > { %4639 = vmatpush.bf16.msra.mxu0 %v5538_v7  ;;  %v6642_v7 = vor.u32 %v7317_v53, %v6641_v29  ;;  %v7125_v29 = vld [vmem:[%s11088_s1 + $0x354] sm:$0xf0] }
 0x4f7   : > { %v10540_v42 = vmax.f32 %v11314_v2, %v4418_v35  ;;  %v11316_v35 = vld [vmem:[#allocation12_spill] sm:$0xff]  ;;  %v11317_v2 = vld [vmem:[#allocation13_spill] sm:$0xff] }
 0x4f8   : > { %4787 = vmatpush.bf16.msra.mxu3 %v6642_v7 }
 0x4fa   : > { %v4370_v60 = vpop.f32.mrf.mxu2 }
 0x4fb   : > { %v4371_v52 = vadd.f32 %v4370_v60, %v4322_v63  ;;  %v4419_v54 = vpop.f32.mrf.mxu3  ;;  %v4275_v31 = vpop.f32.mrf.mxu0  ;;  %v6257_v63 = vld [vmem:[%s11088_s1 + $0x628] sm:$0xf] }
 0x4fc   : > { %v4324_v34 = vpop.f32.mrf.mxu1  ;;  %v6258_v22 = vor.u32 %v7221_v39, %v6257_v63  ;;  %v5873_v63 = vld [vmem:[%s11088_s1 + $0x328] sm:$0xf] }
 0x4fd   : > { %v4420_v32 = vadd.f32 %v4419_v54, %v4371_v52  ;;  %v4325_v5 = vadd.f32 %v4324_v34, %v4275_v31  ;;  %v11318_v34 = vmax.f32 %v9986_v36, %v10277_v51  ;;  %v5874_v36 = vor.u32 %v7125_v29, %v5873_v63 }
 0x4fe   : > { %4470 = vmatmul.bf16.gmra.mxu0 %v7925_v8  ;;  %4519 = vmatmul.bf16.gmra.mxu1 %v7927_v9 }
 0x4ff   : > { %v10558_v55 = vmax.f32 %v11315_v56, %v4420_v32  ;;  %4568 = vmatmul.bf16.gmra.mxu2 %v11316_v35  ;;  %v5489_v56 = vld [vmem:[%s11088_s1 + $0x28] sm:$0xf]  ;;  %4689 = vmatpush.bf16.msra.mxu1 %v5874_v36 }
 0x500   : > { %4617 = vmatmul.bf16.gmra.mxu3 %v11317_v2  ;;  %4738 = vmatpush.bf16.msra.mxu2 %v6258_v22 }
 0x502   : > { %v4373_v0 = vpop.f32.mrf.mxu2 }
 0x503   : > { %v4374_v1 = vadd.f32 %v4373_v0, %v4325_v5  ;;  %v4422_v28 = vpop.f32.mrf.mxu3  ;;  %v4277_v60 = vpop.f32.mrf.mxu0  ;;  %v7029_v5 = vld [vmem:[%s11088_s1 + $0x54] sm:$0xf0] }
 0x504   : > { %v4326_v52 = vpop.f32.mrf.mxu1  ;;  %v5490_v39 = vor.u32 %v7029_v5, %v5489_v56  ;;  %v6595_v56 = vld [vmem:[%s11088_s1 + $0x8f8] sm:$0xf0] }
 0x505   : > { %v4423_v54 = vadd.f32 %v4422_v28, %v4374_v1  ;;  %v4327_v31 = vadd.f32 %v4326_v52, %v4277_v60  ;;  %v11319_v60 = vmax.f32 %v10004_v38, %v10293_v46  ;;  %v7395_v38 = vld [vmem:[%s11088_s1 + $0xbcc] sm:$0xf]  ;;  %v6979_v5 = vld [vmem:[%s11088_s1 + $0xbf8] sm:$0xf0] }
 0x506   : > { %4640 = vmatpush.bf16.msra.mxu0 %v5490_v39  ;;  %v6982_v39 = vor.u32 %v7395_v38, %v6979_v5  ;;  %v6211_v38 = vld [vmem:[%s11088_s1 + $0x5f8] sm:$0xf0] }
 0x507   : > { %v10578_v32 = vmax.f32 %v11318_v34, %v4423_v54  ;;  %v11320_v54 = vld [vmem:[#allocation15_spill] sm:$0xff]  ;;  %v11321_v34 = vld [vmem:[#allocation16_spill] sm:$0xff] }
 0x508   : > { %4976 = vmatpush.bf16.msrb.mxu3 %v6982_v39 }
 0x50a   : > { %v4375_v51 = vpop.f32.mrf.mxu2 }
 0x50b   : > { %v4376_v22 = vadd.f32 %v4375_v51, %v4327_v31  ;;  %v4424_v53 = vpop.f32.mrf.mxu3  ;;  %v4280_v0 = vpop.f32.mrf.mxu0  ;;  %v7299_v31 = vld [vmem:[%s11088_s1 + $0x8cc] sm:$0xf] }
 0x50c   : > { %v4329_v7 = vpop.f32.mrf.mxu1  ;;  %v6598_v46 = vor.u32 %v7299_v31, %v6595_v56  ;;  %v7203_v31 = vld [vmem:[%s11088_s1 + $0x5cc] sm:$0xf] }
 0x50d   : > { %v4425_v1 = vadd.f32 %v4424_v53, %v4376_v22  ;;  %v4330_v28 = vadd.f32 %v4329_v7, %v4280_v0  ;;  %v11322_v7 = vmax.f32 %v10024_v11, %v10313_v43  ;;  %v6214_v11 = vor.u32 %v7203_v31, %v6211_v38 }
 0x50e   : > { %4475 = vmatmul.bf16.gmra.mxu0 %v7969_v44  ;;  %4524 = vmatmul.bf16.gmra.mxu1 %v7971_v45 }
 0x50f   : > { %v10596_v52 = vmax.f32 %v11319_v60, %v4425_v1  ;;  %4573 = vmatmul.bf16.gmra.mxu2 %v11320_v54  ;;  %v7107_v60 = vld [vmem:[%s11088_s1 + $0x2cc] sm:$0xf]  ;;  %4878 = vmatpush.bf16.msrb.mxu1 %v6214_v11 }
 0x510   : > { %4622 = vmatmul.bf16.gmra.mxu3 %v11321_v34  ;;  %4927 = vmatpush.bf16.msrb.mxu2 %v6598_v46 }
 0x512   : > { %v4378_v63 = vpop.f32.mrf.mxu2 }
 0x513   : > { %v4379_v29 = vadd.f32 %v4378_v63, %v4330_v28  ;;  %v4427_v36 = vpop.f32.mrf.mxu3  ;;  %v4282_v51 = vpop.f32.mrf.mxu0  ;;  %v5827_v28 = vld [vmem:[%s11088_s1 + $0x2f8] sm:$0xf0] }
 0x514   : > { %v4331_v22 = vpop.f32.mrf.mxu1  ;;  %v5830_v56 = vor.u32 %v7107_v60, %v5827_v28  ;;  %v6547_v60 = vld [vmem:[%s11088_s1 + $0x898] sm:$0xf0] }
 0x515   : > { %v4428_v53 = vadd.f32 %v4427_v36, %v4379_v29  ;;  %v4332_v0 = vadd.f32 %v4331_v22, %v4282_v51  ;;  %v11323_v51 = vmax.f32 %v10042_v14, %v10329_v37  ;;  %v7383_v14 = vld [vmem:[%s11088_s1 + $0xb6c] sm:$0xf]  ;;  %v6931_v28 = vld [vmem:[%s11088_s1 + $0xb98] sm:$0xf0] }
 0x516   : > { %4829 = vmatpush.bf16.msrb.mxu0 %v5830_v56  ;;  %v6934_v56 = vor.u32 %v7383_v14, %v6931_v28  ;;  %v6163_v14 = vld [vmem:[%s11088_s1 + $0x598] sm:$0xf0] }
 0x517   : > { %v10616_v1 = vmax.f32 %v11322_v7, %v4428_v53  ;;  %v11324_v53 = vld [vmem:[#allocation18_spill] sm:$0xff]  ;;  %v11325_v7 = vld [vmem:[#allocation19_spill] sm:$0xff] }
 0x518   : > { %4977 = vmatpush.bf16.msrb.mxu3 %v6934_v56 }
 0x51a   : > { %v4380_v43 = vpop.f32.mrf.mxu2 }
 0x51b   : > { %v4381_v46 = vadd.f32 %v4380_v43, %v4332_v0  ;;  %v4429_v5 = vpop.f32.mrf.mxu3  ;;  %v4285_v63 = vpop.f32.mrf.mxu0  ;;  %v7287_v0 = vld [vmem:[%s11088_s1 + $0x86c] sm:$0xf] }
 0x51c   : > { %v4334_v39 = vpop.f32.mrf.mxu1  ;;  %v6550_v37 = vor.u32 %v7287_v0, %v6547_v60  ;;  %v7191_v0 = vld [vmem:[%s11088_s1 + $0x56c] sm:$0xf] }
 0x51d   : > { %v4430_v29 = vadd.f32 %v4429_v5, %v4381_v46  ;;  %v4335_v36 = vadd.f32 %v4334_v39, %v4285_v63  ;;  %v11326_v39 = vmax.f32 %v10062_v33, %v10349_v30  ;;  %v6166_v33 = vor.u32 %v7191_v0, %v6163_v14  ;;  %v6883_v0 = vld [vmem:[%s11088_s1 + $0xb38] sm:$0xf0] }
 0x51e   : > { %4480 = vmatmul.bf16.gmra.mxu0 %v8013_v20  ;;  %4529 = vmatmul.bf16.gmra.mxu1 %v8015_v21 }
 0x51f   : > { %v10634_v22 = vmax.f32 %v11323_v51, %v4430_v29  ;;  %4578 = vmatmul.bf16.gmra.mxu2 %v11324_v53  ;;  %v7095_v51 = vld [vmem:[%s11088_s1 + $0x26c] sm:$0xf]  ;;  %4879 = vmatpush.bf16.msrb.mxu1 %v6166_v33 }
 0x520   : > { %4627 = vmatmul.bf16.gmra.mxu3 %v11325_v7  ;;  %4928 = vmatpush.bf16.msrb.mxu2 %v6550_v37 }
 0x522   : > { %v4383_v31 = vpop.f32.mrf.mxu2 }
 0x523   : > { %v4384_v38 = vadd.f32 %v4383_v31, %v4335_v36  ;;  %v4432_v11 = vpop.f32.mrf.mxu3  ;;  %v4287_v43 = vpop.f32.mrf.mxu0  ;;  %v5779_v36 = vld [vmem:[%s11088_s1 + $0x298] sm:$0xf0] }
 0x524   : > { %v4336_v46 = vpop.f32.mrf.mxu1  ;;  %v5782_v60 = vor.u32 %v7095_v51, %v5779_v36  ;;  %v11330_v51 = vld [vmem:[#allocation4_spill] sm:$0xff]  ;;  %v6499_v36 = vld [vmem:[%s11088_s1 + $0x838] sm:$0xf0] }
 0x525   : > { %v4433_v5 = vadd.f32 %v4432_v11, %v4384_v38  ;;  %v4337_v63 = vadd.f32 %v4336_v46, %v4287_v43  ;;  %v11327_v43 = vmax.f32 %v10080_v15, %v10365_v57  ;;  %v7371_v15 = vld [vmem:[%s11088_s1 + $0xb0c] sm:$0xf] }
 0x526   : > { %4830 = vmatpush.bf16.msrb.mxu0 %v5782_v60  ;;  %v6886_v14 = vor.u32 %v7371_v15, %v6883_v0  ;;  %v6115_v15 = vld [vmem:[%s11088_s1 + $0x538] sm:$0xf0] }
 0x527   : > { %v10654_v29 = vmax.f32 %v11326_v39, %v4433_v5  ;;  %v11328_v5 = vld [vmem:[#allocation2_spill] sm:$0xff]  ;;  %v11329_v39 = vld [vmem:[#allocation3_spill] sm:$0xff] }
 0x528   : > { %4978 = vmatpush.bf16.msrb.mxu3 %v6886_v14 }
 0x52a   : > { %v4385_v30 = vpop.f32.mrf.mxu2 }
 0x52b   : > { %v4386_v37 = vadd.f32 %v4385_v30, %v4337_v63  ;;  %v4434_v28 = vpop.f32.mrf.mxu3  ;;  %v4446_v31 = vpop.f32.mrf.mxu0  ;;  %v7275_v63 = vld [vmem:[%s11088_s1 + $0x80c] sm:$0xf] }
 0x52c   : > { %v4495_v56 = vpop.f32.mrf.mxu1  ;;  %v6502_v57 = vor.u32 %v7275_v63, %v6499_v36  ;;  %v5731_v63 = vld [vmem:[%s11088_s1 + $0x238] sm:$0xf0] }
 0x52d   : > { %v4435_v38 = vadd.f32 %v4434_v28, %v4386_v37  ;;  %v4496_v11 = vadd.f32 %v4495_v56, %v4446_v31 }
 0x52e   : > { %4641 = vmatmul.bf16.vlgmr.msra.gmra.mxu0 %v7682_v48  ;;  %4690 = vmatmul.bf16.vlgmr.msra.gmra.mxu1 %v11328_v5 }
 0x52f   : > { %v10672_v46 = vmax.f32 %v11327_v43, %v4435_v38  ;;  %4739 = vmatmul.bf16.vlgmr.msra.gmra.mxu2 %v11329_v39  ;;  %v7083_v43 = vld [vmem:[%s11088_s1 + $0x20c] sm:$0xf] }
 0x530   : > { %4788 = vmatmul.bf16.vlgmr.msra.gmra.mxu3 %v11330_v51  ;;  %4929 = vmatpush.bf16.msrb.mxu2 %v6502_v57  ;;  %v5734_v36 = vor.u32 %v7083_v43, %v5731_v63  ;;  %v6451_v63 = vld [vmem:[%s11088_s1 + $0x7d8] sm:$0xf0] }
 0x532   : > { %v4544_v60 = vpop.f32.mrf.mxu2  ;;  %4831 = vmatpush.bf16.msrb.mxu0 %v5734_v36 }
 0x533   : > { %v4545_v33 = vadd.f32 %v4544_v60, %v4496_v11  ;;  %v4593_v30 = vpop.f32.mrf.mxu3  ;;  %v4448_v37 = vpop.f32.mrf.mxu0  ;;  %v7179_v11 = vld [vmem:[%s11088_s1 + $0x50c] sm:$0xf] }
 0x534   : > { %v4497_v28 = vpop.f32.mrf.mxu1  ;;  %v6118_v57 = vor.u32 %v7179_v11, %v6115_v15  ;;  %v7359_v11 = vld [vmem:[%s11088_s1 + $0xaac] sm:$0xf]  ;;  %v6835_v15 = vld [vmem:[%s11088_s1 + $0xad8] sm:$0xf0] }
 0x535   : > { %v10689_v31 = vadd.f32 %v4593_v30, %v4545_v33  ;;  %v4498_v56 = vadd.f32 %v4497_v28, %v4448_v37 }
 0x536   : > { %4880 = vmatpush.bf16.msrb.mxu1 %v6118_v57 }
 0x53a   : > { %v4546_v0 = vpop.f32.mrf.mxu2 }
 0x53b   : > { %v4547_v60 = vadd.f32 %v4546_v0, %v4498_v56  ;;  %v4595_v14 = vpop.f32.mrf.mxu3  ;;  %v4451_v33 = vpop.f32.mrf.mxu0  ;;  %v7263_v56 = vld [vmem:[%s11088_s1 + $0x7ac] sm:$0xf]  ;;  %v6838_v0 = vor.u32 %v7359_v11, %v6835_v15 }
 0x53c   : > { %v4500_v30 = vpop.f32.mrf.mxu1  ;;  %v6454_v36 = vor.u32 %v7263_v56, %v6451_v63  ;;  %v7071_v56 = vld [vmem:[%s11088_s1 + $0x1ac] sm:$0xf]  ;;  %v5683_v63 = vld [vmem:[%s11088_s1 + $0x1d8] sm:$0xf0] }
 0x53d   : > { %v10705_v37 = vadd.f32 %v4595_v14, %v4547_v60  ;;  %v4501_v28 = vadd.f32 %v4500_v30, %v4451_v33  ;;  %4979 = vmatpush.bf16.msrb.mxu3 %v6838_v0  ;;  %v5686_v11 = vor.u32 %v7071_v56, %v5683_v63  ;;  %v6403_v63 = vld [vmem:[%s11088_s1 + $0x778] sm:$0xf0] }
 0x53e   : > { %4646 = vmatmul.bf16.gmra.mxu0 %v7749_v24  ;;  %4695 = vmatmul.bf16.gmra.mxu1 %v7751_v25 }
 0x53f   : > { %4744 = vmatmul.bf16.gmra.mxu2 %v7753_v26  ;;  %4832 = vmatpush.bf16.msrb.mxu0 %v5686_v11 }
 0x540   : > { %4793 = vmatmul.bf16.gmra.mxu3 %v11301_v62  ;;  %4930 = vmatpush.bf16.msrb.mxu2 %v6454_v36  ;;  %v6067_v36 = vld [vmem:[%s11088_s1 + $0x4d8] sm:$0xf0] }
 0x542   : > { %v4549_v57 = vpop.f32.mrf.mxu2 }
 0x543   : > { %v4550_v60 = vadd.f32 %v4549_v57, %v4501_v28  ;;  %v4598_v14 = vpop.f32.mrf.mxu3  ;;  %v4453_v33 = vpop.f32.mrf.mxu0  ;;  %v7167_v28 = vld [vmem:[%s11088_s1 + $0x4ac] sm:$0xf] }
 0x544   : > { %v4502_v30 = vpop.f32.mrf.mxu1  ;;  %v6070_v15 = vor.u32 %v7167_v28, %v6067_v36  ;;  %v7347_v28 = vld [vmem:[%s11088_s1 + $0xa4c] sm:$0xf]  ;;  %v6787_v36 = vld [vmem:[%s11088_s1 + $0xa78] sm:$0xf0] }
 0x545   : > { %v10725_v43 = vadd.f32 %v4598_v14, %v4550_v60  ;;  %v4503_v38 = vadd.f32 %v4502_v30, %v4453_v33 }
 0x546   : > { %4881 = vmatpush.bf16.msrb.mxu1 %v6070_v15 }
 0x54a   : > { %v4551_v57 = vpop.f32.mrf.mxu2 }
 0x54b   : > { %v4552_v0 = vadd.f32 %v4551_v57, %v4503_v38  ;;  %v4600_v60 = vpop.f32.mrf.mxu3  ;;  %v4456_v14 = vpop.f32.mrf.mxu0  ;;  %v7251_v38 = vld [vmem:[%s11088_s1 + $0x74c] sm:$0xf]  ;;  %v6790_v57 = vor.u32 %v7347_v28, %v6787_v36 }
 0x54c   : > { %v4505_v33 = vpop.f32.mrf.mxu1  ;;  %v6406_v11 = vor.u32 %v7251_v38, %v6403_v63  ;;  %v7059_v38 = vld [vmem:[%s11088_s1 + $0x14c] sm:$0xf]  ;;  %v5635_v63 = vld [vmem:[%s11088_s1 + $0x178] sm:$0xf0] }
 0x54d   : > { %v10741_v30 = vadd.f32 %v4600_v60, %v4552_v0  ;;  %v4506_v62 = vadd.f32 %v4505_v33, %v4456_v14  ;;  %4980 = vmatpush.bf16.msrb.mxu3 %v6790_v57  ;;  %v5638_v28 = vor.u32 %v7059_v38, %v5635_v63  ;;  %v6355_v63 = vld [vmem:[%s11088_s1 + $0x718] sm:$0xf0] }
 0x54e   : > { %4651 = vmatmul.bf16.gmra.mxu0 %v7793_v49  ;;  %4700 = vmatmul.bf16.gmra.mxu1 %v7795_v50 }
 0x54f   : > { %4749 = vmatmul.bf16.gmra.mxu2 %v11304_v4  ;;  %4833 = vmatpush.bf16.msrb.mxu0 %v5638_v28 }
 0x550   : > { %4798 = vmatmul.bf16.gmra.mxu3 %v11305_v10  ;;  %4931 = vmatpush.bf16.msrb.mxu2 %v6406_v11  ;;  %v6019_v11 = vld [vmem:[%s11088_s1 + $0x478] sm:$0xf0] }
 0x552   : > { %v4554_v15 = vpop.f32.mrf.mxu2 }
 0x553   : > { %v4555_v0 = vadd.f32 %v4554_v15, %v4506_v62  ;;  %v4603_v60 = vpop.f32.mrf.mxu3  ;;  %v4458_v14 = vpop.f32.mrf.mxu0  ;;  %v7155_v62 = vld [vmem:[%s11088_s1 + $0x44c] sm:$0xf] }
 0x554   : > { %v4507_v33 = vpop.f32.mrf.mxu1  ;;  %v6022_v36 = vor.u32 %v7155_v62, %v6019_v11  ;;  %v7335_v62 = vld [vmem:[%s11088_s1 + $0x9ec] sm:$0xf]  ;;  %v6739_v11 = vld [vmem:[%s11088_s1 + $0xa18] sm:$0xf0] }
 0x555   : > { %v10761_v56 = vadd.f32 %v4603_v60, %v4555_v0  ;;  %v4508_v10 = vadd.f32 %v4507_v33, %v4458_v14 }
 0x556   : > { %4882 = vmatpush.bf16.msrb.mxu1 %v6022_v36 }
 0x55a   : > { %v4556_v15 = vpop.f32.mrf.mxu2 }
 0x55b   : > { %v4557_v57 = vadd.f32 %v4556_v15, %v4508_v10  ;;  %v4605_v0 = vpop.f32.mrf.mxu3  ;;  %v4461_v60 = vpop.f32.mrf.mxu0  ;;  %v7239_v10 = vld [vmem:[%s11088_s1 + $0x6ec] sm:$0xf]  ;;  %v6742_v15 = vor.u32 %v7335_v62, %v6739_v11 }
 0x55c   : > { %v4510_v14 = vpop.f32.mrf.mxu1  ;;  %v6358_v28 = vor.u32 %v7239_v10, %v6355_v63  ;;  %v7047_v10 = vld [vmem:[%s11088_s1 + $0xec] sm:$0xf]  ;;  %v5587_v63 = vld [vmem:[%s11088_s1 + $0x118] sm:$0xf0] }
 0x55d   : > { %v10777_v33 = vadd.f32 %v4605_v0, %v4557_v57  ;;  %v4511_v4 = vadd.f32 %v4510_v14, %v4461_v60  ;;  %4981 = vmatpush.bf16.msrb.mxu3 %v6742_v15  ;;  %v5590_v62 = vor.u32 %v7047_v10, %v5587_v63  ;;  %v6307_v63 = vld [vmem:[%s11088_s1 + $0x6b8] sm:$0xf0] }
 0x55e   : > { %4656 = vmatmul.bf16.gmra.mxu0 %v7837_v12  ;;  %4705 = vmatmul.bf16.gmra.mxu1 %v7839_v13 }
 0x55f   : > { %4754 = vmatmul.bf16.gmra.mxu2 %v11308_v6  ;;  %4834 = vmatpush.bf16.msrb.mxu0 %v5590_v62 }
 0x560   : > { %4803 = vmatmul.bf16.gmra.mxu3 %v11309_v47  ;;  %4932 = vmatpush.bf16.msrb.mxu2 %v6358_v28  ;;  %v5971_v28 = vld [vmem:[%s11088_s1 + $0x418] sm:$0xf0] }
 0x562   : > { %v4559_v36 = vpop.f32.mrf.mxu2 }
 0x563   : > { %v4560_v57 = vadd.f32 %v4559_v36, %v4511_v4  ;;  %v4608_v0 = vpop.f32.mrf.mxu3  ;;  %v4463_v60 = vpop.f32.mrf.mxu0  ;;  %v7143_v4 = vld [vmem:[%s11088_s1 + $0x3ec] sm:$0xf] }
 0x564   : > { %v4512_v14 = vpop.f32.mrf.mxu1  ;;  %v5974_v11 = vor.u32 %v7143_v4, %v5971_v28  ;;  %v7323_v4 = vld [vmem:[%s11088_s1 + $0x98c] sm:$0xf]  ;;  %v6691_v28 = vld [vmem:[%s11088_s1 + $0x9b8] sm:$0xf0] }
 0x565   : > { %v10797_v38 = vadd.f32 %v4608_v0, %v4560_v57  ;;  %v4513_v47 = vadd.f32 %v4512_v14, %v4463_v60 }
 0x566   : > { %4883 = vmatpush.bf16.msrb.mxu1 %v5974_v11 }
 0x56a   : > { %v4561_v36 = vpop.f32.mrf.mxu2 }
 0x56b   : > { %v4562_v15 = vadd.f32 %v4561_v36, %v4513_v47  ;;  %v4610_v57 = vpop.f32.mrf.mxu3  ;;  %v4466_v0 = vpop.f32.mrf.mxu0  ;;  %v7227_v47 = vld [vmem:[%s11088_s1 + $0x68c] sm:$0xf]  ;;  %v6694_v36 = vor.u32 %v7323_v4, %v6691_v28 }
 0x56c   : > { %v4515_v60 = vpop.f32.mrf.mxu1  ;;  %v6310_v62 = vor.u32 %v7227_v47, %v6307_v63  ;;  %v7035_v47 = vld [vmem:[%s11088_s1 + $0x8c] sm:$0xf]  ;;  %v5539_v63 = vld [vmem:[%s11088_s1 + $0xb8] sm:$0xf0] }
 0x56d   : > { %v10813_v14 = vadd.f32 %v4610_v57, %v4562_v15  ;;  %v4516_v6 = vadd.f32 %v4515_v60, %v4466_v0  ;;  %4982 = vmatpush.bf16.msrb.mxu3 %v6694_v36  ;;  %v5542_v4 = vor.u32 %v7035_v47, %v5539_v63  ;;  %v6259_v63 = vld [vmem:[%s11088_s1 + $0x658] sm:$0xf0] }
 0x56e   : > { %4661 = vmatmul.bf16.gmra.mxu0 %v7881_v40  ;;  %4710 = vmatmul.bf16.gmra.mxu1 %v7883_v41 }
 0x56f   : > { %4759 = vmatmul.bf16.gmra.mxu2 %v11312_v19  ;;  %4835 = vmatpush.bf16.msrb.mxu0 %v5542_v4 }
 0x570   : > { %4808 = vmatmul.bf16.gmra.mxu3 %v11313_v23  ;;  %4933 = vmatpush.bf16.msrb.mxu2 %v6310_v62  ;;  %v5923_v62 = vld [vmem:[%s11088_s1 + $0x3b8] sm:$0xf0] }
 0x572   : > { %v4564_v11 = vpop.f32.mrf.mxu2 }
 0x573   : > { %v4565_v15 = vadd.f32 %v4564_v11, %v4516_v6  ;;  %v4613_v57 = vpop.f32.mrf.mxu3  ;;  %v4468_v0 = vpop.f32.mrf.mxu0  ;;  %v7131_v6 = vld [vmem:[%s11088_s1 + $0x38c] sm:$0xf] }
 0x574   : > { %v4517_v60 = vpop.f32.mrf.mxu1  ;;  %v5926_v28 = vor.u32 %v7131_v6, %v5923_v62  ;;  %v7311_v6 = vld [vmem:[%s11088_s1 + $0x92c] sm:$0xf]  ;;  %v6643_v62 = vld [vmem:[%s11088_s1 + $0x958] sm:$0xf0] }
 0x575   : > { %v10833_v10 = vadd.f32 %v4613_v57, %v4565_v15  ;;  %v4518_v23 = vadd.f32 %v4517_v60, %v4468_v0 }
 0x576   : > { %4884 = vmatpush.bf16.msrb.mxu1 %v5926_v28 }
 0x57a   : > { %v4566_v11 = vpop.f32.mrf.mxu2 }
 0x57b   : > { %v4567_v36 = vadd.f32 %v4566_v11, %v4518_v23  ;;  %v4615_v15 = vpop.f32.mrf.mxu3  ;;  %v4471_v57 = vpop.f32.mrf.mxu0  ;;  %v7215_v23 = vld [vmem:[%s11088_s1 + $0x62c] sm:$0xf]  ;;  %v6646_v11 = vor.u32 %v7311_v6, %v6643_v62 }
 0x57c   : > { %v4520_v0 = vpop.f32.mrf.mxu1  ;;  %v6262_v4 = vor.u32 %v7215_v23, %v6259_v63  ;;  %v7023_v23 = vld [vmem:[%s11088_s1 + $0x2c] sm:$0xf]  ;;  %v5491_v63 = vld [vmem:[%s11088_s1 + $0x58] sm:$0xf0] }
 0x57d   : > { %v10849_v60 = vadd.f32 %v4615_v15, %v4567_v36  ;;  %v4521_v19 = vadd.f32 %v4520_v0, %v4471_v57  ;;  %4983 = vmatpush.bf16.msrb.mxu3 %v6646_v11  ;;  %v5494_v6 = vor.u32 %v7023_v23, %v5491_v63 }
 0x57e   : > { %4666 = vmatmul.bf16.gmra.mxu0 %v7925_v8  ;;  %4715 = vmatmul.bf16.gmra.mxu1 %v7927_v9 }
 0x57f   : > { %4764 = vmatmul.bf16.gmra.mxu2 %v11316_v35  ;;  %4836 = vmatpush.bf16.msrb.mxu0 %v5494_v6 }
 0x580   : > { %4813 = vmatmul.bf16.gmra.mxu3 %v11317_v2  ;;  %4934 = vmatpush.bf16.msrb.mxu2 %v6262_v4  ;;  %v5875_v4 = vld [vmem:[%s11088_s1 + $0x358] sm:$0xf0] }
 0x582   : > { %v4569_v28 = vpop.f32.mrf.mxu2 }
 0x583   : > { %v4570_v36 = vadd.f32 %v4569_v28, %v4521_v19  ;;  %v4618_v15 = vpop.f32.mrf.mxu3  ;;  %v4473_v57 = vpop.f32.mrf.mxu0  ;;  %v7119_v19 = vld [vmem:[%s11088_s1 + $0x32c] sm:$0xf] }
 0x584   : > { %v4522_v0 = vpop.f32.mrf.mxu1  ;;  %v5878_v62 = vor.u32 %v7119_v19, %v5875_v4 }
 0x585   : > { %v10869_v47 = vadd.f32 %v4618_v15, %v4570_v36  ;;  %v4523_v2 = vadd.f32 %v4522_v0, %v4473_v57 }
 0x586   : > { %4885 = vmatpush.bf16.msrb.mxu1 %v5878_v62 }
 0x58a   : > { %v4571_v28 = vpop.f32.mrf.mxu2 }
 0x58b   : > { %v4572_v11 = vadd.f32 %v4571_v28, %v4523_v2  ;;  %v4620_v36 = vpop.f32.mrf.mxu3  ;;  %v4476_v15 = vpop.f32.mrf.mxu0 }
 0x58c   : > { %v4525_v57 = vpop.f32.mrf.mxu1 }
 0x58d   : > { %v10885_v0 = vadd.f32 %v4620_v36, %v4572_v11  ;;  %v4526_v35 = vadd.f32 %v4525_v57, %v4476_v15 }
 0x58e   : > { %4671 = vmatmul.bf16.gmra.mxu0 %v7969_v44  ;;  %4720 = vmatmul.bf16.gmra.mxu1 %v7971_v45 }
 0x58f   : > { %11331 = vst [vmem:[#allocation16_spill] sm:$0xff] %v10885_v0  ;;  %4769 = vmatmul.bf16.gmra.mxu2 %v11320_v54 }
 0x590   : > { %4818 = vmatmul.bf16.gmra.mxu3 %v11321_v34 }
 0x592   : > { %v4574_v63 = vpop.f32.mrf.mxu2 }
 0x593   : > { %v4575_v2 = vadd.f32 %v4574_v63, %v4526_v35  ;;  %v4623_v19 = vpop.f32.mrf.mxu3  ;;  %v4478_v6 = vpop.f32.mrf.mxu0 }
 0x594   : > { %v4527_v4 = vpop.f32.mrf.mxu1 }
 0x595   : > { %v10893_v62 = vadd.f32 %v4623_v19, %v4575_v2  ;;  %v4528_v28 = vadd.f32 %v4527_v4, %v4478_v6 }
 0x59a   : > { %v4576_v36 = vpop.f32.mrf.mxu2 }
 0x59b   : > { %v4577_v15 = vadd.f32 %v4576_v36, %v4528_v28  ;;  %v4625_v57 = vpop.f32.mrf.mxu3  ;;  %v4481_v23 = vpop.f32.mrf.mxu0 }
 0x59c   : > { %v4530_v45 = vpop.f32.mrf.mxu1 }
 0x59d   : > { %v10897_v0 = vadd.f32 %v4625_v57, %v4577_v15  ;;  %v4531_v54 = vadd.f32 %v4530_v45, %v4481_v23 }
 0x59e   : > { %4676 = vmatmul.bf16.gmra.mxu0 %v8013_v20  ;;  %4725 = vmatmul.bf16.gmra.mxu1 %v8015_v21 }
 0x59f   : > { %4774 = vmatmul.bf16.gmra.mxu2 %v11324_v53 }
 0x5a0   : > { %4823 = vmatmul.bf16.gmra.mxu3 %v11325_v7 }
 0x5a2   : > { %v4579_v63 = vpop.f32.mrf.mxu2 }
 0x5a3   : > { %v4580_v2 = vadd.f32 %v4579_v63, %v4531_v54  ;;  %v4628_v19 = vpop.f32.mrf.mxu3  ;;  %v4483_v6 = vpop.f32.mrf.mxu0 }
 0x5a4   : > { %v4532_v4 = vpop.f32.mrf.mxu1 }
 0x5a5   : > { %v10905_v28 = vadd.f32 %v4628_v19, %v4580_v2  ;;  %v4533_v36 = vadd.f32 %v4532_v4, %v4483_v6 }
 0x5aa   : > { %v4581_v23 = vpop.f32.mrf.mxu2 }
 0x5ab   : > { %v4582_v15 = vadd.f32 %v4581_v23, %v4533_v36  ;;  %v4630_v57 = vpop.f32.mrf.mxu3  ;;  %v4642_v35 = vpop.f32.mrf.mxu0 }
 0x5ac   : > { %v4691_v11 = vpop.f32.mrf.mxu1 }
 0x5ad   : > { %v10909_v21 = vadd.f32 %v4630_v57, %v4582_v15  ;;  %v4692_v53 = vadd.f32 %v4691_v11, %v4642_v35  ;;  %v11332_v11 = vmax.f32 %v10388_v17, %v10689_v31  ;;  %v11334_v17 = vld [vmem:[#allocation5_spill] sm:$0xff] }
 0x5ae   : > { %4837 = vmatmul.bf16.vlgmr.msrb.gmra.mxu0 %v7682_v48  ;;  %4886 = vmatmul.bf16.vlgmr.msrb.gmra.mxu1 %v11328_v5 }
 0x5af   : > { %4935 = vmatmul.bf16.vlgmr.msrb.gmra.mxu2 %v11329_v39 }
 0x5b0   : > { %4984 = vmatmul.bf16.vlgmr.msrb.gmra.mxu3 %v11330_v51 }
 0x5b2   : > { %v4740_v63 = vpop.f32.mrf.mxu2 }
 0x5b3   : > { %v4741_v2 = vadd.f32 %v4740_v63, %v4692_v53  ;;  %v4789_v19 = vpop.f32.mrf.mxu3  ;;  %v4644_v6 = vpop.f32.mrf.mxu0  ;;  %v11333_v53 = vmax.f32 %v10406_v61, %v10705_v37 }
 0x5b4   : > { %v4693_v4 = vpop.f32.mrf.mxu1 }
 0x5b5   : > { %v4790_v36 = vadd.f32 %v4789_v19, %v4741_v2  ;;  %v4694_v23 = vadd.f32 %v4693_v4, %v4644_v6 }
 0x5b7   : > { %v10920_v48 = vmax.f32 %v11332_v11, %v4790_v36 }
 0x5ba   : > { %v4742_v35 = vpop.f32.mrf.mxu2 }
 0x5bb   : > { %v4743_v15 = vadd.f32 %v4742_v35, %v4694_v23  ;;  %v4791_v57 = vpop.f32.mrf.mxu3  ;;  %v4647_v5 = vpop.f32.mrf.mxu0 }
 0x5bc   : > { %v4696_v54 = vpop.f32.mrf.mxu1 }
 0x5bd   : > { %v4792_v39 = vadd.f32 %v4791_v57, %v4743_v15  ;;  %v4697_v45 = vadd.f32 %v4696_v54, %v4647_v5  ;;  %v11337_v57 = vld [vmem:[#allocation6_spill] sm:$0xff] }
 0x5be   : > { %4842 = vmatmul.bf16.gmra.mxu0 %v7749_v24  ;;  %4891 = vmatmul.bf16.gmra.mxu1 %v7751_v25  ;;  %v11335_v24 = vmax.f32 %v10426_v3, %v10725_v43  ;;  %v11338_v3 = vld [vmem:[#allocation7_spill] sm:$0xff] }
 0x5bf   : > { %v10926_v51 = vmax.f32 %v11333_v53, %v4792_v39  ;;  %4940 = vmatmul.bf16.gmra.mxu2 %v7753_v26 }
 0x5c0   : > { %4989 = vmatmul.bf16.gmra.mxu3 %v11334_v17 }
 0x5c2   : > { %v4745_v31 = vpop.f32.mrf.mxu2 }
 0x5c3   : > { %v4746_v63 = vadd.f32 %v4745_v31, %v4697_v45  ;;  %v4794_v2 = vpop.f32.mrf.mxu3  ;;  %v4649_v19 = vpop.f32.mrf.mxu0  ;;  %v11336_v45 = vmax.f32 %v10444_v27, %v10741_v30 }
 0x5c4   : > { %v4698_v6 = vpop.f32.mrf.mxu1 }
 0x5c5   : > { %v4795_v4 = vadd.f32 %v4794_v2, %v4746_v63  ;;  %v4699_v54 = vadd.f32 %v4698_v6, %v4649_v19 }
 0x5c7   : > { %v10934_v36 = vmax.f32 %v11335_v24, %v4795_v4  ;;  %v11340_v24 = vmax.f32 %v10482_v16, %v10777_v33 }
 0x5ca   : > { %v4747_v61 = vpop.f32.mrf.mxu2 }
 0x5cb   : > { %v4748_v37 = vadd.f32 %v4747_v61, %v4699_v54  ;;  %v4796_v23 = vpop.f32.mrf.mxu3  ;;  %v4652_v25 = vpop.f32.mrf.mxu0 }
 0x5cc   : > { %v4701_v11 = vpop.f32.mrf.mxu1 }
 0x5cd   : > { %v4797_v26 = vadd.f32 %v4796_v23, %v4748_v37  ;;  %v4702_v35 = vadd.f32 %v4701_v11, %v4652_v25  ;;  %v11341_v37 = vld [vmem:[#allocation8_spill] sm:$0xff] }
 0x5ce   : > { %4847 = vmatmul.bf16.gmra.mxu0 %v7793_v49  ;;  %4896 = vmatmul.bf16.gmra.mxu1 %v7795_v50  ;;  %v11339_v49 = vmax.f32 %v10464_v58, %v10761_v56  ;;  %v11342_v58 = vld [vmem:[#allocation9_spill] sm:$0xff] }
 0x5cf   : > { %v10940_v15 = vmax.f32 %v11336_v45, %v4797_v26  ;;  %4945 = vmatmul.bf16.gmra.mxu2 %v11337_v57 }
 0x5d0   : > { %4994 = vmatmul.bf16.gmra.mxu3 %v11338_v3 }
 0x5d2   : > { %v4750_v43 = vpop.f32.mrf.mxu2 }
 0x5d3   : > { %v4751_v5 = vadd.f32 %v4750_v43, %v4702_v35  ;;  %v4799_v39 = vpop.f32.mrf.mxu3  ;;  %v4654_v53 = vpop.f32.mrf.mxu0 }
 0x5d4   : > { %v4703_v17 = vpop.f32.mrf.mxu1 }
 0x5d5   : > { %v4800_v31 = vadd.f32 %v4799_v39, %v4751_v5  ;;  %v4704_v63 = vadd.f32 %v4703_v17, %v4654_v53  ;;  %v11344_v53 = vmax.f32 %v10520_v59, %v10813_v14 }
 0x5d7   : > { %v10948_v2 = vmax.f32 %v11339_v49, %v4800_v31  ;;  %v11345_v31 = vld [vmem:[#allocation10_spill] sm:$0xff] }
 0x5da   : > { %v4752_v27 = vpop.f32.mrf.mxu2 }
 0x5db   : > { %v4753_v30 = vadd.f32 %v4752_v27, %v4704_v63  ;;  %v4801_v19 = vpop.f32.mrf.mxu3  ;;  %v4657_v50 = vpop.f32.mrf.mxu0 }
 0x5dc   : > { %v4706_v6 = vpop.f32.mrf.mxu1 }
 0x5dd   : > { %v4802_v4 = vadd.f32 %v4801_v19, %v4753_v30  ;;  %v4707_v54 = vadd.f32 %v4706_v6, %v4657_v50 }
 0x5de   : > { %4852 = vmatmul.bf16.gmra.mxu0 %v7837_v12  ;;  %4901 = vmatmul.bf16.gmra.mxu1 %v7839_v13  ;;  %v11343_v12 = vmax.f32 %v10502_v18, %v10797_v38  ;;  %v11346_v18 = vld [vmem:[#allocation11_spill] sm:$0xff] }
 0x5df   : > { %v10954_v61 = vmax.f32 %v11340_v24, %v4802_v4  ;;  %4950 = vmatmul.bf16.gmra.mxu2 %v11341_v37 }
 0x5e0   : > { %4999 = vmatmul.bf16.gmra.mxu3 %v11342_v58  ;;  %v11348_v58 = vmax.f32 %v10558_v55, %v10849_v60 }
 0x5e2   : > { %v4755_v56 = vpop.f32.mrf.mxu2 }
 0x5e3   : > { %v4756_v23 = vadd.f32 %v4755_v56, %v4707_v54  ;;  %v4804_v25 = vpop.f32.mrf.mxu3  ;;  %v4659_v11 = vpop.f32.mrf.mxu0 }
 0x5e4   : > { %v4708_v26 = vpop.f32.mrf.mxu1 }
 0x5e5   : > { %v4805_v35 = vadd.f32 %v4804_v25, %v4756_v23  ;;  %v4709_v45 = vadd.f32 %v4708_v26, %v4659_v11  ;;  %v11349_v23 = vld [vmem:[#allocation12_spill] sm:$0xff] }
 0x5e7   : > { %v10962_v57 = vmax.f32 %v11343_v12, %v4805_v35 }
 0x5ea   : > { %v4757_v16 = vpop.f32.mrf.mxu2 }
 0x5eb   : > { %v4758_v33 = vadd.f32 %v4757_v16, %v4709_v45  ;;  %v4806_v3 = vpop.f32.mrf.mxu3  ;;  %v4662_v13 = vpop.f32.mrf.mxu0 }
 0x5ec   : > { %v4711_v43 = vpop.f32.mrf.mxu1 }
 0x5ed   : > { %v4807_v5 = vadd.f32 %v4806_v3, %v4758_v33  ;;  %v4712_v39 = vadd.f32 %v4711_v43, %v4662_v13 }
 0x5ee   : > { %4857 = vmatmul.bf16.gmra.mxu0 %v7881_v40  ;;  %4906 = vmatmul.bf16.gmra.mxu1 %v7883_v41  ;;  %v11347_v40 = vmax.f32 %v10540_v42, %v10833_v10  ;;  %v11350_v42 = vld [vmem:[#allocation13_spill] sm:$0xff] }
 0x5ef   : > { %v10968_v17 = vmax.f32 %v11344_v53, %v4807_v5  ;;  %4955 = vmatmul.bf16.gmra.mxu2 %v11345_v31  ;;  %v11352_v5 = vld [vmem:[#allocation16_spill] sm:$0xff]  ;;  %v11354_v31 = vld [vmem:[#allocation14_spill] sm:$0xff] }
 0x5f0   : > { %5004 = vmatmul.bf16.gmra.mxu3 %v11346_v18  ;;  %v11355_v18 = vld [vmem:[#allocation15_spill] sm:$0xff] }
 0x5f2   : > { %v4760_v38 = vpop.f32.mrf.mxu2 }
 0x5f3   : > { %v4761_v63 = vadd.f32 %v4760_v38, %v4712_v39  ;;  %v4809_v49 = vpop.f32.mrf.mxu3  ;;  %v4664_v27 = vpop.f32.mrf.mxu0  ;;  %v11353_v39 = vmax.f32 %v10596_v52, %v11352_v5 }
 0x5f4   : > { %v4713_v30 = vpop.f32.mrf.mxu1 }
 0x5f5   : > { %v4810_v19 = vadd.f32 %v4809_v49, %v4761_v63  ;;  %v4714_v50 = vadd.f32 %v4713_v30, %v4664_v27 }
 0x5f7   : > { %v10976_v6 = vmax.f32 %v11347_v40, %v4810_v19 }
 0x5fa   : > { %v4762_v59 = vpop.f32.mrf.mxu2 }
 0x5fb   : > { %v4763_v14 = vadd.f32 %v4762_v59, %v4714_v50  ;;  %v4811_v4 = vpop.f32.mrf.mxu3  ;;  %v4667_v41 = vpop.f32.mrf.mxu0 }
 0x5fc   : > { %v4716_v54 = vpop.f32.mrf.mxu1 }
 0x5fd   : > { %v4812_v24 = vadd.f32 %v4811_v4, %v4763_v14  ;;  %v4717_v37 = vadd.f32 %v4716_v54, %v4667_v41 }
 0x5fe   : > { %4862 = vmatmul.bf16.gmra.mxu0 %v7925_v8  ;;  %4911 = vmatmul.bf16.gmra.mxu1 %v7927_v9  ;;  %v11351_v8 = vmax.f32 %v10578_v32, %v10869_v47 }
 0x5ff   : > { %v10982_v56 = vmax.f32 %v11348_v58, %v4812_v24  ;;  %4960 = vmatmul.bf16.gmra.mxu2 %v11349_v23  ;;  %v11358_v24 = vld [vmem:[#allocation17_spill] sm:$0xff] }
 0x600   : > { %5009 = vmatmul.bf16.gmra.mxu3 %v11350_v42 }
 0x602   : > { %v4765_v10 = vpop.f32.mrf.mxu2 }
 0x603   : > { %v4766_v25 = vadd.f32 %v4765_v10, %v4717_v37  ;;  %v4814_v11 = vpop.f32.mrf.mxu3  ;;  %v4669_v26 = vpop.f32.mrf.mxu0  ;;  %v11359_v37 = vld [vmem:[#allocation18_spill] sm:$0xff] }
 0x604   : > { %v4718_v35 = vpop.f32.mrf.mxu1 }
 0x605   : > { %v4815_v45 = vadd.f32 %v4814_v11, %v4766_v25  ;;  %v4719_v12 = vadd.f32 %v4718_v35, %v4669_v26 }
 0x607   : > { %v10990_v16 = vmax.f32 %v11351_v8, %v4815_v45 }
 0x60a   : > { %v4767_v55 = vpop.f32.mrf.mxu2 }
 0x60b   : > { %v4768_v60 = vadd.f32 %v4767_v55, %v4719_v12  ;;  %v4816_v33 = vpop.f32.mrf.mxu3  ;;  %v4672_v9 = vpop.f32.mrf.mxu0 }
 0x60c   : > { %v4721_v3 = vpop.f32.mrf.mxu1 }
 0x60d   : > { %v4817_v13 = vadd.f32 %v4816_v33, %v4768_v60  ;;  %v4722_v43 = vadd.f32 %v4721_v3, %v4672_v9 }
 0x60e   : > { %4867 = vmatmul.bf16.gmra.mxu0 %v7969_v44  ;;  %4916 = vmatmul.bf16.gmra.mxu1 %v11354_v31  ;;  %v11356_v44 = vmax.f32 %v10616_v1, %v10893_v62 }
 0x60f   : > { %v10996_v53 = vmax.f32 %v11353_v39, %v4817_v13  ;;  %4965 = vmatmul.bf16.gmra.mxu2 %v11355_v18  ;;  %v11028_v13 = vld [vmem:[%s11089_s2] ss:$0 sm:$0xff] }
 0x610   : > { %5014 = vmatmul.bf16.gmra.mxu3 %v11321_v34  ;;  %v11357_v34 = vmax.f32 %v10634_v22, %v10897_v0 }
 0x612   : > { %v4770_v32 = vpop.f32.mrf.mxu2 }
 0x613   : > { %v4771_v47 = vadd.f32 %v4770_v32, %v4722_v43  ;;  %v4819_v38 = vpop.f32.mrf.mxu3  ;;  %v4674_v63 = vpop.f32.mrf.mxu0 }
 0x614   : > { %v4723_v49 = vpop.f32.mrf.mxu1 }
 0x615   : > { %v4820_v27 = vadd.f32 %v4819_v38, %v4771_v47  ;;  %v4724_v30 = vadd.f32 %v4723_v49, %v4674_v63 }
 0x617   : > { %v11004_v19 = vmax.f32 %v11356_v44, %v4820_v27 }
 0x61a   : > { %v4772_v52 = vpop.f32.mrf.mxu2 }
 0x61b   : > { %v4773_v50 = vadd.f32 %v4772_v52, %v4724_v30  ;;  %v4821_v40 = vpop.f32.mrf.mxu3  ;;  %v4677_v59 = vpop.f32.mrf.mxu0 }
 0x61c   : > { %v4726_v14 = vpop.f32.mrf.mxu1 }
 0x61d   : > { %v4822_v4 = vadd.f32 %v4821_v40, %v4773_v50  ;;  %v4727_v41 = vadd.f32 %v4726_v14, %v4677_v59 }
 0x61e   : > { %4872 = vmatmul.bf16.gmra.mxu0 %v8013_v20  ;;  %4921 = vmatmul.bf16.gmra.mxu1 %v11358_v24  ;;  %v11360_v20 = vmax.f32 %v10654_v29, %v10905_v28 }
 0x61f   : > { %v11010_v54 = vmax.f32 %v11357_v34, %v4822_v4  ;;  %4970 = vmatmul.bf16.gmra.mxu2 %v11359_v37 }
 0x620   : > { %5019 = vmatmul.bf16.gmra.mxu3 %v11325_v7  ;;  %v11361_v7 = vmax.f32 %v10672_v46, %v10909_v21 }
 0x622   : > { %v4775_v1 = vpop.f32.mrf.mxu2 }
 0x623   : > { %v4776_v62 = vadd.f32 %v4775_v1, %v4727_v41  ;;  %v4824_v58 = vpop.f32.mrf.mxu3  ;;  %v4679_v23 = vpop.f32.mrf.mxu0 }
 0x624   : > { %v4728_v42 = vpop.f32.mrf.mxu1 }
 0x625   : > { %v4825_v10 = vadd.f32 %v4824_v58, %v4776_v62  ;;  %v4729_v25 = vadd.f32 %v4728_v42, %v4679_v23 }
 0x627   : > { %v11018_v11 = vmax.f32 %v11360_v20, %v4825_v10 }
 0x62a   : > { %v4777_v22 = vpop.f32.mrf.mxu2 }
 0x62b   : > { %v4778_v0 = vadd.f32 %v4777_v22, %v4729_v25  ;;  %v4826_v26 = vpop.f32.mrf.mxu3  ;;  %v4838_v35 = vpop.f32.mrf.mxu0 }
 0x62c   : > { %v4887_v45 = vpop.f32.mrf.mxu1 }
 0x62d   : > { %v4827_v12 = vadd.f32 %v4826_v26, %v4778_v0  ;;  %v4888_v55 = vadd.f32 %v4887_v45, %v4838_v35 }
 0x62f   : > { %v11023_v8 = vmax.f32 %v11361_v7, %v4827_v12 }
 0x632   : > { %v4936_v60 = vpop.f32.mrf.mxu2 }
 0x633   : > { %v4937_v33 = vadd.f32 %v4936_v60, %v4888_v55  ;;  %v4985_v9 = vpop.f32.mrf.mxu3  ;;  %v4840_v3 = vpop.f32.mrf.mxu0 }
 0x634   : > { %v4889_v29 = vpop.f32.mrf.mxu1 }
 0x635   : > { %v4986_v28 = vadd.f32 %v4985_v9, %v4937_v33  ;;  %v4890_v21 = vadd.f32 %v4889_v29, %v4840_v3 }
 0x637   : > { %v5185_v43 = vmax.f32 %v10920_v48, %v4986_v28 }
 0x639   : > { %v5205_v5 = vadd.f32 %v11028_v13, %v5185_v43 }
 0x63a   : > { %v4938_v46 = vpop.f32.mrf.mxu2 }
 0x63b   : > { %v5221_v39 = vmax.f32 %v5205_v5, 0.0  ;;  %v4939_v31 = vadd.f32 %v4938_v46, %v4890_v21  ;;  %v4987_v18 = vpop.f32.mrf.mxu3  ;;  %v4843_v32 = vpop.f32.mrf.mxu0 }
 0x63c   : > { %v4892_v47 = vpop.f32.mrf.mxu1 }
 0x63d   : > { %5237 = vst [vmem:[%s11036_s14] sm:$0xff] %v5221_v39  ;;  %v4988_v38 = vadd.f32 %v4987_v18, %v4939_v31  ;;  %v4893_v63 = vadd.f32 %v4892_v47, %v4843_v32 }
 0x63f   : > { %v5186_v48 = vmax.f32 %v10926_v51, %v4988_v38 }
 0x641   : > { %v5206_v49 = vadd.f32 %v11028_v13, %v5186_v48 }
 0x642   : > { %v4941_v27 = vpop.f32.mrf.mxu2 }
 0x643   : > { %v5222_v30 = vmax.f32 %v5206_v49, 0.0  ;;  %v4942_v44 = vadd.f32 %v4941_v27, %v4893_v63  ;;  %v4990_v52 = vpop.f32.mrf.mxu3  ;;  %v4845_v50 = vpop.f32.mrf.mxu0 }
 0x644   : > { %v4894_v40 = vpop.f32.mrf.mxu1 }
 0x645   : > { %5238 = vst [vmem:[%s11036_s14 + $0x8] sm:$0xff] %v5222_v30  ;;  %v4991_v59 = vadd.f32 %v4990_v52, %v4942_v44  ;;  %v4895_v41 = vadd.f32 %v4894_v40, %v4845_v50 }
 0x647   : > { %v5187_v14 = vmax.f32 %v10934_v36, %v4991_v59 }
 0x649   : > { %v5207_v4 = vadd.f32 %v11028_v13, %v5187_v14 }
 0x64a   : > { %v4943_v34 = vpop.f32.mrf.mxu2 }
 0x64b   : > { %v5223_v24 = vmax.f32 %v5207_v4, 0.0  ;;  %v4944_v51 = vadd.f32 %v4943_v34, %v4895_v41  ;;  %v4992_v37 = vpop.f32.mrf.mxu3  ;;  %v4848_v1 = vpop.f32.mrf.mxu0 }
 0x64c   : > { %v4897_v62 = vpop.f32.mrf.mxu1 }
 0x64d   : > { %5239 = vst [vmem:[%s11036_s14 + $0x10] sm:$0xff] %v5223_v24  ;;  %v4993_v58 = vadd.f32 %v4992_v37, %v4944_v51  ;;  %v4898_v42 = vadd.f32 %v4897_v62, %v4848_v1 }
 0x64f   : > { %v5188_v23 = vmax.f32 %v10940_v15, %v4993_v58 }
 0x651   : > { %v5208_v10 = vadd.f32 %v11028_v13, %v5188_v23 }
 0x652   : > { %v4946_v25 = vpop.f32.mrf.mxu2 }
 0x653   : > { %v5224_v20 = vmax.f32 %v5208_v10, 0.0  ;;  %v4947_v36 = vadd.f32 %v4946_v25, %v4898_v42  ;;  %v4995_v22 = vpop.f32.mrf.mxu3  ;;  %v4850_v0 = vpop.f32.mrf.mxu0 }
 0x654   : > { %v4899_v26 = vpop.f32.mrf.mxu1 }
 0x655   : > { %5240 = vst [vmem:[%s11036_s14 + $0x18] sm:$0xff] %v5224_v20  ;;  %v4996_v35 = vadd.f32 %v4995_v22, %v4947_v36  ;;  %v4900_v7 = vadd.f32 %v4899_v26, %v4850_v0 }
 0x657   : > { %v5189_v45 = vmax.f32 %v10948_v2, %v4996_v35 }
 0x659   : > { %v5209_v12 = vadd.f32 %v11028_v13, %v5189_v45 }
 0x65a   : > { %v4948_v55 = vpop.f32.mrf.mxu2 }
 0x65b   : > { %v5225_v60 = vmax.f32 %v5209_v12, 0.0  ;;  %v4949_v15 = vadd.f32 %v4948_v55, %v4900_v7  ;;  %v4997_v33 = vpop.f32.mrf.mxu3  ;;  %v4853_v9 = vpop.f32.mrf.mxu0 }
 0x65c   : > { %v4902_v3 = vpop.f32.mrf.mxu1 }
 0x65d   : > { %5241 = vst [vmem:[%s11036_s14 + $0x20] sm:$0xff] %v5225_v60  ;;  %v4998_v29 = vadd.f32 %v4997_v33, %v4949_v15  ;;  %v4903_v43 = vadd.f32 %v4902_v3, %v4853_v9 }
 0x65f   : > { %v5190_v28 = vmax.f32 %v10954_v61, %v4998_v29 }
 0x661   : > { %v5210_v5 = vadd.f32 %v11028_v13, %v5190_v28 }
 0x662   : > { %v4951_v21 = vpop.f32.mrf.mxu2 }
 0x663   : > { %v5226_v46 = vmax.f32 %v5210_v5, 0.0  ;;  %v4952_v2 = vadd.f32 %v4951_v21, %v4903_v43  ;;  %v5000_v39 = vpop.f32.mrf.mxu3  ;;  %v4855_v31 = vpop.f32.mrf.mxu0 }
 0x664   : > { %v4904_v18 = vpop.f32.mrf.mxu1 }
 0x665   : > { %5242 = vst [vmem:[%s11036_s14 + $0x28] sm:$0xff] %v5226_v46  ;;  %v5001_v32 = vadd.f32 %v5000_v39, %v4952_v2  ;;  %v4905_v48 = vadd.f32 %v4904_v18, %v4855_v31 }
 0x667   : > { %v5191_v47 = vmax.f32 %v10962_v57, %v5001_v32 }
 0x669   : > { %v5211_v38 = vadd.f32 %v11028_v13, %v5191_v47 }
 0x66a   : > { %v4953_v63 = vpop.f32.mrf.mxu2 }
 0x66b   : > { %v5227_v49 = vmax.f32 %v5211_v38, 0.0  ;;  %v4954_v61 = vadd.f32 %v4953_v63, %v4905_v48  ;;  %v5002_v27 = vpop.f32.mrf.mxu3  ;;  %v4858_v30 = vpop.f32.mrf.mxu0 }
 0x66c   : > { %v4907_v44 = vpop.f32.mrf.mxu1 }
 0x66d   : > { %5243 = vst [vmem:[%s11036_s14 + $0x30] sm:$0xff] %v5227_v49  ;;  %v5003_v52 = vadd.f32 %v5002_v27, %v4954_v61  ;;  %v4908_v40 = vadd.f32 %v4907_v44, %v4858_v30 }
 0x66f   : > { %v5192_v50 = vmax.f32 %v10968_v17, %v5003_v52 }
 0x671   : > { %v5212_v59 = vadd.f32 %v11028_v13, %v5192_v50 }
 0x672   : > { %v4956_v14 = vpop.f32.mrf.mxu2 }
 0x673   : > { %v5228_v4 = vmax.f32 %v5212_v59, 0.0  ;;  %v4957_v57 = vadd.f32 %v4956_v14, %v4908_v40  ;;  %v5005_v41 = vpop.f32.mrf.mxu3  ;;  %v4860_v34 = vpop.f32.mrf.mxu0 }
 0x674   : > { %v4909_v24 = vpop.f32.mrf.mxu1 }
 0x675   : > { %5244 = vst [vmem:[%s11036_s14 + $0x38] sm:$0xff] %v5228_v4  ;;  %v5006_v51 = vadd.f32 %v5005_v41, %v4957_v57  ;;  %v4910_v62 = vadd.f32 %v4909_v24, %v4860_v34 }
 0x677   : > { %v5193_v37 = vmax.f32 %v10976_v6, %v5006_v51 }
 0x679   : > { %v5213_v1 = vadd.f32 %v11028_v13, %v5193_v37 }
 0x67a   : > { %v4958_v58 = vpop.f32.mrf.mxu2 }
 0x67b   : > { %v5229_v23 = vmax.f32 %v5213_v1, 0.0  ;;  %v4959_v17 = vadd.f32 %v4958_v58, %v4910_v62  ;;  %v5007_v42 = vpop.f32.mrf.mxu3  ;;  %v4863_v10 = vpop.f32.mrf.mxu0 }
 0x67c   : > { %v4912_v25 = vpop.f32.mrf.mxu1 }
 0x67d   : > { %5245 = vst [vmem:[%s11036_s14 + $0x40] sm:$0xff] %v5229_v23  ;;  %v5008_v20 = vadd.f32 %v5007_v42, %v4959_v17  ;;  %v4913_v22 = vadd.f32 %v4912_v25, %v4863_v10 }
 0x67f   : > { %v5194_v36 = vmax.f32 %v10982_v56, %v5008_v20 }
 0x681   : > { %v5214_v0 = vadd.f32 %v11028_v13, %v5194_v36 }
 0x682   : > { %v4961_v26 = vpop.f32.mrf.mxu2 }
 0x683   : > { %v5230_v35 = vmax.f32 %v5214_v0, 0.0  ;;  %v4962_v6 = vadd.f32 %v4961_v26, %v4913_v22  ;;  %v5010_v45 = vpop.f32.mrf.mxu3  ;;  %v4865_v12 = vpop.f32.mrf.mxu0 }
 0x684   : > { %v4914_v7 = vpop.f32.mrf.mxu1 }
 0x685   : > { %5246 = vst [vmem:[%s11036_s14 + $0x48] sm:$0xff] %v5230_v35  ;;  %v5011_v55 = vadd.f32 %v5010_v45, %v4962_v6  ;;  %v4915_v33 = vadd.f32 %v4914_v7, %v4865_v12 }
 0x687   : > { %v5195_v60 = vmax.f32 %v10990_v16, %v5011_v55 }
 0x689   : > { %v5215_v15 = vadd.f32 %v11028_v13, %v5195_v60 }
 0x68a   : > { %v4963_v9 = vpop.f32.mrf.mxu2 }
 0x68b   : > { %v5231_v3 = vmax.f32 %v5215_v15, 0.0  ;;  %v4964_v56 = vadd.f32 %v4963_v9, %v4915_v33  ;;  %v5012_v29 = vpop.f32.mrf.mxu3  ;;  %v4868_v28 = vpop.f32.mrf.mxu0 }
 0x68c   : > { %v4917_v43 = vpop.f32.mrf.mxu1 }
 0x68d   : > { %5247 = vst [vmem:[%s11036_s14 + $0x50] sm:$0xff] %v5231_v3  ;;  %v5013_v5 = vadd.f32 %v5012_v29, %v4964_v56  ;;  %v4918_v46 = vadd.f32 %v4917_v43, %v4868_v28 }
 0x68f   : > { %v5196_v21 = vmax.f32 %v10996_v53, %v5013_v5 }
 0x691   : > { %v5216_v2 = vadd.f32 %v11028_v13, %v5196_v21 }
 0x692   : > { %v4966_v39 = vpop.f32.mrf.mxu2 }
 0x693   : > { %v5232_v31 = vmax.f32 %v5216_v2, 0.0  ;;  %v4967_v16 = vadd.f32 %v4966_v39, %v4918_v46  ;;  %v5015_v18 = vpop.f32.mrf.mxu3  ;;  %v4870_v32 = vpop.f32.mrf.mxu0 }
 0x694   : > { %v4919_v47 = vpop.f32.mrf.mxu1 }
 0x695   : > { %5248 = vst [vmem:[%s11036_s14 + $0x58] sm:$0xff] %v5232_v31  ;;  %v5016_v38 = vadd.f32 %v5015_v18, %v4967_v16  ;;  %v4920_v49 = vadd.f32 %v4919_v47, %v4870_v32 }
 0x697   : > { %v5197_v48 = vmax.f32 %v11004_v19, %v5016_v38 }
 0x699   : > { %v5217_v63 = vadd.f32 %v11028_v13, %v5197_v48 }
 0x69a   : > { %v4968_v61 = vpop.f32.mrf.mxu2 }
 0x69b   : > { %v5233_v53 = vmax.f32 %v5217_v63, 0.0  ;;  %v4969_v27 = vadd.f32 %v4968_v61, %v4920_v49  ;;  %v5017_v30 = vpop.f32.mrf.mxu3  ;;  %v4873_v44 = vpop.f32.mrf.mxu0 }
 0x69c   : > { %v4922_v52 = vpop.f32.mrf.mxu1 }
 0x69d   : > { %5249 = vst [vmem:[%s11036_s14 + $0x60] sm:$0xff] %v5233_v53  ;;  %v5018_v50 = vadd.f32 %v5017_v30, %v4969_v27  ;;  %v4923_v59 = vadd.f32 %v4922_v52, %v4873_v44 }
 0x69f   : > { %v5198_v40 = vmax.f32 %v11010_v54, %v5018_v50 }
 0x6a1   : > { %v5218_v14 = vadd.f32 %v11028_v13, %v5198_v40 }
 0x6a2   : > { %v4971_v4 = vpop.f32.mrf.mxu2 }
 0x6a3   : > { %v5234_v19 = vmax.f32 %v5218_v14, 0.0  ;;  %v4972_v57 = vadd.f32 %v4971_v4, %v4923_v59  ;;  %v5020_v41 = vpop.f32.mrf.mxu3  ;;  %v4875_v24 = vpop.f32.mrf.mxu0 }
 0x6a4   : > { %v4924_v51 = vpop.f32.mrf.mxu1 }
 0x6a5   : > { %5250 = vst [vmem:[%s11036_s14 + $0x68] sm:$0xff] %v5234_v19  ;;  %v5021_v34 = vadd.f32 %v5020_v41, %v4972_v57  ;;  %v4925_v62 = vadd.f32 %v4924_v51, %v4875_v24 }
 0x6a7   : > { %v5199_v37 = vmax.f32 %v11018_v11, %v5021_v34 }
 0x6a9   : > { %v5219_v1 = vadd.f32 %v11028_v13, %v5199_v37 }
 0x6aa   : > { %v4973_v58 = vpop.f32.mrf.mxu2 }
 0x6ab   : > { %v5235_v54 = vmax.f32 %v5219_v1, 0.0  ;;  %v4974_v23 = vadd.f32 %v4973_v58, %v4925_v62  ;;  %v5022_v17 = vpop.f32.mrf.mxu3 }
 0x6ad   : > { %5251 = vst [vmem:[%s11036_s14 + $0x70] sm:$0xff] %v5235_v54  ;;  %v5023_v42 = vadd.f32 %v5022_v17, %v4974_v23 }
 0x6af   : > { %v5200_v10 = vmax.f32 %v11023_v8, %v5023_v42 }
 0x6b1   : > { %v5220_v25 = vadd.f32 %v11028_v13, %v5200_v10 }
 0x6b3   : > { %v5236_v20 = vmax.f32 %v5220_v25, 0.0 }
 0x6b5   : > { %5252 = vst [vmem:[%s11036_s14 + $0x78] sm:$0xff] %v5236_v20 }
 0x6b6 PF: > { %s13_s12 = sadd.s32 1, %s7417_s12  }
 0x6b7   : > { %p10_p4 = scmp.ge.s32.totalorder %s13_s12, 4  }
 0x6b9   :  { %12 = sbr.rel (!%p10_p4) target bundleno = 1 (0x1), region = 62 }

</bundles_post_ra>
